<compile_context>
chip_gen: v7x
topology: tpu7x:2x2x1
jax: 0.10.0
libtpu: 0.0.40
codegen_flags: <defaults>
</compile_context>

<pallas_src>
import functools

import numpy as np
import jax
import jax.numpy as jnp
from jax.experimental import pallas as pl
from jax.experimental.pallas import tpu as pltpu

_EPS = 1e-5
_LANE = 128


def _round_up(x, m):
    return (x + m - 1) // m * m


def _vmem_caps():
    """Generation-aware VMEM sizing: (vmem_limit_bytes, per-step working-set budget)."""
    cap = 64 * 1024 * 1024                        # conservative default (v7x-sized)
    try:
        cap = int(getattr(pltpu.get_tpu_info(), "vmem_capacity_bytes", cap))
    except Exception:
        pass
    return int(cap * 3 // 4), int(cap * 9 // 20)  # limit ~75% of physical, budget ~45%


def _conv_working_set(th, w, cin, npad):
    """Rough per-grid-step VMEM working set (bytes) for the conv kernel."""
    return (2 * th * w * cin * 2            # input row tile (bf16, double buffered)
            + 2 * 2 * w * cin * 2           # two 1-row halos (double buffered)
            + 2 * 9 * cin * npad * 2        # weights (conservatively x2)
            + 2 * th * w * npad * 2         # y output tile (bf16, double buffered)
            + 2 * 2 * npad * 4              # stats tile
            + (th + 2) * w * 3 * cin * 2    # dx-stacked im2col scratch
            + 2 * th * w * npad * 4)        # live f32 accumulator values / spill


# ----------------------------- Pallas kernels -------------------------------

def _conv3x3_kernel(x_ref, xu_ref, xd_ref, sc_ref, sh_ref, w_ref,
                    y_ref, st_ref, wbuf_ref, *, th, w_img, cin, npad, apply_act):
    """(optional BN scale/shift + ReLU on the input) + 3x3 'same' conv for one
    (batch, row-tile) grid cell.

    x_ref : (1, th, W, Cin) bf16  rows [t*th, (t+1)*th) of the UNPADDED input
    xu_ref: (1, 1,  W, Cin) bf16  row just above the tile (clamped; zeroed at t==0)
    xd_ref: (1, 1,  W, Cin) bf16  row just below the tile (clamped; zeroed at t==T-1)
    sc_ref/sh_ref: (1, Cin) f32   BN scale/shift applied to the input iff apply_act
    w_ref : (3, 3*Cin, Npad) bf16 w[dy, dx*Cin+ci, co]
    y_ref : (1, th, W, Npad) bf16 pre-BN conv output
    st_ref: (1, 1, 2, Npad) f32   per-tile [sum(y), sum(y*y)] from the f32 accumulator
    wbuf_ref: VMEM (th+2, W, 3*Cin) bf16 dx-stacked im2col; the center lane block also
              serves as the zero-padded activation slab.
    """
    t = pl.program_id(1)
    last_t = pl.num_programs(1) - 1

    if apply_act:
        sc = sc_ref[0, :].reshape(1, 1, cin)
        sh = sh_ref[0, :].reshape(1, 1, cin)

    def act(v):
        if not apply_act:
            return v
        return jnp.maximum(v.astype(jnp.float32) * sc + sh, 0.0).astype(jnp.bfloat16)

    c1, c2 = cin, 2 * cin

    # --- center (dx=1) lane block doubles as the activation slab -----------------
    wbuf_ref[0:1, :, c1:c2] = act(xu_ref[0])
    wbuf_ref[1:th + 1, :, c1:c2] = act(x_ref[0])
    wbuf_ref[th + 1:th + 2, :, c1:c2] = act(xd_ref[0])

    zrow = jnp.zeros((1, w_img, cin), jnp.bfloat16)

    @pl.when(t == 0)
    def _():                                   # top image border -> zero padding row
        wbuf_ref[0:1, :, c1:c2] = zrow

    @pl.when(t == last_t)
    def _():                                   # bottom image border -> zero padding row
        wbuf_ref[th + 1:th + 2, :, c1:c2] = zrow

    # --- dx=0 / dx=2 lane blocks: width-shifted copies, zero side columns --------
    s = wbuf_ref[:, :, c1:c2]                  # (th+2, W, Cin)
    zcol = jnp.zeros((th + 2, 1, cin), jnp.bfloat16)
    wbuf_ref[:, 0:1, 0:cin] = zcol
    wbuf_ref[:, 1:w_img, 0:cin] = s[:, 0:w_img - 1, :]
    wbuf_ref[:, w_img - 1:w_img, c2:c2 + cin] = zcol
    wbuf_ref[:, 0:w_img - 1, c2:c2 + cin] = s[:, 1:w_img, :]

    # --- three K=3*Cin matmuls (one per dy), accumulated as values ----------------
    acc = jnp.dot(wbuf_ref[0:th].reshape(th * w_img, 3 * cin), w_ref[0],
                  preferred_element_type=jnp.float32)
    acc = acc + jnp.dot(wbuf_ref[1:th + 1].reshape(th * w_img, 3 * cin), w_ref[1],
                        preferred_element_type=jnp.float32)
    acc = acc + jnp.dot(wbuf_ref[2:th + 2].reshape(th * w_img, 3 * cin), w_ref[2],
                        preferred_element_type=jnp.float32)

    # --- per-tile BatchNorm statistics from the f32 accumulator -------------------
    st_ref[0, 0, 0:1, :] = jnp.sum(acc, axis=0, keepdims=True)
    st_ref[0, 0, 1:2, :] = jnp.sum(acc * acc, axis=0, keepdims=True)
    y_ref[...] = acc.astype(y_ref.dtype).reshape(1, th, w_img, npad)


def _bn_relu_kernel(y_ref, sc_ref, sh_ref, o_ref):
    # y: (rows, Npad) bf16; sc/sh: (1, Npad) f32; lane-dense output in o_ref.dtype.
    o_ref[...] = jnp.maximum(
        y_ref[...].astype(jnp.float32) * sc_ref[...] + sh_ref[...], 0.0
    ).astype(o_ref.dtype)


# --------------------------- conv pass wrapper --------------------------------

def _pick_row_tile(batch, h, w, cin, npad, budget, min_steps=8):
    """Largest divisor of h whose working set fits the budget, shrunk (if possible)
    so the grid has >= min_steps steps for pipelining / megacore sharding."""
    divs = [d for d in range(1, h + 1) if h % d == 0]
    fits = [d for d in divs if _conv_working_set(d, w, cin, npad) <= budget] or [divs[0]]
    th = max(fits)
    for d in sorted(fits, reverse=True):
        if batch * (h // d) >= min_steps:
            th = d
            break
    return th


def _conv3x3(x, w3, scale_in, shift_in, apply_act, vmem_limit, budget):
    """3x3 'same' conv, optionally fused with an input scale/shift + ReLU.

    x: (B, H, W, Cin) bf16, spatially unpadded; w3: (3, 3*Cin, Npad) bf16.
    Returns (y, stats): y (B, H, W, Npad) bf16 pre-BN output,
    stats (B, T, 2, Npad) f32 per-tile [sum, sum_sq]."""
    B, H, W, Cin = x.shape
    Npad = w3.shape[-1]
    assert w3.shape == (3, 3 * Cin, Npad), (w3.shape, Cin, Npad)

    th = _pick_row_tile(B, H, W, Cin, Npad, budget)
    if _conv_working_set(th, W, Cin, Npad) > vmem_limit:
        raise ValueError(
            f"conv3x3 tile (th={th}, W={W}, Cin={Cin}, Npad={Npad}) working set "
            f"exceeds the VMEM limit ({vmem_limit} bytes)")
    T = H // th

    kern = functools.partial(_conv3x3_kernel, th=th, w_img=W, cin=Cin,
                             npad=Npad, apply_act=apply_act)
    y, stats = pl.pallas_call(
        kern,
        grid=(B, T),
        in_specs=[
            pl.BlockSpec((1, th, W, Cin), lambda b, t: (b, t, 0, 0)),
            pl.BlockSpec((1, 1, W, Cin),
                         lambda b, t: (b, jnp.maximum(t * th - 1, 0), 0, 0)),
            pl.BlockSpec((1, 1, W, Cin),
                         lambda b, t: (b, jnp.minimum((t + 1) * th, H - 1), 0, 0)),
            pl.BlockSpec((1, Cin), lambda b, t: (0, 0)),
            pl.BlockSpec((1, Cin), lambda b, t: (0, 0)),
            pl.BlockSpec((3, 3 * Cin, Npad), lambda b, t: (0, 0, 0)),   # resident weights
        ],
        out_specs=(
            pl.BlockSpec((1, th, W, Npad), lambda b, t: (b, t, 0, 0)),
            pl.BlockSpec((1, 1, 2, Npad), lambda b, t: (b, t, 0, 0)),
        ),
        out_shape=(
            jax.ShapeDtypeStruct((B, H, W, Npad), jnp.bfloat16),
            jax.ShapeDtypeStruct((B, T, 2, Npad), jnp.float32),
        ),
        scratch_shapes=[pltpu.VMEM((th + 2, W, 3 * Cin), jnp.bfloat16)],
        compiler_params=pltpu.CompilerParams(
            dimension_semantics=("parallel", "parallel"),
            vmem_limit_bytes=vmem_limit),
    )(x, x, x, scale_in, shift_in, w3)
    return y, stats


def _bn_scale_shift(stats, gamma, beta, count, npad):
    """Training-mode BatchNorm (biased variance, eps=1e-5) -> per-channel scale/shift."""
    s = jnp.sum(stats.astype(jnp.float32), axis=(0, 1))        # (2, Npad)
    mean = s[0] / count
    var = jnp.maximum(s[1] / count - mean * mean, 0.0)
    cout = gamma.shape[0]
    g = jnp.zeros((npad,), jnp.float32).at[:cout].set(gamma.astype(jnp.float32))
    b = jnp.zeros((npad,), jnp.float32).at[:cout].set(beta.astype(jnp.float32))
    scale = g * jax.lax.rsqrt(var + _EPS)
    shift = b - mean * scale
    return scale, shift


def _pick_bn_rows(n, cap=4096):
    best = None
    r = 8
    while r <= min(n, cap):
        if n % r == 0:
            best = r
        r += 8
    return best if best is not None else n


def _bn_relu_apply(y, scale, shift, out_dtype, vmem_limit):
    """Final BN scale/shift + ReLU over (B,H,W,Npad) with large flattened blocks."""
    B, H, W, Npad = y.shape
    n = B * H * W
    rows = _pick_bn_rows(n)
    out = pl.pallas_call(
        _bn_relu_kernel,
        grid=(n // rows,),
        in_specs=[pl.BlockSpec((rows, Npad), lambda i: (i, 0)),
                  pl.BlockSpec((1, Npad), lambda i: (0, 0)),
                  pl.BlockSpec((1, Npad), lambda i: (0, 0))],
        out_specs=pl.BlockSpec((rows, Npad), lambda i: (i, 0)),
        out_shape=jax.ShapeDtypeStruct((n, Npad), out_dtype),
        compiler_params=pltpu.CompilerParams(
            dimension_semantics=("parallel",),
            vmem_limit_bytes=vmem_limit),
    )(y.reshape(n, Npad), scale.reshape(1, Npad), shift.reshape(1, Npad))
    return out.reshape(B, H, W, Npad)


# ------------------------------- XLA glue ------------------------------------

def _interp_matrix(n_in):
    """Row-interpolation matrix for 2x bilinear upsample, align_corners=True."""
    n_out = 2 * n_in
    if n_in == 1:
        return jnp.ones((n_out, 1), jnp.float32)
    src = np.arange(n_out, dtype=np.float64) * (n_in - 1) / (n_out - 1)
    lo = np.clip(np.floor(src).astype(np.int64), 0, n_in - 2)
    frac = (src - lo).astype(np.float32)
    m = np.zeros((n_out, n_in), np.float32)
    m[np.arange(n_out), lo] += 1.0 - frac
    m[np.arange(n_out), lo + 1] += frac
    return jnp.asarray(m)


def bilinear_up2x(x):  # NHWC, == nn.Upsample(scale_factor=2, 'bilinear', align_corners=True)
    B, H, W, C = x.shape
    y = jnp.einsum('oh,bhwc->bowc', _interp_matrix(H), x)
    y = jnp.einsum('pw,bowc->bopc', _interp_matrix(W), y)
    return y


# ------------------------------ Up forward -----------------------------------

def up_forward(params, x1, x2):
    """Up.forward(x1, x2): x1 (NCHW) is 2x-upsampled, concatenated with skip x2 (NCHW),
    then passed through DoubleConv (conv-BN-ReLU x2, training-mode batch stats)."""
    x1 = jnp.transpose(x1, (0, 2, 3, 1)).astype(jnp.float32)   # NHWC
    x2 = jnp.transpose(x2, (0, 2, 3, 1)).astype(jnp.float32)
    # TODO(synk): bilinear upsample / channel concat / NCHW<->NHWC transposes stay as XLA glue.
    x1u = bilinear_up2x(x1)

    cin1p = params['w1'].shape[1] // 3
    B, H, W, _ = x2.shape
    cin_raw = x2.shape[-1] + x1u.shape[-1]
    pieces = [x2, x1u]
    if cin1p > cin_raw:                                         # lane-pad conv1's Cin
        pieces.append(jnp.zeros((B, H, W, cin1p - cin_raw), jnp.float32))
    x = jnp.concatenate(pieces, axis=-1).astype(jnp.bfloat16)   # torch.cat([x2, x1], 1)

    vmem_limit, budget = _vmem_caps()
    count = jnp.float32(B * H * W)
    npad = params['w1'].shape[-1]
    cout = params['g2'].shape[0]

    # conv1: raw concat input -> pre-BN bf16 output + batch stats
    ones = jnp.ones((1, cin1p), jnp.float32)
    zeros = jnp.zeros((1, cin1p), jnp.float32)
    y1, s1 = _conv3x3(x, params['w1'], ones, zeros, False, vmem_limit, budget)
    sc1, sh1 = _bn_scale_shift(s1, params['g1'], params['b1'], count, npad)

    # conv2: BN1 + ReLU (and the zero padding) fused into the conv kernel's input path
    y2, s2 = _conv3x3(y1, params['w2'], sc1.reshape(1, npad), sh1.reshape(1, npad),
                      True, vmem_limit, budget)
    sc2, sh2 = _bn_scale_shift(s2, params['g2'], params['b2'], count, npad)

    a2 = _bn_relu_apply(y2, sc2, sh2, jnp.float32, vmem_limit)
    return jnp.transpose(a2[..., :cout], (0, 3, 1, 2))          # NCHW


# --------------------------- parameter initialization ------------------------

def _prep_conv_weight(w_hwio, cin_pad, npad):
    """(3,3,Cin,Cout) f32 -> (3, 3*cin_pad, npad) bf16 (dy, dx-major/ci-minor, co)."""
    _, _, cin, cout = w_hwio.shape
    w = jnp.zeros((3, 3, cin_pad, npad), jnp.float32)
    w = w.at[:, :, :cin, :cout].set(w_hwio)
    return w.reshape(3, 3 * cin_pad, npad).astype(jnp.bfloat16)


def init_up_params(key, in_channels, out_channels):
    """Matches Up(in_channels, out_channels, bilinear=True): DoubleConv(in, out)."""
    npad = _round_up(out_channels, _LANE)
    cin1p = _round_up(in_channels, _LANE)
    k1, k2 = jax.random.split(key)

    def conv_w(k, cin, cout):
        std = (2.0 / (9 * cin)) ** 0.5
        return jax.random.normal(k, (3, 3, cin, cout), jnp.float32) * std

    return dict(
        w1=_prep_conv_weight(conv_w(k1, in_channels, out_channels), cin1p, npad),
        g1=jnp.ones((out_channels,), jnp.float32),              # BN gamma (torch default)
        b1=jnp.zeros((out_channels,), jnp.float32),              # BN beta
        # conv2 consumes the channel-padded activation -> its Cin is npad
        w2=_prep_conv_weight(conv_w(k2, out_channels, out_channels), npad, npad),
        g2=jnp.ones((out_channels,), jnp.float32),
        b2=jnp.zeros((out_channels,), jnp.float32),
    )


# ---------------------------------- main --------------------------------------

if __name__ == "__main__":
    key = jax.random.PRNGKey(0)
    kp, ka, kb = jax.random.split(key, 3)

    B, H, W = 2, 16, 16
    c_skip, c_up, c_out = 64, 64, 64            # Up(in_channels=128, out_channels=64)
    params = init_up_params(kp, c_skip + c_up, c_out)

    x1 = jax.random.normal(ka, (B, c_up, H // 2, W // 2), jnp.float32)  # to be upsampled
    x2 = jax.random.normal(kb, (B, c_skip, H, W), jnp.float32)          # skip connection

    out = jax.jit(up_forward)(params, x1, x2)
    jax.block_until_ready(out)
    assert out.shape == (B, c_out, H, W), out.shape
    assert bool(jnp.all(jnp.isfinite(out)))
    print("KERNEL_OK")
</pallas_src>

<mosaic_0001>
module attributes {stable_mosaic.version = 11 : i64} {
  func.func @_conv3x3_kernel(%arg0: i32, %arg1: i32, %arg2: memref<1x4x16x128xbf16, #tpu.memory_space<vmem>>, %arg3: memref<1x1x16x128xbf16, #tpu.memory_space<vmem>>, %arg4: memref<1x1x16x128xbf16, #tpu.memory_space<vmem>>, %arg5: memref<1x128xf32, #tpu.memory_space<vmem>>, %arg6: memref<1x128xf32, #tpu.memory_space<vmem>>, %arg7: memref<3x384x128xbf16, #tpu.memory_space<vmem>>, %arg8: memref<1x4x16x128xbf16, #tpu.memory_space<vmem>>, %arg9: memref<1x1x2x128xf32, #tpu.memory_space<vmem>>, %arg10: memref<6x16x384xbf16, #tpu.memory_space<vmem>>) attributes {dimension_semantics = [#tpu.dimension_semantics<parallel>, #tpu.dimension_semantics<parallel>], iteration_bounds = array<i64: 2, 4>, scalar_prefetch = 0 : i64, scratch_operands = 1 : i64, tpu.core_type = #tpu.core_type<tc>, window_params = [{transform_indices = @transform_0, window_bounds = array<i64: 1, 4, 16, 128>}, {transform_indices = @transform_1, window_bounds = array<i64: 1, 1, 16, 128>}, {transform_indices = @transform_2, window_bounds = array<i64: 1, 1, 16, 128>}, {pipeline_mode = #tpu.pipeline_mode<synchronous>, transform_indices = @transform_3, window_bounds = array<i64: 1, 128>}, {pipeline_mode = #tpu.pipeline_mode<synchronous>, transform_indices = @transform_4, window_bounds = array<i64: 1, 128>}, {pipeline_mode = #tpu.pipeline_mode<synchronous>, transform_indices = @transform_5, window_bounds = array<i64: 3, 384, 128>}, {transform_indices = @transform_6, window_bounds = array<i64: 1, 4, 16, 128>}, {transform_indices = @transform_7, window_bounds = array<i64: 1, 1, 2, 128>}]} {
    %c0 = arith.constant 0 : index
    %c0_0 = arith.constant 0 : index
    %c0_1 = arith.constant 0 : index
    %c0_2 = arith.constant 0 : index
    %0 = vector.load %arg3[%c0, %c0_0, %c0_1, %c0_2] : memref<1x1x16x128xbf16, #tpu.memory_space<vmem>>, vector<1x1x16x128xbf16>
    %1 = vector.shape_cast %0 : vector<1x1x16x128xbf16> to vector<1x16x128xbf16>
    %c0_3 = arith.constant 0 : index
    %c0_4 = arith.constant 0 : index
    %c128 = arith.constant 128 : index
    %2 = vector.load %arg10[%c0_3, %c0_4, %c128] : memref<6x16x384xbf16, #tpu.memory_space<vmem>>, vector<1x16x128xbf16>
    tpu.vector_store %arg10[%c0_3, %c0_4, %c128], %1 {strides = array<i32>} : memref<6x16x384xbf16, #tpu.memory_space<vmem>>, vector<1x16x128xbf16>,
    %c0_5 = arith.constant 0 : index
    %c0_6 = arith.constant 0 : index
    %c0_7 = arith.constant 0 : index
    %c0_8 = arith.constant 0 : index
    %3 = vector.load %arg2[%c0_5, %c0_6, %c0_7, %c0_8] : memref<1x4x16x128xbf16, #tpu.memory_space<vmem>>, vector<1x4x16x128xbf16>
    %4 = vector.shape_cast %3 : vector<1x4x16x128xbf16> to vector<4x16x128xbf16>
    %c1 = arith.constant 1 : index
    %c0_9 = arith.constant 0 : index
    %c128_10 = arith.constant 128 : index
    %5 = vector.load %arg10[%c1, %c0_9, %c128_10] : memref<6x16x384xbf16, #tpu.memory_space<vmem>>, vector<4x16x128xbf16>
    tpu.vector_store %arg10[%c1, %c0_9, %c128_10], %4 {strides = array<i32>} : memref<6x16x384xbf16, #tpu.memory_space<vmem>>, vector<4x16x128xbf16>,
    %c0_11 = arith.constant 0 : index
    %c0_12 = arith.constant 0 : index
    %c0_13 = arith.constant 0 : index
    %c0_14 = arith.constant 0 : index
    %6 = vector.load %arg4[%c0_11, %c0_12, %c0_13, %c0_14] : memref<1x1x16x128xbf16, #tpu.memory_space<vmem>>, vector<1x1x16x128xbf16>
    %7 = vector.shape_cast %6 : vector<1x1x16x128xbf16> to vector<1x16x128xbf16>
    %c5 = arith.constant 5 : index
    %c0_15 = arith.constant 0 : index
    %c128_16 = arith.constant 128 : index
    %8 = vector.load %arg10[%c5, %c0_15, %c128_16] : memref<6x16x384xbf16, #tpu.memory_space<vmem>>, vector<1x16x128xbf16>
    tpu.vector_store %arg10[%c5, %c0_15, %c128_16], %7 {strides = array<i32>} : memref<6x16x384xbf16, #tpu.memory_space<vmem>>, vector<1x16x128xbf16>,
    %cst = arith.constant 0.000000e+00 : bf16
    %9 = vector.broadcast %cst : bf16 to vector<1x16x128xbf16>
    %c0_i32 = arith.constant 0 : i32
    %10 = arith.cmpi eq, %arg1, %c0_i32 : i32
    %11 = arith.extui %10 : i1 to i32
    %c0_i32_17 = arith.constant 0 : i32
    %12 = arith.cmpi ne, %11, %c0_i32_17 : i32
    scf.if %12 {
      %c0_67 = arith.constant 0 : index
      %c0_68 = arith.constant 0 : index
      %c128_69 = arith.constant 128 : index
      %55 = vector.load %arg10[%c0_67, %c0_68, %c128_69] : memref<6x16x384xbf16, #tpu.memory_space<vmem>>, vector<1x16x128xbf16>
      tpu.vector_store %arg10[%c0_67, %c0_68, %c128_69], %9 {strides = array<i32>} : memref<6x16x384xbf16, #tpu.memory_space<vmem>>, vector<1x16x128xbf16>,
    } else {
    }
    %c3_i32 = arith.constant 3 : i32
    %13 = arith.cmpi eq, %arg1, %c3_i32 : i32
    %14 = arith.extui %13 : i1 to i32
    %c0_i32_18 = arith.constant 0 : i32
    %15 = arith.cmpi ne, %14, %c0_i32_18 : i32
    scf.if %15 {
      %c5_67 = arith.constant 5 : index
      %c0_68 = arith.constant 0 : index
      %c128_69 = arith.constant 128 : index
      %55 = vector.load %arg10[%c5_67, %c0_68, %c128_69] : memref<6x16x384xbf16, #tpu.memory_space<vmem>>, vector<1x16x128xbf16>
      tpu.vector_store %arg10[%c5_67, %c0_68, %c128_69], %9 {strides = array<i32>} : memref<6x16x384xbf16, #tpu.memory_space<vmem>>, vector<1x16x128xbf16>,
    } else {
    }
    %c0_19 = arith.constant 0 : index
    %c0_20 = arith.constant 0 : index
    %c128_21 = arith.constant 128 : index
    %16 = vector.load %arg10[%c0_19, %c0_20, %c128_21] : memref<6x16x384xbf16, #tpu.memory_space<vmem>>, vector<6x16x128xbf16>
    %cst_22 = arith.constant 0.000000e+00 : bf16
    %17 = vector.broadcast %cst_22 : bf16 to vector<6x1x128xbf16>
    %c0_23 = arith.constant 0 : index
    %c0_24 = arith.constant 0 : index
    %c0_25 = arith.constant 0 : index
    %18 = vector.load %arg10[%c0_23, %c0_24, %c0_25] : memref<6x16x384xbf16, #tpu.memory_space<vmem>>, vector<6x1x128xbf16>
    tpu.vector_store %arg10[%c0_23, %c0_24, %c0_25], %17 {strides = array<i32>} : memref<6x16x384xbf16, #tpu.memory_space<vmem>>, vector<6x1x128xbf16>,
    %19 = vector.extract_strided_slice %16 {offsets = [0, 0, 0], sizes = [6, 15, 128], strides = [1, 1, 1]} : vector<6x16x128xbf16> to vector<6x15x128xbf16>
    %c0_26 = arith.constant 0 : index
    %c1_27 = arith.constant 1 : index
    %c0_28 = arith.constant 0 : index
    %20 = vector.load %arg10[%c0_26, %c1_27, %c0_28] : memref<6x16x384xbf16, #tpu.memory_space<vmem>>, vector<6x15x128xbf16>
    tpu.vector_store %arg10[%c0_26, %c1_27, %c0_28], %19 {strides = array<i32>} : memref<6x16x384xbf16, #tpu.memory_space<vmem>>, vector<6x15x128xbf16>,
    %c0_29 = arith.constant 0 : index
    %c15 = arith.constant 15 : index
    %c256 = arith.constant 256 : index
    %21 = vector.load %arg10[%c0_29, %c15, %c256] : memref<6x16x384xbf16, #tpu.memory_space<vmem>>, vector<6x1x128xbf16>
    tpu.vector_store %arg10[%c0_29, %c15, %c256], %17 {strides = array<i32>} : memref<6x16x384xbf16, #tpu.memory_space<vmem>>, vector<6x1x128xbf16>,
    %22 = vector.extract_strided_slice %16 {offsets = [0, 1, 0], sizes = [6, 15, 128], strides = [1, 1, 1]} : vector<6x16x128xbf16> to vector<6x15x128xbf16>
    %c0_30 = arith.constant 0 : index
    %c0_31 = arith.constant 0 : index
    %c256_32 = arith.constant 256 : index
    %23 = vector.load %arg10[%c0_30, %c0_31, %c256_32] : memref<6x16x384xbf16, #tpu.memory_space<vmem>>, vector<6x15x128xbf16>
    tpu.vector_store %arg10[%c0_30, %c0_31, %c256_32], %22 {strides = array<i32>} : memref<6x16x384xbf16, #tpu.memory_space<vmem>>, vector<6x15x128xbf16>,
    %c0_33 = arith.constant 0 : index
    %c0_34 = arith.constant 0 : index
    %c0_35 = arith.constant 0 : index
    %24 = vector.load %arg10[%c0_33, %c0_34, %c0_35] : memref<6x16x384xbf16, #tpu.memory_space<vmem>>, vector<4x16x384xbf16>
    %25 = vector.shape_cast %24 : vector<4x16x384xbf16> to vector<64x384xbf16>
    %c0_36 = arith.constant 0 : index
    %c0_37 = arith.constant 0 : index
    %c0_38 = arith.constant 0 : index
    %26 = vector.load %arg7[%c0_36, %c0_37, %c0_38] : memref<3x384x128xbf16, #tpu.memory_space<vmem>>, vector<1x384x128xbf16>
    %27 = vector.shape_cast %26 : vector<1x384x128xbf16> to vector<384x128xbf16>
    %cst_39 = arith.constant dense<0.000000e+00> : vector<64x128xf32>
    %28 = tpu.matmul %25, %27, %cst_39 {dimension_numbers = #tpu.dot_dimension_numbers<[1], [0], [0], [1], [0, 0, 1, 1], [], []>} : vector<64x384xbf16>, vector<384x128xbf16>, vector<64x128xf32> -> vector<64x128xf32>
    %c1_40 = arith.constant 1 : index
    %c0_41 = arith.constant 0 : index
    %c0_42 = arith.constant 0 : index
    %29 = vector.load %arg10[%c1_40, %c0_41, %c0_42] : memref<6x16x384xbf16, #tpu.memory_space<vmem>>, vector<4x16x384xbf16>
    %30 = vector.shape_cast %29 : vector<4x16x384xbf16> to vector<64x384xbf16>
    %c1_43 = arith.constant 1 : index
    %c0_44 = arith.constant 0 : index
    %c0_45 = arith.constant 0 : index
    %31 = vector.load %arg7[%c1_43, %c0_44, %c0_45] : memref<3x384x128xbf16, #tpu.memory_space<vmem>>, vector<1x384x128xbf16>
    %32 = vector.shape_cast %31 : vector<1x384x128xbf16> to vector<384x128xbf16>
    %cst_46 = arith.constant dense<0.000000e+00> : vector<64x128xf32>
    %33 = tpu.matmul %30, %32, %cst_46 {dimension_numbers = #tpu.dot_dimension_numbers<[1], [0], [0], [1], [0, 0, 1, 1], [], []>} : vector<64x384xbf16>, vector<384x128xbf16>, vector<64x128xf32> -> vector<64x128xf32>
    %34 = arith.addf %28, %33 : vector<64x128xf32>
    %c2 = arith.constant 2 : index
    %c0_47 = arith.constant 0 : index
    %c0_48 = arith.constant 0 : index
    %35 = vector.load %arg10[%c2, %c0_47, %c0_48] : memref<6x16x384xbf16, #tpu.memory_space<vmem>>, vector<4x16x384xbf16>
    %36 = vector.shape_cast %35 : vector<4x16x384xbf16> to vector<64x384xbf16>
    %c2_49 = arith.constant 2 : index
    %c0_50 = arith.constant 0 : index
    %c0_51 = arith.constant 0 : index
    %37 = vector.load %arg7[%c2_49, %c0_50, %c0_51] : memref<3x384x128xbf16, #tpu.memory_space<vmem>>, vector<1x384x128xbf16>
    %38 = vector.shape_cast %37 : vector<1x384x128xbf16> to vector<384x128xbf16>
    %cst_52 = arith.constant dense<0.000000e+00> : vector<64x128xf32>
    %39 = tpu.matmul %36, %38, %cst_52 {dimension_numbers = #tpu.dot_dimension_numbers<[1], [0], [0], [1], [0, 0, 1, 1], [], []>} : vector<64x384xbf16>, vector<384x128xbf16>, vector<64x128xf32> -> vector<64x128xf32>
    %40 = arith.addf %34, %39 : vector<64x128xf32>
    %cst_53 = arith.constant dense<0.000000e+00> : vector<128xf32>
    %41 = vector.multi_reduction <add>, %40, %cst_53 [0] : vector<64x128xf32> to vector<128xf32>
    %42 = vector.shape_cast %41 : vector<128xf32> to vector<1x128xf32>
    %c0_54 = arith.constant 0 : index
    %c0_55 = arith.constant 0 : index
    %c0_56 = arith.constant 0 : index
    %c0_57 = arith.constant 0 : index
    %43 = vector.load %arg9[%c0_54, %c0_55, %c0_56, %c0_57] : memref<1x1x2x128xf32, #tpu.memory_space<vmem>>, vector<1x1x1x128xf32>
    %44 = vector.shape_cast %43 : vector<1x1x1x128xf32> to vector<1x128xf32>
    %45 = vector.shape_cast %42 : vector<1x128xf32> to vector<1x1x1x128xf32>
    tpu.vector_store %arg9[%c0_54, %c0_55, %c0_56, %c0_57], %45 {strides = array<i32>} : memref<1x1x2x128xf32, #tpu.memory_space<vmem>>, vector<1x1x1x128xf32>,
    %46 = arith.mulf %40, %40 : vector<64x128xf32>
    %cst_58 = arith.constant dense<0.000000e+00> : vector<128xf32>
    %47 = vector.multi_reduction <add>, %46, %cst_58 [0] : vector<64x128xf32> to vector<128xf32>
    %48 = vector.shape_cast %47 : vector<128xf32> to vector<1x128xf32>
    %c0_59 = arith.constant 0 : index
    %c0_60 = arith.constant 0 : index
    %c1_61 = arith.constant 1 : index
    %c0_62 = arith.constant 0 : index
    %49 = vector.load %arg9[%c0_59, %c0_60, %c1_61, %c0_62] : memref<1x1x2x128xf32, #tpu.memory_space<vmem>>, vector<1x1x1x128xf32>
    %50 = vector.shape_cast %49 : vector<1x1x1x128xf32> to vector<1x128xf32>
    %51 = vector.shape_cast %48 : vector<1x128xf32> to vector<1x1x1x128xf32>
    tpu.vector_store %arg9[%c0_59, %c0_60, %c1_61, %c0_62], %51 {strides = array<i32>} : memref<1x1x2x128xf32, #tpu.memory_space<vmem>>, vector<1x1x1x128xf32>,
    %52 = arith.truncf %40 : vector<64x128xf32> to vector<64x128xbf16>
    %53 = vector.shape_cast %52 : vector<64x128xbf16> to vector<1x4x16x128xbf16>
    %c0_63 = arith.constant 0 : index
    %c0_64 = arith.constant 0 : index
    %c0_65 = arith.constant 0 : index
    %c0_66 = arith.constant 0 : index
    %54 = vector.load %arg8[%c0_63, %c0_64, %c0_65, %c0_66] : memref<1x4x16x128xbf16, #tpu.memory_space<vmem>>, vector<1x4x16x128xbf16>
    tpu.vector_store %arg8[%c0_63, %c0_64, %c0_65, %c0_66], %53 {strides = array<i32>} : memref<1x4x16x128xbf16, #tpu.memory_space<vmem>>, vector<1x4x16x128xbf16>,
    return
  }
  func.func @transform_0(%arg0: i32, %arg1: i32) -> (i32, i32, i32, i32) {
    %c0_i32 = arith.constant 0 : i32
    %c0_i32_0 = arith.constant 0 : i32
    %c0_i32_1 = arith.constant 0 : i32
    return %arg0, %arg1, %c0_i32, %c0_i32_0 : i32, i32, i32, i32
  }
  func.func @transform_1(%arg0: i32, %arg1: i32) -> (i32, i32, i32, i32) {
    %c4_i32 = arith.constant 4 : i32
    %0 = arith.muli %arg1, %c4_i32 : i32
    %c1_i32 = arith.constant 1 : i32
    %1 = arith.subi %0, %c1_i32 : i32
    %c0_i32 = arith.constant 0 : i32
    %2 = arith.maxsi %1, %c0_i32 : i32
    %c0_i32_0 = arith.constant 0 : i32
    %c0_i32_1 = arith.constant 0 : i32
    %c0_i32_2 = arith.constant 0 : i32
    return %arg0, %2, %c0_i32_0, %c0_i32_1 : i32, i32, i32, i32
  }
  func.func @transform_2(%arg0: i32, %arg1: i32) -> (i32, i32, i32, i32) {
    %c1_i32 = arith.constant 1 : i32
    %0 = arith.addi %arg1, %c1_i32 : i32
    %c4_i32 = arith.constant 4 : i32
    %1 = arith.muli %0, %c4_i32 : i32
    %c15_i32 = arith.constant 15 : i32
    %2 = arith.minsi %1, %c15_i32 : i32
    %c0_i32 = arith.constant 0 : i32
    %c0_i32_0 = arith.constant 0 : i32
    %c0_i32_1 = arith.constant 0 : i32
    return %arg0, %2, %c0_i32, %c0_i32_0 : i32, i32, i32, i32
  }
  func.func @transform_3(%arg0: i32, %arg1: i32) -> (i32, i32) {
    %c0_i32 = arith.constant 0 : i32
    %c0_i32_0 = arith.constant 0 : i32
    %c0_i32_1 = arith.constant 0 : i32
    return %c0_i32, %c0_i32_0 : i32, i32
  }
  func.func @transform_4(%arg0: i32, %arg1: i32) -> (i32, i32) {
    %c0_i32 = arith.constant 0 : i32
    %c0_i32_0 = arith.constant 0 : i32
    %c0_i32_1 = arith.constant 0 : i32
    return %c0_i32, %c0_i32_0 : i32, i32
  }
  func.func @transform_5(%arg0: i32, %arg1: i32) -> (i32, i32, i32) {
    %c0_i32 = arith.constant 0 : i32
    %c0_i32_0 = arith.constant 0 : i32
    %c0_i32_1 = arith.constant 0 : i32
    %c0_i32_2 = arith.constant 0 : i32
    return %c0_i32, %c0_i32_0, %c0_i32_1 : i32, i32, i32
  }
  func.func @transform_6(%arg0: i32, %arg1: i32) -> (i32, i32, i32, i32) {
    %c0_i32 = arith.constant 0 : i32
    %c0_i32_0 = arith.constant 0 : i32
    %c0_i32_1 = arith.constant 0 : i32
    return %arg0, %arg1, %c0_i32, %c0_i32_0 : i32, i32, i32, i32
  }
  func.func @transform_7(%arg0: i32, %arg1: i32) -> (i32, i32, i32, i32) {
    %c0_i32 = arith.constant 0 : i32
    %c0_i32_0 = arith.constant 0 : i32
    %c0_i32_1 = arith.constant 0 : i32
    return %arg0, %arg1, %c0_i32, %c0_i32_0 : i32, i32, i32, i32
  }
}

module attributes {stable_mosaic.version = 11 : i64} {
  func.func @_bn_relu_kernel(%arg0: i32, %arg1: memref<512x128xbf16, #tpu.memory_space<vmem>>, %arg2: memref<1x128xf32, #tpu.memory_space<vmem>>, %arg3: memref<1x128xf32, #tpu.memory_space<vmem>>, %arg4: memref<512x128xf32, #tpu.memory_space<vmem>>) attributes {dimension_semantics = [#tpu.dimension_semantics<parallel>], iteration_bounds = array<i64: 1>, scalar_prefetch = 0 : i64, scratch_operands = 0 : i64, tpu.core_type = #tpu.core_type<tc>, window_params = [{transform_indices = @transform_0, window_bounds = array<i64: 512, 128>}, {pipeline_mode = #tpu.pipeline_mode<synchronous>, transform_indices = @transform_1, window_bounds = array<i64: 1, 128>}, {pipeline_mode = #tpu.pipeline_mode<synchronous>, transform_indices = @transform_2, window_bounds = array<i64: 1, 128>}, {transform_indices = @transform_3, window_bounds = array<i64: 512, 128>}]} {
    %c0 = arith.constant 0 : index
    %c0_0 = arith.constant 0 : index
    %0 = vector.load %arg1[%c0, %c0_0] : memref<512x128xbf16, #tpu.memory_space<vmem>>, vector<512x128xbf16>
    %1 = arith.extf %0 : vector<512x128xbf16> to vector<512x128xf32>
    %c0_1 = arith.constant 0 : index
    %c0_2 = arith.constant 0 : index
    %2 = vector.load %arg2[%c0_1, %c0_2] : memref<1x128xf32, #tpu.memory_space<vmem>>, vector<1x128xf32>
    %3 = vector.broadcast %2 : vector<1x128xf32> to vector<512x128xf32>
    %4 = arith.mulf %1, %3 : vector<512x128xf32>
    %c0_3 = arith.constant 0 : index
    %c0_4 = arith.constant 0 : index
    %5 = vector.load %arg3[%c0_3, %c0_4] : memref<1x128xf32, #tpu.memory_space<vmem>>, vector<1x128xf32>
    %6 = vector.broadcast %5 : vector<1x128xf32> to vector<512x128xf32>
    %7 = arith.addf %4, %6 : vector<512x128xf32>
    %cst = arith.constant 0.000000e+00 : f32
    %8 = vector.broadcast %cst : f32 to vector<512x128xf32>
    %9 = arith.maximumf %7, %8 : vector<512x128xf32>
    %c0_5 = arith.constant 0 : index
    %c0_6 = arith.constant 0 : index
    %10 = vector.load %arg4[%c0_5, %c0_6] : memref<512x128xf32, #tpu.memory_space<vmem>>, vector<512x128xf32>
    tpu.vector_store %arg4[%c0_5, %c0_6], %9 {strides = array<i32>} : memref<512x128xf32, #tpu.memory_space<vmem>>, vector<512x128xf32>,
    return
  }
  func.func @transform_0(%arg0: i32) -> (i32, i32) {
    %c0_i32 = arith.constant 0 : i32
    %c0_i32_0 = arith.constant 0 : i32
    return %arg0, %c0_i32 : i32, i32
  }
  func.func @transform_1(%arg0: i32) -> (i32, i32) {
    %c0_i32 = arith.constant 0 : i32
    %c0_i32_0 = arith.constant 0 : i32
    %c0_i32_1 = arith.constant 0 : i32
    return %c0_i32, %c0_i32_0 : i32, i32
  }
  func.func @transform_2(%arg0: i32) -> (i32, i32) {
    %c0_i32 = arith.constant 0 : i32
    %c0_i32_0 = arith.constant 0 : i32
    %c0_i32_1 = arith.constant 0 : i32
    return %c0_i32, %c0_i32_0 : i32, i32
  }
  func.func @transform_3(%arg0: i32) -> (i32, i32) {
    %c0_i32 = arith.constant 0 : i32
    %c0_i32_0 = arith.constant 0 : i32
    return %arg0, %c0_i32 : i32, i32
  }
}

module attributes {stable_mosaic.version = 11 : i64} {
  func.func @_conv3x3_kernel(%arg0: i32, %arg1: i32, %arg2: memref<1x4x16x128xbf16, #tpu.memory_space<vmem>>, %arg3: memref<1x1x16x128xbf16, #tpu.memory_space<vmem>>, %arg4: memref<1x1x16x128xbf16, #tpu.memory_space<vmem>>, %arg5: memref<1x128xf32, #tpu.memory_space<vmem>>, %arg6: memref<1x128xf32, #tpu.memory_space<vmem>>, %arg7: memref<3x384x128xbf16, #tpu.memory_space<vmem>>, %arg8: memref<1x4x16x128xbf16, #tpu.memory_space<vmem>>, %arg9: memref<1x1x2x128xf32, #tpu.memory_space<vmem>>, %arg10: memref<6x16x384xbf16, #tpu.memory_space<vmem>>) attributes {dimension_semantics = [#tpu.dimension_semantics<parallel>, #tpu.dimension_semantics<parallel>], iteration_bounds = array<i64: 2, 4>, scalar_prefetch = 0 : i64, scratch_operands = 1 : i64, tpu.core_type = #tpu.core_type<tc>, window_params = [{transform_indices = @transform_0, window_bounds = array<i64: 1, 4, 16, 128>}, {transform_indices = @transform_1, window_bounds = array<i64: 1, 1, 16, 128>}, {transform_indices = @transform_2, window_bounds = array<i64: 1, 1, 16, 128>}, {pipeline_mode = #tpu.pipeline_mode<synchronous>, transform_indices = @transform_3, window_bounds = array<i64: 1, 128>}, {pipeline_mode = #tpu.pipeline_mode<synchronous>, transform_indices = @transform_4, window_bounds = array<i64: 1, 128>}, {pipeline_mode = #tpu.pipeline_mode<synchronous>, transform_indices = @transform_5, window_bounds = array<i64: 3, 384, 128>}, {transform_indices = @transform_6, window_bounds = array<i64: 1, 4, 16, 128>}, {transform_indices = @transform_7, window_bounds = array<i64: 1, 1, 2, 128>}]} {
    %c0 = arith.constant 0 : index
    %c0_0 = arith.constant 0 : index
    %0 = vector.load %arg5[%c0, %c0_0] : memref<1x128xf32, #tpu.memory_space<vmem>>, vector<1x128xf32>
    %1 = vector.shape_cast %0 : vector<1x128xf32> to vector<128xf32>
    %2 = vector.shape_cast %1 : vector<128xf32> to vector<1x1x128xf32>
    %c0_1 = arith.constant 0 : index
    %c0_2 = arith.constant 0 : index
    %3 = vector.load %arg6[%c0_1, %c0_2] : memref<1x128xf32, #tpu.memory_space<vmem>>, vector<1x128xf32>
    %4 = vector.shape_cast %3 : vector<1x128xf32> to vector<128xf32>
    %5 = vector.shape_cast %4 : vector<128xf32> to vector<1x1x128xf32>
    %c0_3 = arith.constant 0 : index
    %c0_4 = arith.constant 0 : index
    %c0_5 = arith.constant 0 : index
    %c0_6 = arith.constant 0 : index
    %6 = vector.load %arg3[%c0_3, %c0_4, %c0_5, %c0_6] : memref<1x1x16x128xbf16, #tpu.memory_space<vmem>>, vector<1x1x16x128xbf16>
    %7 = vector.shape_cast %6 : vector<1x1x16x128xbf16> to vector<1x16x128xbf16>
    %8 = arith.extf %7 : vector<1x16x128xbf16> to vector<1x16x128xf32>
    %9 = vector.broadcast %2 : vector<1x1x128xf32> to vector<1x16x128xf32>
    %10 = arith.mulf %8, %9 : vector<1x16x128xf32>
    %11 = vector.broadcast %5 : vector<1x1x128xf32> to vector<1x16x128xf32>
    %12 = arith.addf %10, %11 : vector<1x16x128xf32>
    %cst = arith.constant 0.000000e+00 : f32
    %13 = vector.broadcast %cst : f32 to vector<1x16x128xf32>
    %14 = arith.maximumf %12, %13 : vector<1x16x128xf32>
    %15 = arith.truncf %14 : vector<1x16x128xf32> to vector<1x16x128xbf16>
    %c0_7 = arith.constant 0 : index
    %c0_8 = arith.constant 0 : index
    %c128 = arith.constant 128 : index
    %16 = vector.load %arg10[%c0_7, %c0_8, %c128] : memref<6x16x384xbf16, #tpu.memory_space<vmem>>, vector<1x16x128xbf16>
    tpu.vector_store %arg10[%c0_7, %c0_8, %c128], %15 {strides = array<i32>} : memref<6x16x384xbf16, #tpu.memory_space<vmem>>, vector<1x16x128xbf16>,
    %c0_9 = arith.constant 0 : index
    %c0_10 = arith.constant 0 : index
    %c0_11 = arith.constant 0 : index
    %c0_12 = arith.constant 0 : index
    %17 = vector.load %arg2[%c0_9, %c0_10, %c0_11, %c0_12] : memref<1x4x16x128xbf16, #tpu.memory_space<vmem>>, vector<1x4x16x128xbf16>
    %18 = vector.shape_cast %17 : vector<1x4x16x128xbf16> to vector<4x16x128xbf16>
    %19 = arith.extf %18 : vector<4x16x128xbf16> to vector<4x16x128xf32>
    %20 = vector.broadcast %2 : vector<1x1x128xf32> to vector<4x16x128xf32>
    %21 = arith.mulf %19, %20 : vector<4x16x128xf32>
    %22 = vector.broadcast %5 : vector<1x1x128xf32> to vector<4x16x128xf32>
    %23 = arith.addf %21, %22 : vector<4x16x128xf32>
    %cst_13 = arith.constant 0.000000e+00 : f32
    %24 = vector.broadcast %cst_13 : f32 to vector<4x16x128xf32>
    %25 = arith.maximumf %23, %24 : vector<4x16x128xf32>
    %26 = arith.truncf %25 : vector<4x16x128xf32> to vector<4x16x128xbf16>
    %c1 = arith.constant 1 : index
    %c0_14 = arith.constant 0 : index
    %c128_15 = arith.constant 128 : index
    %27 = vector.load %arg10[%c1, %c0_14, %c128_15] : memref<6x16x384xbf16, #tpu.memory_space<vmem>>, vector<4x16x128xbf16>
    tpu.vector_store %arg10[%c1, %c0_14, %c128_15], %26 {strides = array<i32>} : memref<6x16x384xbf16, #tpu.memory_space<vmem>>, vector<4x16x128xbf16>,
    %c0_16 = arith.constant 0 : index
    %c0_17 = arith.constant 0 : index
    %c0_18 = arith.constant 0 : index
    %c0_19 = arith.constant 0 : index
    %28 = vector.load %arg4[%c0_16, %c0_17, %c0_18, %c0_19] : memref<1x1x16x128xbf16, #tpu.memory_space<vmem>>, vector<1x1x16x128xbf16>
    %29 = vector.shape_cast %28 : vector<1x1x16x128xbf16> to vector<1x16x128xbf16>
    %30 = arith.extf %29 : vector<1x16x128xbf16> to vector<1x16x128xf32>
    %31 = vector.broadcast %2 : vector<1x1x128xf32> to vector<1x16x128xf32>
    %32 = arith.mulf %30, %31 : vector<1x16x128xf32>
    %33 = vector.broadcast %5 : vector<1x1x128xf32> to vector<1x16x128xf32>
    %34 = arith.addf %32, %33 : vector<1x16x128xf32>
    %cst_20 = arith.constant 0.000000e+00 : f32
    %35 = vector.broadcast %cst_20 : f32 to vector<1x16x128xf32>
    %36 = arith.maximumf %34, %35 : vector<1x16x128xf32>
    %37 = arith.truncf %36 : vector<1x16x128xf32> to vector<1x16x128xbf16>
    %c5 = arith.constant 5 : index
    %c0_21 = arith.constant 0 : index
    %c128_22 = arith.constant 128 : index
    %38 = vector.load %arg10[%c5, %c0_21, %c128_22] : memref<6x16x384xbf16, #tpu.memory_space<vmem>>, vector<1x16x128xbf16>
    tpu.vector_store %arg10[%c5, %c0_21, %c128_22], %37 {strides = array<i32>} : memref<6x16x384xbf16, #tpu.memory_space<vmem>>, vector<1x16x128xbf16>,
    %cst_23 = arith.constant 0.000000e+00 : bf16
    %39 = vector.broadcast %cst_23 : bf16 to vector<1x16x128xbf16>
    %c0_i32 = arith.constant 0 : i32
    %40 = arith.cmpi eq, %arg1, %c0_i32 : i32
    %41 = arith.extui %40 : i1 to i32
    %c0_i32_24 = arith.constant 0 : i32
    %42 = arith.cmpi ne, %41, %c0_i32_24 : i32
    scf.if %42 {
      %c0_74 = arith.constant 0 : index
      %c0_75 = arith.constant 0 : index
      %c128_76 = arith.constant 128 : index
      %85 = vector.load %arg10[%c0_74, %c0_75, %c128_76] : memref<6x16x384xbf16, #tpu.memory_space<vmem>>, vector<1x16x128xbf16>
      tpu.vector_store %arg10[%c0_74, %c0_75, %c128_76], %39 {strides = array<i32>} : memref<6x16x384xbf16, #tpu.memory_space<vmem>>, vector<1x16x128xbf16>,
    } else {
    }
    %c3_i32 = arith.constant 3 : i32
    %43 = arith.cmpi eq, %arg1, %c3_i32 : i32
    %44 = arith.extui %43 : i1 to i32
    %c0_i32_25 = arith.constant 0 : i32
    %45 = arith.cmpi ne, %44, %c0_i32_25 : i32
    scf.if %45 {
      %c5_74 = arith.constant 5 : index
      %c0_75 = arith.constant 0 : index
      %c128_76 = arith.constant 128 : index
      %85 = vector.load %arg10[%c5_74, %c0_75, %c128_76] : memref<6x16x384xbf16, #tpu.memory_space<vmem>>, vector<1x16x128xbf16>
      tpu.vector_store %arg10[%c5_74, %c0_75, %c128_76], %39 {strides = array<i32>} : memref<6x16x384xbf16, #tpu.memory_space<vmem>>, vector<1x16x128xbf16>,
    } else {
    }
    %c0_26 = arith.constant 0 : index
    %c0_27 = arith.constant 0 : index
    %c128_28 = arith.constant 128 : index
    %46 = vector.load %arg10[%c0_26, %c0_27, %c128_28] : memref<6x16x384xbf16, #tpu.memory_space<vmem>>, vector<6x16x128xbf16>
    %cst_29 = arith.constant 0.000000e+00 : bf16
    %47 = vector.broadcast %cst_29 : bf16 to vector<6x1x128xbf16>
    %c0_30 = arith.constant 0 : index
    %c0_31 = arith.constant 0 : index
    %c0_32 = arith.constant 0 : index
    %48 = vector.load %arg10[%c0_30, %c0_31, %c0_32] : memref<6x16x384xbf16, #tpu.memory_space<vmem>>, vector<6x1x128xbf16>
    tpu.vector_store %arg10[%c0_30, %c0_31, %c0_32], %47 {strides = array<i32>} : memref<6x16x384xbf16, #tpu.memory_space<vmem>>, vector<6x1x128xbf16>,
    %49 = vector.extract_strided_slice %46 {offsets = [0, 0, 0], sizes = [6, 15, 128], strides = [1, 1, 1]} : vector<6x16x128xbf16> to vector<6x15x128xbf16>
    %c0_33 = arith.constant 0 : index
    %c1_34 = arith.constant 1 : index
    %c0_35 = arith.constant 0 : index
    %50 = vector.load %arg10[%c0_33, %c1_34, %c0_35] : memref<6x16x384xbf16, #tpu.memory_space<vmem>>, vector<6x15x128xbf16>
    tpu.vector_store %arg10[%c0_33, %c1_34, %c0_35], %49 {strides = array<i32>} : memref<6x16x384xbf16, #tpu.memory_space<vmem>>, vector<6x15x128xbf16>,
    %c0_36 = arith.constant 0 : index
    %c15 = arith.constant 15 : index
    %c256 = arith.constant 256 : index
    %51 = vector.load %arg10[%c0_36, %c15, %c256] : memref<6x16x384xbf16, #tpu.memory_space<vmem>>, vector<6x1x128xbf16>
    tpu.vector_store %arg10[%c0_36, %c15, %c256], %47 {strides = array<i32>} : memref<6x16x384xbf16, #tpu.memory_space<vmem>>, vector<6x1x128xbf16>,
    %52 = vector.extract_strided_slice %46 {offsets = [0, 1, 0], sizes = [6, 15, 128], strides = [1, 1, 1]} : vector<6x16x128xbf16> to vector<6x15x128xbf16>
    %c0_37 = arith.constant 0 : index
    %c0_38 = arith.constant 0 : index
    %c256_39 = arith.constant 256 : index
    %53 = vector.load %arg10[%c0_37, %c0_38, %c256_39] : memref<6x16x384xbf16, #tpu.memory_space<vmem>>, vector<6x15x128xbf16>
    tpu.vector_store %arg10[%c0_37, %c0_38, %c256_39], %52 {strides = array<i32>} : memref<6x16x384xbf16, #tpu.memory_space<vmem>>, vector<6x15x128xbf16>,
    %c0_40 = arith.constant 0 : index
    %c0_41 = arith.constant 0 : index
    %c0_42 = arith.constant 0 : index
    %54 = vector.load %arg10[%c0_40, %c0_41, %c0_42] : memref<6x16x384xbf16, #tpu.memory_space<vmem>>, vector<4x16x384xbf16>
    %55 = vector.shape_cast %54 : vector<4x16x384xbf16> to vector<64x384xbf16>
    %c0_43 = arith.constant 0 : index
    %c0_44 = arith.constant 0 : index
    %c0_45 = arith.constant 0 : index
    %56 = vector.load %arg7[%c0_43, %c0_44, %c0_45] : memref<3x384x128xbf16, #tpu.memory_space<vmem>>, vector<1x384x128xbf16>
    %57 = vector.shape_cast %56 : vector<1x384x128xbf16> to vector<384x128xbf16>
    %cst_46 = arith.constant dense<0.000000e+00> : vector<64x128xf32>
    %58 = tpu.matmul %55, %57, %cst_46 {dimension_numbers = #tpu.dot_dimension_numbers<[1], [0], [0], [1], [0, 0, 1, 1], [], []>} : vector<64x384xbf16>, vector<384x128xbf16>, vector<64x128xf32> -> vector<64x128xf32>
    %c1_47 = arith.constant 1 : index
    %c0_48 = arith.constant 0 : index
    %c0_49 = arith.constant 0 : index
    %59 = vector.load %arg10[%c1_47, %c0_48, %c0_49] : memref<6x16x384xbf16, #tpu.memory_space<vmem>>, vector<4x16x384xbf16>
    %60 = vector.shape_cast %59 : vector<4x16x384xbf16> to vector<64x384xbf16>
    %c1_50 = arith.constant 1 : index
    %c0_51 = arith.constant 0 : index
    %c0_52 = arith.constant 0 : index
    %61 = vector.load %arg7[%c1_50, %c0_51, %c0_52] : memref<3x384x128xbf16, #tpu.memory_space<vmem>>, vector<1x384x128xbf16>
    %62 = vector.shape_cast %61 : vector<1x384x128xbf16> to vector<384x128xbf16>
    %cst_53 = arith.constant dense<0.000000e+00> : vector<64x128xf32>
    %63 = tpu.matmul %60, %62, %cst_53 {dimension_numbers = #tpu.dot_dimension_numbers<[1], [0], [0], [1], [0, 0, 1, 1], [], []>} : vector<64x384xbf16>, vector<384x128xbf16>, vector<64x128xf32> -> vector<64x128xf32>
    %64 = arith.addf %58, %63 : vector<64x128xf32>
    %c2 = arith.constant 2 : index
    %c0_54 = arith.constant 0 : index
    %c0_55 = arith.constant 0 : index
    %65 = vector.load %arg10[%c2, %c0_54, %c0_55] : memref<6x16x384xbf16, #tpu.memory_space<vmem>>, vector<4x16x384xbf16>
    %66 = vector.shape_cast %65 : vector<4x16x384xbf16> to vector<64x384xbf16>
    %c2_56 = arith.constant 2 : index
    %c0_57 = arith.constant 0 : index
    %c0_58 = arith.constant 0 : index
    %67 = vector.load %arg7[%c2_56, %c0_57, %c0_58] : memref<3x384x128xbf16, #tpu.memory_space<vmem>>, vector<1x384x128xbf16>
    %68 = vector.shape_cast %67 : vector<1x384x128xbf16> to vector<384x128xbf16>
    %cst_59 = arith.constant dense<0.000000e+00> : vector<64x128xf32>
    %69 = tpu.matmul %66, %68, %cst_59 {dimension_numbers = #tpu.dot_dimension_numbers<[1], [0], [0], [1], [0, 0, 1, 1], [], []>} : vector<64x384xbf16>, vector<384x128xbf16>, vector<64x128xf32> -> vector<64x128xf32>
    %70 = arith.addf %64, %69 : vector<64x128xf32>
    %cst_60 = arith.constant dense<0.000000e+00> : vector<128xf32>
    %71 = vector.multi_reduction <add>, %70, %cst_60 [0] : vector<64x128xf32> to vector<128xf32>
    %72 = vector.shape_cast %71 : vector<128xf32> to vector<1x128xf32>
    %c0_61 = arith.constant 0 : index
    %c0_62 = arith.constant 0 : index
    %c0_63 = arith.constant 0 : index
    %c0_64 = arith.constant 0 : index
    %73 = vector.load %arg9[%c0_61, %c0_62, %c0_63, %c0_64] : memref<1x1x2x128xf32, #tpu.memory_space<vmem>>, vector<1x1x1x128xf32>
    %74 = vector.shape_cast %73 : vector<1x1x1x128xf32> to vector<1x128xf32>
    %75 = vector.shape_cast %72 : vector<1x128xf32> to vector<1x1x1x128xf32>
    tpu.vector_store %arg9[%c0_61, %c0_62, %c0_63, %c0_64], %75 {strides = array<i32>} : memref<1x1x2x128xf32, #tpu.memory_space<vmem>>, vector<1x1x1x128xf32>,
    %76 = arith.mulf %70, %70 : vector<64x128xf32>
    %cst_65 = arith.constant dense<0.000000e+00> : vector<128xf32>
    %77 = vector.multi_reduction <add>, %76, %cst_65 [0] : vector<64x128xf32> to vector<128xf32>
    %78 = vector.shape_cast %77 : vector<128xf32> to vector<1x128xf32>
    %c0_66 = arith.constant 0 : index
    %c0_67 = arith.constant 0 : index
    %c1_68 = arith.constant 1 : index
    %c0_69 = arith.constant 0 : index
    %79 = vector.load %arg9[%c0_66, %c0_67, %c1_68, %c0_69] : memref<1x1x2x128xf32, #tpu.memory_space<vmem>>, vector<1x1x1x128xf32>
    %80 = vector.shape_cast %79 : vector<1x1x1x128xf32> to vector<1x128xf32>
    %81 = vector.shape_cast %78 : vector<1x128xf32> to vector<1x1x1x128xf32>
    tpu.vector_store %arg9[%c0_66, %c0_67, %c1_68, %c0_69], %81 {strides = array<i32>} : memref<1x1x2x128xf32, #tpu.memory_space<vmem>>, vector<1x1x1x128xf32>,
    %82 = arith.truncf %70 : vector<64x128xf32> to vector<64x128xbf16>
    %83 = vector.shape_cast %82 : vector<64x128xbf16> to vector<1x4x16x128xbf16>
    %c0_70 = arith.constant 0 : index
    %c0_71 = arith.constant 0 : index
    %c0_72 = arith.constant 0 : index
    %c0_73 = arith.constant 0 : index
    %84 = vector.load %arg8[%c0_70, %c0_71, %c0_72, %c0_73] : memref<1x4x16x128xbf16, #tpu.memory_space<vmem>>, vector<1x4x16x128xbf16>
    tpu.vector_store %arg8[%c0_70, %c0_71, %c0_72, %c0_73], %83 {strides = array<i32>} : memref<1x4x16x128xbf16, #tpu.memory_space<vmem>>, vector<1x4x16x128xbf16>,
    return
  }
  func.func @transform_0(%arg0: i32, %arg1: i32) -> (i32, i32, i32, i32) {
    %c0_i32 = arith.constant 0 : i32
    %c0_i32_0 = arith.constant 0 : i32
    %c0_i32_1 = arith.constant 0 : i32
    return %arg0, %arg1, %c0_i32, %c0_i32_0 : i32, i32, i32, i32
  }
  func.func @transform_1(%arg0: i32, %arg1: i32) -> (i32, i32, i32, i32) {
    %c4_i32 = arith.constant 4 : i32
    %0 = arith.muli %arg1, %c4_i32 : i32
    %c1_i32 = arith.constant 1 : i32
    %1 = arith.subi %0, %c1_i32 : i32
    %c0_i32 = arith.constant 0 : i32
    %2 = arith.maxsi %1, %c0_i32 : i32
    %c0_i32_0 = arith.constant 0 : i32
    %c0_i32_1 = arith.constant 0 : i32
    %c0_i32_2 = arith.constant 0 : i32
    return %arg0, %2, %c0_i32_0, %c0_i32_1 : i32, i32, i32, i32
  }
  func.func @transform_2(%arg0: i32, %arg1: i32) -> (i32, i32, i32, i32) {
    %c1_i32 = arith.constant 1 : i32
    %0 = arith.addi %arg1, %c1_i32 : i32
    %c4_i32 = arith.constant 4 : i32
    %1 = arith.muli %0, %c4_i32 : i32
    %c15_i32 = arith.constant 15 : i32
    %2 = arith.minsi %1, %c15_i32 : i32
    %c0_i32 = arith.constant 0 : i32
    %c0_i32_0 = arith.constant 0 : i32
    %c0_i32_1 = arith.constant 0 : i32
    return %arg0, %2, %c0_i32, %c0_i32_0 : i32, i32, i32, i32
  }
  func.func @transform_3(%arg0: i32, %arg1: i32) -> (i32, i32) {
    %c0_i32 = arith.constant 0 : i32
    %c0_i32_0 = arith.constant 0 : i32
    %c0_i32_1 = arith.constant 0 : i32
    return %c0_i32, %c0_i32_0 : i32, i32
  }
  func.func @transform_4(%arg0: i32, %arg1: i32) -> (i32, i32) {
    %c0_i32 = arith.constant 0 : i32
    %c0_i32_0 = arith.constant 0 : i32
    %c0_i32_1 = arith.constant 0 : i32
    return %c0_i32, %c0_i32_0 : i32, i32
  }
  func.func @transform_5(%arg0: i32, %arg1: i32) -> (i32, i32, i32) {
    %c0_i32 = arith.constant 0 : i32
    %c0_i32_0 = arith.constant 0 : i32
    %c0_i32_1 = arith.constant 0 : i32
    %c0_i32_2 = arith.constant 0 : i32
    return %c0_i32, %c0_i32_0, %c0_i32_1 : i32, i32, i32
  }
  func.func @transform_6(%arg0: i32, %arg1: i32) -> (i32, i32, i32, i32) {
    %c0_i32 = arith.constant 0 : i32
    %c0_i32_0 = arith.constant 0 : i32
    %c0_i32_1 = arith.constant 0 : i32
    return %arg0, %arg1, %c0_i32, %c0_i32_0 : i32, i32, i32, i32
  }
  func.func @transform_7(%arg0: i32, %arg1: i32) -> (i32, i32, i32, i32) {
    %c0_i32 = arith.constant 0 : i32
    %c0_i32_0 = arith.constant 0 : i32
    %c0_i32_1 = arith.constant 0 : i32
    return %arg0, %arg1, %c0_i32, %c0_i32_0 : i32, i32, i32, i32
  }
}

</mosaic_0001>

<bundles_post_ra>
// kernel: up_forward.5
= control target key start
LH: loop header
LB: loop body
LE: loop exit
PB: predicated region body
PF: predicated region fallthrough
CT: control target
= control target key end

     0   :  { %s1023_s0 = inlined_call_operand.vmem [shape: bf16[512,128], index: 0, kind: input, shape index: {}]   ;;  %s1024_s1 = inlined_call_operand.vmem [shape: f32[1,128], index: 1, kind: input, shape index: {}]   ;;  %s1025_s2 = inlined_call_operand.vmem [shape: f32[1,128], index: 2, kind: input, shape index: {}]   ;;  %s1026_s3 = inlined_call_operand.vmem [shape: f32[512,128], index: 3, kind: output, shape index: {}]  }
   0x1   :  { %v419_v0 = vld [vmem:[%s1023_s0] sm:$0xff]   ;;  %v546_v4 = vld [vmem:[%s1023_s0 + $0x8] sm:$0xff]   ;;  %v547_v5 = vld [vmem:[%s1023_s0 + $0x10] sm:$0xff]  }
   0x2   :  { %v603_v1 = vld [vmem:[%s1024_s1] ss:$0 sm:$0xff]  ;;  %v420_v2 = vunpack.c.l.bf16 %v419_v0  ;;  %v421_v3 = vunpack.c.h.bf16 %v419_v0  ;;  %v548_v6 = vld [vmem:[%s1023_s0 + $0x18] sm:$0xff]   ;;  %v424_v8 = vunpack.c.l.bf16 %v546_v4  ;;  %v425_v9 = vunpack.c.h.bf16 %v546_v4  ;;  %v550_v33 = vld [vmem:[%s1023_s0 + $0x28] sm:$0xff]  }
   0x3   :  { %v617_v7 = vld [vmem:[%s1025_s2] ss:$0 sm:$0xff]  ;;  %v428_v10 = vunpack.c.l.bf16 %v547_v5  ;;  %v429_v11 = vunpack.c.h.bf16 %v547_v5  ;;  %v432_v14 = vunpack.c.l.bf16 %v548_v6  ;;  %v433_v15 = vunpack.c.h.bf16 %v548_v6  ;;  %v551_v34 = vld [vmem:[%s1023_s0 + $0x30] sm:$0xff]   ;;  %v552_v39 = vld [vmem:[%s1023_s0 + $0x38] sm:$0xff]  }
   0x4   :  { %v149_v12 = vmul.f32 %v420_v2, %v603_v1  ;;  %v150_v13 = vmul.f32 %v421_v3, %v603_v1  ;;  %v151_v16 = vmul.f32 %v424_v8, %v603_v1  ;;  %v152_v17 = vmul.f32 %v425_v9, %v603_v1  ;;  %v549_v28 = vld [vmem:[%s1023_s0 + $0x20] sm:$0xff]   ;;  %v554_v6 = vld [vmem:[%s1023_s0 + $0x48] sm:$0xff]   ;;  %v555_v8 = vld [vmem:[%s1023_s0 + $0x50] sm:$0xff]  }
   0x5   :  { %v153_v18 = vmul.f32 %v428_v10, %v603_v1  ;;  %v154_v19 = vmul.f32 %v429_v11, %v603_v1  ;;  %v155_v22 = vmul.f32 %v432_v14, %v603_v1  ;;  %v156_v23 = vmul.f32 %v433_v15, %v603_v1  ;;  %v553_v0 = vld [vmem:[%s1023_s0 + $0x40] sm:$0xff]  }
   0x6   :  { %v220_v20 = vadd.f32 %v617_v7, %v149_v12  ;;  %v221_v21 = vadd.f32 %v617_v7, %v150_v13  ;;  %v222_v24 = vadd.f32 %v617_v7, %v151_v16  ;;  %v223_v25 = vadd.f32 %v617_v7, %v152_v17  ;;  %v556_v13 = vld [vmem:[%s1023_s0 + $0x58] sm:$0xff]  }
   0x7   :  { %v224_v26 = vadd.f32 %v617_v7, %v153_v18  ;;  %v225_v27 = vadd.f32 %v617_v7, %v154_v19  ;;  %v226_v31 = vadd.f32 %v617_v7, %v155_v22  ;;  %v227_v32 = vadd.f32 %v617_v7, %v156_v23 }
   0x8   :  { %v284_v29 = vmax.f32 %v220_v20, 0.0  ;;  %v285_v30 = vmax.f32 %v221_v21, 0.0  ;;  %v286_v35 = vmax.f32 %v222_v24, 0.0  ;;  %v287_v36 = vmax.f32 %v223_v25, 0.0 }
   0x9   :  { %v288_v37 = vmax.f32 %v224_v26, 0.0  ;;  %v289_v38 = vmax.f32 %v225_v27, 0.0  ;;  %v290_v40 = vmax.f32 %v226_v31, 0.0  ;;  %v291_v41 = vmax.f32 %v227_v32, 0.0 }
   0xa   :  { %348 = vst [vmem:[%s1026_s3] sm:$0xff] %v284_v29  ;;  %349 = vst [vmem:[%s1026_s3 + $0x8] sm:$0xff] %v285_v30  ;;  %v436_v42 = vunpack.c.l.bf16 %v549_v28  ;;  %v437_v43 = vunpack.c.h.bf16 %v549_v28  ;;  %v440_v44 = vunpack.c.l.bf16 %v550_v33  ;;  %v441_v45 = vunpack.c.h.bf16 %v550_v33 }
   0xb   :  { %350 = vst [vmem:[%s1026_s3 + $0x10] sm:$0xff] %v286_v35  ;;  %351 = vst [vmem:[%s1026_s3 + $0x18] sm:$0xff] %v287_v36  ;;  %v444_v46 = vunpack.c.l.bf16 %v551_v34  ;;  %v445_v47 = vunpack.c.h.bf16 %v551_v34  ;;  %v448_v50 = vunpack.c.l.bf16 %v552_v39  ;;  %v449_v51 = vunpack.c.h.bf16 %v552_v39 }
   0xc   :  { %352 = vst [vmem:[%s1026_s3 + $0x20] sm:$0xff] %v288_v37  ;;  %353 = vst [vmem:[%s1026_s3 + $0x28] sm:$0xff] %v289_v38  ;;  %v157_v48 = vmul.f32 %v436_v42, %v603_v1  ;;  %v158_v49 = vmul.f32 %v437_v43, %v603_v1  ;;  %v159_v52 = vmul.f32 %v440_v44, %v603_v1  ;;  %v452_v16 = vunpack.c.l.bf16 %v553_v0  ;;  %v557_v38 = vld [vmem:[%s1023_s0 + $0x60] sm:$0xff]   ;;  %v558_v43 = vld [vmem:[%s1023_s0 + $0x68] sm:$0xff]  }
   0xd   :  { %354 = vst [vmem:[%s1026_s3 + $0x30] sm:$0xff] %v290_v40  ;;  %355 = vst [vmem:[%s1026_s3 + $0x38] sm:$0xff] %v291_v41  ;;  %v160_v53 = vmul.f32 %v441_v45, %v603_v1  ;;  %v161_v54 = vmul.f32 %v444_v46, %v603_v1  ;;  %v162_v55 = vmul.f32 %v445_v47, %v603_v1  ;;  %v453_v17 = vunpack.c.h.bf16 %v553_v0  ;;  %v559_v44 = vld [vmem:[%s1023_s0 + $0x70] sm:$0xff]  }
   0xe   :  { %v228_v56 = vadd.f32 %v617_v7, %v157_v48  ;;  %v229_v57 = vadd.f32 %v617_v7, %v158_v49  ;;  %v163_v58 = vmul.f32 %v448_v50, %v603_v1  ;;  %v164_v59 = vmul.f32 %v449_v51, %v603_v1  ;;  %v560_v49 = vld [vmem:[%s1023_s0 + $0x78] sm:$0xff]  }
   0xf   :  { %v230_v60 = vadd.f32 %v617_v7, %v159_v52  ;;  %v231_v61 = vadd.f32 %v617_v7, %v160_v53  ;;  %v232_v62 = vadd.f32 %v617_v7, %v161_v54  ;;  %v233_v63 = vadd.f32 %v617_v7, %v162_v55 }
  0x10   :  { %v292_v2 = vmax.f32 %v228_v56, 0.0  ;;  %v293_v3 = vmax.f32 %v229_v57, 0.0  ;;  %v234_v4 = vadd.f32 %v617_v7, %v163_v58  ;;  %v235_v5 = vadd.f32 %v617_v7, %v164_v59 }
  0x11   :  { %v294_v9 = vmax.f32 %v230_v60, 0.0  ;;  %v295_v10 = vmax.f32 %v231_v61, 0.0  ;;  %v296_v11 = vmax.f32 %v232_v62, 0.0  ;;  %v297_v12 = vmax.f32 %v233_v63, 0.0 }
  0x12   :  { %356 = vst [vmem:[%s1026_s3 + $0x40] sm:$0xff] %v292_v2  ;;  %357 = vst [vmem:[%s1026_s3 + $0x48] sm:$0xff] %v293_v3  ;;  %v298_v14 = vmax.f32 %v234_v4, 0.0  ;;  %v299_v15 = vmax.f32 %v235_v5, 0.0  ;;  %v456_v18 = vunpack.c.l.bf16 %v554_v6  ;;  %v457_v19 = vunpack.c.h.bf16 %v554_v6 }
  0x13   :  { %358 = vst [vmem:[%s1026_s3 + $0x50] sm:$0xff] %v294_v9  ;;  %359 = vst [vmem:[%s1026_s3 + $0x58] sm:$0xff] %v295_v10  ;;  %v460_v20 = vunpack.c.l.bf16 %v555_v8  ;;  %v461_v21 = vunpack.c.h.bf16 %v555_v8  ;;  %v165_v22 = vmul.f32 %v452_v16, %v603_v1  ;;  %v166_v23 = vmul.f32 %v453_v17, %v603_v1  ;;  %v562_v17 = vld [vmem:[%s1023_s0 + $0x88] sm:$0xff]  }
  0x14   :  { %360 = vst [vmem:[%s1026_s3 + $0x60] sm:$0xff] %v296_v11  ;;  %361 = vst [vmem:[%s1026_s3 + $0x68] sm:$0xff] %v297_v12  ;;  %v464_v24 = vunpack.c.l.bf16 %v556_v13  ;;  %v465_v25 = vunpack.c.h.bf16 %v556_v13  ;;  %v167_v26 = vmul.f32 %v456_v18, %v603_v1  ;;  %v168_v27 = vmul.f32 %v457_v19, %v603_v1  ;;  %v561_v12 = vld [vmem:[%s1023_s0 + $0x80] sm:$0xff]   ;;  %v563_v18 = vld [vmem:[%s1023_s0 + $0x90] sm:$0xff]  }
  0x15   :  { %362 = vst [vmem:[%s1026_s3 + $0x70] sm:$0xff] %v298_v14  ;;  %363 = vst [vmem:[%s1026_s3 + $0x78] sm:$0xff] %v299_v15  ;;  %v169_v28 = vmul.f32 %v460_v20, %v603_v1  ;;  %v170_v29 = vmul.f32 %v461_v21, %v603_v1  ;;  %v236_v30 = vadd.f32 %v617_v7, %v165_v22  ;;  %v468_v52 = vunpack.c.l.bf16 %v557_v38 }
  0x16   :  { %v237_v31 = vadd.f32 %v617_v7, %v166_v23  ;;  %v171_v32 = vmul.f32 %v464_v24, %v603_v1  ;;  %v172_v33 = vmul.f32 %v465_v25, %v603_v1  ;;  %v238_v34 = vadd.f32 %v617_v7, %v167_v26  ;;  %v564_v23 = vld [vmem:[%s1023_s0 + $0x98] sm:$0xff]  }
  0x17   :  { %v239_v35 = vadd.f32 %v617_v7, %v168_v27  ;;  %v240_v36 = vadd.f32 %v617_v7, %v169_v28  ;;  %v241_v37 = vadd.f32 %v617_v7, %v170_v29  ;;  %v300_v39 = vmax.f32 %v236_v30, 0.0 }
  0x18   :  { %v301_v40 = vmax.f32 %v237_v31, 0.0  ;;  %v242_v41 = vadd.f32 %v617_v7, %v171_v32  ;;  %v243_v42 = vadd.f32 %v617_v7, %v172_v33  ;;  %v302_v45 = vmax.f32 %v238_v34, 0.0 }
  0x19   :  { %v303_v46 = vmax.f32 %v239_v35, 0.0  ;;  %v304_v47 = vmax.f32 %v240_v36, 0.0  ;;  %v305_v48 = vmax.f32 %v241_v37, 0.0  ;;  %364 = vst [vmem:[%s1026_s3 + $0x80] sm:$0xff] %v300_v39  ;;  %v469_v53 = vunpack.c.h.bf16 %v557_v38 }
  0x1a   :  { %365 = vst [vmem:[%s1026_s3 + $0x88] sm:$0xff] %v301_v40  ;;  %v306_v50 = vmax.f32 %v242_v41, 0.0  ;;  %v307_v51 = vmax.f32 %v243_v42, 0.0  ;;  %366 = vst [vmem:[%s1026_s3 + $0x90] sm:$0xff] %v302_v45  ;;  %v472_v54 = vunpack.c.l.bf16 %v558_v43  ;;  %v473_v55 = vunpack.c.h.bf16 %v558_v43 }
  0x1b   :  { %367 = vst [vmem:[%s1026_s3 + $0x98] sm:$0xff] %v303_v46  ;;  %368 = vst [vmem:[%s1026_s3 + $0xa0] sm:$0xff] %v304_v47  ;;  %v476_v56 = vunpack.c.l.bf16 %v559_v44  ;;  %v477_v57 = vunpack.c.h.bf16 %v559_v44  ;;  %v173_v58 = vmul.f32 %v468_v52, %v603_v1  ;;  %v174_v59 = vmul.f32 %v469_v53, %v603_v1  ;;  %v566_v53 = vld [vmem:[%s1023_s0 + $0xa8] sm:$0xff]  }
  0x1c   :  { %369 = vst [vmem:[%s1026_s3 + $0xa8] sm:$0xff] %v305_v48  ;;  %370 = vst [vmem:[%s1026_s3 + $0xb0] sm:$0xff] %v306_v50  ;;  %v480_v60 = vunpack.c.l.bf16 %v560_v49  ;;  %v481_v61 = vunpack.c.h.bf16 %v560_v49  ;;  %v175_v62 = vmul.f32 %v472_v54, %v603_v1  ;;  %v176_v63 = vmul.f32 %v473_v55, %v603_v1  ;;  %v565_v48 = vld [vmem:[%s1023_s0 + $0xa0] sm:$0xff]   ;;  %v567_v54 = vld [vmem:[%s1023_s0 + $0xb0] sm:$0xff]  }
  0x1d   :  { %371 = vst [vmem:[%s1026_s3 + $0xb8] sm:$0xff] %v307_v51  ;;  %v177_v0 = vmul.f32 %v476_v56, %v603_v1  ;;  %v178_v2 = vmul.f32 %v477_v57, %v603_v1  ;;  %v244_v3 = vadd.f32 %v617_v7, %v173_v58  ;;  %v245_v4 = vadd.f32 %v617_v7, %v174_v59  ;;  %v568_v59 = vld [vmem:[%s1023_s0 + $0xb8] sm:$0xff]  }
  0x1e   :  { %v179_v5 = vmul.f32 %v480_v60, %v603_v1  ;;  %v180_v6 = vmul.f32 %v481_v61, %v603_v1  ;;  %v246_v8 = vadd.f32 %v617_v7, %v175_v62  ;;  %v247_v9 = vadd.f32 %v617_v7, %v176_v63 }
  0x1f   :  { %v248_v10 = vadd.f32 %v617_v7, %v177_v0  ;;  %v249_v11 = vadd.f32 %v617_v7, %v178_v2  ;;  %v308_v13 = vmax.f32 %v244_v3, 0.0  ;;  %v309_v14 = vmax.f32 %v245_v4, 0.0 }
  0x20   :  { %v250_v15 = vadd.f32 %v617_v7, %v179_v5  ;;  %v251_v16 = vadd.f32 %v617_v7, %v180_v6  ;;  %v310_v19 = vmax.f32 %v246_v8, 0.0  ;;  %v311_v20 = vmax.f32 %v247_v9, 0.0 }
  0x21   :  { %v312_v21 = vmax.f32 %v248_v10, 0.0  ;;  %v313_v22 = vmax.f32 %v249_v11, 0.0  ;;  %372 = vst [vmem:[%s1026_s3 + $0xc0] sm:$0xff] %v308_v13  ;;  %373 = vst [vmem:[%s1026_s3 + $0xc8] sm:$0xff] %v309_v14  ;;  %v484_v26 = vunpack.c.l.bf16 %v561_v12  ;;  %v485_v27 = vunpack.c.h.bf16 %v561_v12 }
  0x22   :  { %v314_v24 = vmax.f32 %v250_v15, 0.0  ;;  %v315_v25 = vmax.f32 %v251_v16, 0.0  ;;  %374 = vst [vmem:[%s1026_s3 + $0xd0] sm:$0xff] %v310_v19  ;;  %375 = vst [vmem:[%s1026_s3 + $0xd8] sm:$0xff] %v311_v20  ;;  %v488_v28 = vunpack.c.l.bf16 %v562_v17  ;;  %v489_v29 = vunpack.c.h.bf16 %v562_v17 }
  0x23   :  { %376 = vst [vmem:[%s1026_s3 + $0xe0] sm:$0xff] %v312_v21  ;;  %377 = vst [vmem:[%s1026_s3 + $0xe8] sm:$0xff] %v313_v22  ;;  %v492_v30 = vunpack.c.l.bf16 %v563_v18  ;;  %v493_v31 = vunpack.c.h.bf16 %v563_v18  ;;  %v181_v32 = vmul.f32 %v484_v26, %v603_v1  ;;  %v182_v33 = vmul.f32 %v485_v27, %v603_v1  ;;  %v569_v22 = vld [vmem:[%s1023_s0 + $0xc0] sm:$0xff]   ;;  %v570_v27 = vld [vmem:[%s1023_s0 + $0xc8] sm:$0xff]  }
  0x24   :  { %378 = vst [vmem:[%s1026_s3 + $0xf0] sm:$0xff] %v314_v24  ;;  %379 = vst [vmem:[%s1026_s3 + $0xf8] sm:$0xff] %v315_v25  ;;  %v496_v34 = vunpack.c.l.bf16 %v564_v23  ;;  %v497_v35 = vunpack.c.h.bf16 %v564_v23  ;;  %v183_v36 = vmul.f32 %v488_v28, %v603_v1  ;;  %v184_v37 = vmul.f32 %v489_v29, %v603_v1  ;;  %v571_v28 = vld [vmem:[%s1023_s0 + $0xd0] sm:$0xff]  }
  0x25   :  { %v185_v38 = vmul.f32 %v492_v30, %v603_v1  ;;  %v186_v39 = vmul.f32 %v493_v31, %v603_v1  ;;  %v252_v40 = vadd.f32 %v617_v7, %v181_v32  ;;  %v253_v41 = vadd.f32 %v617_v7, %v182_v33  ;;  %v572_v33 = vld [vmem:[%s1023_s0 + $0xd8] sm:$0xff]  }
  0x26   :  { %v187_v42 = vmul.f32 %v496_v34, %v603_v1  ;;  %v188_v43 = vmul.f32 %v497_v35, %v603_v1  ;;  %v254_v44 = vadd.f32 %v617_v7, %v183_v36  ;;  %v255_v45 = vadd.f32 %v617_v7, %v184_v37 }
  0x27   :  { %v256_v46 = vadd.f32 %v617_v7, %v185_v38  ;;  %v257_v47 = vadd.f32 %v617_v7, %v186_v39  ;;  %v316_v49 = vmax.f32 %v252_v40, 0.0  ;;  %v317_v50 = vmax.f32 %v253_v41, 0.0 }
  0x28   :  { %v258_v51 = vadd.f32 %v617_v7, %v187_v42  ;;  %v259_v52 = vadd.f32 %v617_v7, %v188_v43  ;;  %v318_v55 = vmax.f32 %v254_v44, 0.0  ;;  %v319_v56 = vmax.f32 %v255_v45, 0.0 }
  0x29   :  { %v320_v57 = vmax.f32 %v256_v46, 0.0  ;;  %v321_v58 = vmax.f32 %v257_v47, 0.0  ;;  %380 = vst [vmem:[%s1026_s3 + $0x100] sm:$0xff] %v316_v49  ;;  %381 = vst [vmem:[%s1026_s3 + $0x108] sm:$0xff] %v317_v50  ;;  %v500_v62 = vunpack.c.l.bf16 %v565_v48  ;;  %v501_v63 = vunpack.c.h.bf16 %v565_v48 }
  0x2a   :  { %v322_v60 = vmax.f32 %v258_v51, 0.0  ;;  %v323_v61 = vmax.f32 %v259_v52, 0.0  ;;  %382 = vst [vmem:[%s1026_s3 + $0x110] sm:$0xff] %v318_v55  ;;  %383 = vst [vmem:[%s1026_s3 + $0x118] sm:$0xff] %v319_v56  ;;  %v504_v0 = vunpack.c.l.bf16 %v566_v53  ;;  %v505_v2 = vunpack.c.h.bf16 %v566_v53 }
  0x2b   :  { %384 = vst [vmem:[%s1026_s3 + $0x120] sm:$0xff] %v320_v57  ;;  %385 = vst [vmem:[%s1026_s3 + $0x128] sm:$0xff] %v321_v58  ;;  %v508_v3 = vunpack.c.l.bf16 %v567_v54  ;;  %v509_v4 = vunpack.c.h.bf16 %v567_v54  ;;  %v189_v5 = vmul.f32 %v500_v62, %v603_v1  ;;  %v190_v6 = vmul.f32 %v501_v63, %v603_v1  ;;  %v573_v58 = vld [vmem:[%s1023_s0 + $0xe0] sm:$0xff]   ;;  %v574_v63 = vld [vmem:[%s1023_s0 + $0xe8] sm:$0xff]  }
  0x2c   :  { %386 = vst [vmem:[%s1026_s3 + $0x130] sm:$0xff] %v322_v60  ;;  %387 = vst [vmem:[%s1026_s3 + $0x138] sm:$0xff] %v323_v61  ;;  %v512_v8 = vunpack.c.l.bf16 %v568_v59  ;;  %v513_v9 = vunpack.c.h.bf16 %v568_v59  ;;  %v191_v10 = vmul.f32 %v504_v0, %v603_v1  ;;  %v192_v11 = vmul.f32 %v505_v2, %v603_v1  ;;  %v575_v0 = vld [vmem:[%s1023_s0 + $0xf0] sm:$0xff]  }
  0x2d   :  { %v193_v12 = vmul.f32 %v508_v3, %v603_v1  ;;  %v194_v13 = vmul.f32 %v509_v4, %v603_v1  ;;  %v260_v14 = vadd.f32 %v617_v7, %v189_v5  ;;  %v261_v15 = vadd.f32 %v617_v7, %v190_v6  ;;  %v576_v6 = vld [vmem:[%s1023_s0 + $0xf8] sm:$0xff]  }
  0x2e   :  { %v195_v16 = vmul.f32 %v512_v8, %v603_v1  ;;  %v196_v17 = vmul.f32 %v513_v9, %v603_v1  ;;  %v262_v18 = vadd.f32 %v617_v7, %v191_v10  ;;  %v263_v19 = vadd.f32 %v617_v7, %v192_v11 }
  0x2f   :  { %v264_v20 = vadd.f32 %v617_v7, %v193_v12  ;;  %v265_v21 = vadd.f32 %v617_v7, %v194_v13  ;;  %v324_v23 = vmax.f32 %v260_v14, 0.0  ;;  %v325_v24 = vmax.f32 %v261_v15, 0.0 }
  0x30   :  { %v266_v25 = vadd.f32 %v617_v7, %v195_v16  ;;  %v267_v26 = vadd.f32 %v617_v7, %v196_v17  ;;  %v326_v29 = vmax.f32 %v262_v18, 0.0  ;;  %v327_v30 = vmax.f32 %v263_v19, 0.0 }
  0x31   :  { %v328_v31 = vmax.f32 %v264_v20, 0.0  ;;  %v329_v32 = vmax.f32 %v265_v21, 0.0  ;;  %388 = vst [vmem:[%s1026_s3 + $0x140] sm:$0xff] %v324_v23  ;;  %389 = vst [vmem:[%s1026_s3 + $0x148] sm:$0xff] %v325_v24  ;;  %v516_v36 = vunpack.c.l.bf16 %v569_v22  ;;  %v517_v37 = vunpack.c.h.bf16 %v569_v22 }
  0x32   :  { %v330_v34 = vmax.f32 %v266_v25, 0.0  ;;  %v331_v35 = vmax.f32 %v267_v26, 0.0  ;;  %390 = vst [vmem:[%s1026_s3 + $0x150] sm:$0xff] %v326_v29  ;;  %391 = vst [vmem:[%s1026_s3 + $0x158] sm:$0xff] %v327_v30  ;;  %v520_v38 = vunpack.c.l.bf16 %v570_v27  ;;  %v521_v39 = vunpack.c.h.bf16 %v570_v27 }
  0x33   :  { %392 = vst [vmem:[%s1026_s3 + $0x160] sm:$0xff] %v328_v31  ;;  %393 = vst [vmem:[%s1026_s3 + $0x168] sm:$0xff] %v329_v32  ;;  %v524_v40 = vunpack.c.l.bf16 %v571_v28  ;;  %v525_v41 = vunpack.c.h.bf16 %v571_v28  ;;  %v197_v42 = vmul.f32 %v516_v36, %v603_v1  ;;  %v198_v43 = vmul.f32 %v517_v37, %v603_v1 }
  0x34   :  { %394 = vst [vmem:[%s1026_s3 + $0x170] sm:$0xff] %v330_v34  ;;  %395 = vst [vmem:[%s1026_s3 + $0x178] sm:$0xff] %v331_v35  ;;  %v528_v44 = vunpack.c.l.bf16 %v572_v33  ;;  %v529_v45 = vunpack.c.h.bf16 %v572_v33  ;;  %v199_v46 = vmul.f32 %v520_v38, %v603_v1  ;;  %v200_v47 = vmul.f32 %v521_v39, %v603_v1 }
  0x35   :  { %v201_v48 = vmul.f32 %v524_v40, %v603_v1  ;;  %v202_v49 = vmul.f32 %v525_v41, %v603_v1  ;;  %v268_v50 = vadd.f32 %v617_v7, %v197_v42  ;;  %v269_v51 = vadd.f32 %v617_v7, %v198_v43 }
  0x36   :  { %v203_v52 = vmul.f32 %v528_v44, %v603_v1  ;;  %v204_v53 = vmul.f32 %v529_v45, %v603_v1  ;;  %v270_v54 = vadd.f32 %v617_v7, %v199_v46  ;;  %v271_v55 = vadd.f32 %v617_v7, %v200_v47 }
  0x37   :  { %v272_v56 = vadd.f32 %v617_v7, %v201_v48  ;;  %v273_v57 = vadd.f32 %v617_v7, %v202_v49  ;;  %v332_v59 = vmax.f32 %v268_v50, 0.0  ;;  %v333_v60 = vmax.f32 %v269_v51, 0.0 }
  0x38   :  { %v274_v61 = vadd.f32 %v617_v7, %v203_v52  ;;  %v275_v62 = vadd.f32 %v617_v7, %v204_v53  ;;  %v334_v2 = vmax.f32 %v270_v54, 0.0  ;;  %v335_v3 = vmax.f32 %v271_v55, 0.0 }
  0x39   :  { %v336_v4 = vmax.f32 %v272_v56, 0.0  ;;  %v337_v5 = vmax.f32 %v273_v57, 0.0  ;;  %396 = vst [vmem:[%s1026_s3 + $0x180] sm:$0xff] %v332_v59  ;;  %397 = vst [vmem:[%s1026_s3 + $0x188] sm:$0xff] %v333_v60  ;;  %v532_v10 = vunpack.c.l.bf16 %v573_v58  ;;  %v533_v11 = vunpack.c.h.bf16 %v573_v58 }
  0x3a   :  { %v338_v8 = vmax.f32 %v274_v61, 0.0  ;;  %v339_v9 = vmax.f32 %v275_v62, 0.0  ;;  %398 = vst [vmem:[%s1026_s3 + $0x190] sm:$0xff] %v334_v2  ;;  %399 = vst [vmem:[%s1026_s3 + $0x198] sm:$0xff] %v335_v3  ;;  %v536_v12 = vunpack.c.l.bf16 %v574_v63  ;;  %v537_v13 = vunpack.c.h.bf16 %v574_v63 }
  0x3b   :  { %400 = vst [vmem:[%s1026_s3 + $0x1a0] sm:$0xff] %v336_v4  ;;  %401 = vst [vmem:[%s1026_s3 + $0x1a8] sm:$0xff] %v337_v5  ;;  %v540_v14 = vunpack.c.l.bf16 %v575_v0  ;;  %v541_v15 = vunpack.c.h.bf16 %v575_v0  ;;  %v205_v16 = vmul.f32 %v532_v10, %v603_v1  ;;  %v206_v17 = vmul.f32 %v533_v11, %v603_v1 }
  0x3c   :  { %402 = vst [vmem:[%s1026_s3 + $0x1b0] sm:$0xff] %v338_v8  ;;  %403 = vst [vmem:[%s1026_s3 + $0x1b8] sm:$0xff] %v339_v9  ;;  %v544_v18 = vunpack.c.l.bf16 %v576_v6  ;;  %v545_v19 = vunpack.c.h.bf16 %v576_v6  ;;  %v207_v20 = vmul.f32 %v536_v12, %v603_v1  ;;  %v208_v21 = vmul.f32 %v537_v13, %v603_v1 }
  0x3d   :  { %v209_v22 = vmul.f32 %v540_v14, %v603_v1  ;;  %v210_v23 = vmul.f32 %v541_v15, %v603_v1  ;;  %v276_v24 = vadd.f32 %v617_v7, %v205_v16  ;;  %v277_v25 = vadd.f32 %v617_v7, %v206_v17 }
  0x3e   :  { %v211_v26 = vmul.f32 %v544_v18, %v603_v1  ;;  %v212_v27 = vmul.f32 %v545_v19, %v603_v1  ;;  %v278_v28 = vadd.f32 %v617_v7, %v207_v20  ;;  %v279_v29 = vadd.f32 %v617_v7, %v208_v21 }
  0x3f   :  { %v280_v30 = vadd.f32 %v617_v7, %v209_v22  ;;  %v281_v31 = vadd.f32 %v617_v7, %v210_v23  ;;  %v340_v32 = vmax.f32 %v276_v24, 0.0  ;;  %v341_v33 = vmax.f32 %v277_v25, 0.0 }
  0x40   :  { %v282_v34 = vadd.f32 %v617_v7, %v211_v26  ;;  %v283_v35 = vadd.f32 %v617_v7, %v212_v27  ;;  %v342_v36 = vmax.f32 %v278_v28, 0.0  ;;  %v343_v37 = vmax.f32 %v279_v29, 0.0 }
  0x41   :  { %v344_v38 = vmax.f32 %v280_v30, 0.0  ;;  %v345_v39 = vmax.f32 %v281_v31, 0.0  ;;  %404 = vst [vmem:[%s1026_s3 + $0x1c0] sm:$0xff] %v340_v32  ;;  %405 = vst [vmem:[%s1026_s3 + $0x1c8] sm:$0xff] %v341_v33 }
  0x42   :  { %v346_v1 = vmax.f32 %v282_v34, 0.0  ;;  %v347_v40 = vmax.f32 %v283_v35, 0.0  ;;  %406 = vst [vmem:[%s1026_s3 + $0x1d0] sm:$0xff] %v342_v36  ;;  %407 = vst [vmem:[%s1026_s3 + $0x1d8] sm:$0xff] %v343_v37 }
  0x43   :  { %408 = vst [vmem:[%s1026_s3 + $0x1e0] sm:$0xff] %v344_v38  ;;  %409 = vst [vmem:[%s1026_s3 + $0x1e8] sm:$0xff] %v345_v39 }
  0x44   :  { %410 = vst [vmem:[%s1026_s3 + $0x1f0] sm:$0xff] %v346_v1  ;;  %411 = vst [vmem:[%s1026_s3 + $0x1f8] sm:$0xff] %v347_v40 }

// kernel: up_forward.3
= control target key start
LH: loop header
LB: loop body
LE: loop exit
PB: predicated region body
PF: predicated region fallthrough
CT: control target
= control target key end

     0   :  { %s2700_s24 = smov 0   ;;  %s2702_s25 = smov 0   ;;  %s3149_s0 = inlined_call_operand.vmem [shape: bf16[2,16,16,128], index: 0, kind: input, shape index: {}, may-alias: {0,1,2}]   ;;  %s3150_s1 = inlined_call_operand.vmem [shape: bf16[2,16,16,128], index: 1, kind: input, shape index: {}, may-alias: {0,1,2}]   ;;  %s3151_s2 = inlined_call_operand.vmem [shape: bf16[2,16,16,128], index: 2, kind: input, shape index: {}, may-alias: {0,1,2}]   ;;  %s3152_s3 = inlined_call_operand.vmem [shape: f32[1,128], index: 3, kind: input, shape index: {}]   ;;  %s3153_s4 = inlined_call_operand.vmem [shape: f32[1,128], index: 4, kind: input, shape index: {}]   ;;  %s3154_s5 = inlined_call_operand.vmem [shape: bf16[3,384,128], index: 5, kind: input, shape index: {}]   ;;  %s3155_s6 = inlined_call_operand.vmem [shape: bf16[2,16,16,128], index: 6, kind: output, shape index: {0}]   ;;  %s3156_s7 = inlined_call_operand.vmem [shape: f32[2,4,2,128], index: 7, kind: output, shape index: {1}]  }
   0x1   :  { %s2704_s26 = smov 0   ;;  %s2706_s27 = smov 0  }
   0x2   :  { %s2708_s3 = smov 0  }
   0x3 LB: > { %s27_s4 = sadd.s32 1, %s2648_s26  ;;  %s30_s28 = sadd.s32 1, %s2652_s27  ;;  %s2656_s3 = sphi %s2708_s3, %s18_s3   ;;  %s2652_s27 = sphi %s2706_s27, %s3168_s27   ;;  %s2648_s26 = sphi %s2704_s26, %s3167_s26   ;;  %s2644_s25 = sphi %s2702_s25, %s3166_s25   ;;  %s2640_s24 = sphi %s2700_s24, %s3165_s24  }
   0x4   : > { %p28_p0 = scmp.ge.s32.totalorder %s27_s4, 4  ;;  %p1977_p1 = scmp.ge.s32.totalorder %s2656_s3, 1 }
   0x5   : > { %p328_p2 = scmp.lt.s32.totalorder %s2656_s3, 9 }
   0x6   : > { %s3170_s4 = smov (%p28_p0, %s27_s4), 0  ;;  %s3172_s28 = smov (!%p28_p0, %s30_s28), %s2652_s27 }
   0x7   : > { %p329_p3 = pnand %p1977_p1, %p328_p2  ;;  %p32_p4 = scmp.ge.s32.totalorder %s3172_s28, 2 }
   0x8   : > { %s2733_s29 = sshll.u32 (!%p329_p3), %s2640_s24, 2  ;;  %p405_p5 = scmp.lt.s32.totalorder (!%p329_p3), %s2644_s25, 1 }
   0x9   : > { %s3174_s28 = smov (%p32_p4, %s3172_s28), 0  ;;  %332 = sbr.rel (%p329_p3) target bundleno = 404 (0x194), region = 44 }
   0xa   : > { %p407_p6 = scmp.lt.s32.totalorder (!%p329_p3), %s2733_s29, 15  ;;  %s1983_s30 = sadd.s32 (!%p329_p3), 4294967295, %s2733_s29 }
   0xb   : > { %p417_p7 = scmp.gt.s32.totalorder (!%p329_p3), %s1983_s30, 0  ;;  %p1984_p8 = scmp.lt.s32.totalorder (!%p329_p3), %s1983_s30, 15 }
   0xc   : > { %p462_p9 = scmp.lt.s32.totalorder (!%p329_p3), %s2640_s24, 3  ;;  %s2198_s22 = sadd.s32 (!%p329_p3), 4, %s2733_s29 }
   0xd   : > { %p434_p10 = scmp.lt.s32.totalorder (!%p329_p3), %s2198_s22, 15  ;;  %p2011_p11 = scmp.ne.s32.totalorder (!%p329_p3), %s2640_s24, 0 }
  0x10   : > { %s3176_s25 = smov (!%p405_p5, %s2644_s25), 1  ;;  %s3178_s30 = smov (!%p417_p7, %s1983_s30), 0 }
  0x11   : > { %s408_s8 = scalar_select %p407_p6, %s2733_s29, 15 }
  0x12   : > { %s2738_s9 = sshll.u32 %s3176_s25, 5  ;;  %s2003_s13 = sshll.u32 %s3176_s25, 2  ;;  %v2658_v6 = vmov (!%p2011_p11), 0  }
  0x13   : > { %s1979_s10 = sshll.u32 %s408_s8, 1  ;;  %s3180_s30 = smov (!%p1984_p8, %s3178_s30), 15 }
  0x14   : > { %s411_s11 = sadd.s32 %s2738_s9, %s1979_s10  ;;  %s1989_s23 = sshll.u32 %s3180_s30, 1 }
  0x15   : > { %s1981_s12 = sshll.u32 %s411_s11, 2  ;;  %s425_s8 = sadd.s32 %s1989_s23, %s2738_s9 }
  0x16   : > { %s413_s16 = scalar_lea.vmem %s3149_s0, %s1981_s12  ;;  %s2748_s19 = scalar_lea.vmem %s3155_s6, %s1981_s12 }
  0x17   : > { %v2541_v0 = vld [vmem:[%s413_s16] sm:$0xff]   ;;  %s463_s20 = scalar_select %p462_p9, %s2640_s24, 3  ;;  %v2542_v1 = vld [vmem:[%s413_s16 + $0x8] sm:$0xff]   ;;  %v2543_v2 = vld [vmem:[%s413_s16 + $0x10] sm:$0xff]  }
  0x18   : > { %511 = vst [vmem:[#allocation2 + $0x20] sm:$0xff] %v2541_v0  ;;  %512 = vst [vmem:[#allocation2 + $0x38] sm:$0xff] %v2542_v1  ;;  %v2544_v3 = vld [vmem:[%s413_s16 + $0x18] sm:$0xff]   ;;  %s1991_s14 = sshll.u32 %s425_s8, 2  ;;  %s3182_s22 = smov (!%p434_p10, %s2198_s22), 15 }
  0x19   : > { %s465_s21 = sadd.s32 %s2003_s13, %s463_s20  ;;  %513 = vst [vmem:[#allocation2 + $0x50] sm:$0xff] %v2543_v2  ;;  %514 = vst [vmem:[#allocation2 + $0x68] sm:$0xff] %v2544_v3  ;;  %s427_s13 = scalar_lea.vmem %s3150_s1, %s1991_s14 }
  0x1a   : > { %s2004_s25 = sshll.u32 %s465_s21, 1  ;;  %v2540_v4 = vld [vmem:[%s427_s13] sm:$0xff]   ;;  %s3184_s22 = smov (!%p434_p10, %s3182_s22), 15 }
  0x1b   : > { %s2756_s12 = scalar_lea.vmem %s3156_s7, %s2004_s25  ;;  %477 = vst [vmem:[#allocation2 + $0x8] sm:$0xff] %v2540_v4  ;;  %s1996_s29 = sshll.u32 %s3184_s22, 1 }
  0x1c   : > { %s442_s30 = sadd.s32 %s1996_s29, %s2738_s9  ;;  %528 = sbr.rel (%p2011_p11) target bundleno = 35 (0x23), region = 48  ;;  %529 = vst [vmem:[#allocation2 + $0x8] sm:$0xff] (!%p2011_p11), %v2658_v6 }
  0x1d   : > { %s1998_s16 = sshll.u32 %s442_s30, 2 }
  0x1e   : > { %s444_s21 = scalar_lea.vmem %s3151_s2, %s1998_s16 }
  0x1f   : > { %v2545_v5 = vld [vmem:[%s444_s21] sm:$0xff]  }
  0x20   : > { %524 = vst [vmem:[#allocation2 + $0x80] sm:$0xff] %v2545_v5 }
  0x23 PF: > { %p2012_p12 = scmp.ne.s32.totalorder %s2640_s24, 3 }
  0x24   : > { %v2659_v7 = vmov (!%p2012_p12), 0  }
  0x25   : > { %533 = sbr.rel (%p2012_p12) target bundleno = 44 (0x2c), region = 52  ;;  %534 = vst [vmem:[#allocation2 + $0x80] sm:$0xff] (!%p2012_p12), %v2659_v7 }
  0x2c PF: > { %v2546_v8 = vld [vmem:[%s3154_s5 + $0x100] sm:$0xff]   ;;  %v2549_v11 = vld [vmem:[%s3154_s5 + $0x108] sm:$0xff]   ;;  %v2552_v14 = vld [vmem:[%s3154_s5 + $0x110] sm:$0xff]   ;;  %vm541_vm0 = vcmask 1040384   ;;  %vm631_vm1 = vcmask 1047559   ;;  %vm610_vm7 = vcmask 1047552  }
  0x2d   : > { %v2547_v9 = vld [vmem:[%s3154_s5 + $0x140] sm:$0xff]   ;;  %2230 = vmatprep.subr.bf16.mxu0 %v2546_v8  ;;  %v2550_v12 = vld [vmem:[%s3154_s5 + $0x148] sm:$0xff]   ;;  %v2553_v15 = vld [vmem:[%s3154_s5 + $0x150] sm:$0xff]   ;;  %vm542_vm2 = vsmask.f32 256 }
  0x2e   : > { %v2548_v10 = vld [vmem:[%s3154_s5 + $0xc0] sm:$0xff]   ;;  %2386 = vmatprep.subr.bf16.mxu1 %v2547_v9  ;;  %v2551_v13 = vld [vmem:[%s3154_s5 + $0xc8] sm:$0xff]   ;;  %v2554_v16 = vld [vmem:[%s3154_s5 + $0xd0] sm:$0xff]   ;;  %vm611_vm4 = vsmask.f32 7938 }
  0x2f   : > { %2231 = vmatpush3.bf16.msra.mxu0 %v2548_v10  ;;  %2387 = vmatpush3.bf16.msra.mxu1 %v2547_v9  ;;  %v2555_v17 = vld [vmem:[%s3154_s5 + $0x118] sm:$0xff]   ;;  %v2558_v20 = vld [vmem:[%s3154_s5 + $0x120] sm:$0xff]   ;;  %v2561_v23 = vld [vmem:[%s3154_s5 + $0x128] sm:$0xff]   ;;  %vm632_vm5 = vsmask.f32 7966 }
  0x30   : > { %2232 = vmatprep.subr.bf16.mxu0 %v2549_v11  ;;  %2388 = vmatprep.subr.bf16.mxu1 %v2550_v12  ;;  %v2556_v18 = vld [vmem:[%s3154_s5 + $0x158] sm:$0xff]   ;;  %v2559_v21 = vld [vmem:[%s3154_s5 + $0x160] sm:$0xff]   ;;  %v2562_v24 = vld [vmem:[%s3154_s5 + $0x168] sm:$0xff]   ;;  %vm670_vm6 = vsmask.f32 7424 }
  0x31   : > { %v2557_v19 = vld [vmem:[%s3154_s5 + $0xd8] sm:$0xff]   ;;  %v2560_v22 = vld [vmem:[%s3154_s5 + $0xe0] sm:$0xff]   ;;  %v2563_v25 = vld [vmem:[%s3154_s5 + $0xe8] sm:$0xff]  }
  0x32   : > { %v2564_v26 = vld [vmem:[%s3154_s5 + $0x130] sm:$0xff]   ;;  %v2567_v29 = vld [vmem:[%s3154_s5 + $0x138] sm:$0xff]   ;;  %v2836_v31 = vld [vmem:[#allocation2 + $0x20] sm:$0xff] }
  0x33   : > { %2233 = vmatpush3.bf16.msra.mxu0 %v2551_v13  ;;  %2389 = vmatpush3.bf16.msra.mxu1 %v2550_v12  ;;  %v2565_v27 = vld [vmem:[%s3154_s5 + $0x170] sm:$0xff]   ;;  %v2568_v30 = vld [vmem:[%s3154_s5 + $0x178] sm:$0xff]   ;;  %vm2838_vm3 = vmand %vm541_vm0, %vm542_vm2  ;;  %v570_v34 = vshrl.u32 %v2836_v31, 16  ;;  %v573_v35 = vshll.u32 %v2836_v31, 16 }
  0x34   : > { %2234 = vmatprep.subr.bf16.mxu0 %v2552_v14  ;;  %2390 = vmatprep.subr.bf16.mxu1 %v2553_v15  ;;  %v2566_v28 = vld [vmem:[%s3154_s5 + $0xf0] sm:$0xff]   ;;  %v547_v32 = vld [vmem:[#allocation2 + $0x18] sm:$0x1]  ;;  %v637_v38 = vld [vmem:[#allocation2 + $0x28] sm:$0x80] }
  0x35   : > { %v2569_v36 = vld [vmem:[%s3154_s5 + $0xf8] sm:$0xff]   ;;  %987 = vmatprep.mubr.bf16.mxu0 %v2836_v31  ;;  %v548_v37 = vsel %vm2838_vm3, 0, %v547_v32  ;;  %v572_v39 = vrot.slane %v570_v34, 7  ;;  %vm2851_vm8 = vmand %vm631_vm1, %vm632_vm5  ;;  %v2570_v41 = vld [vmem:[%s3154_s5 + $0x40] sm:$0xff]   ;;  %v654_v44 = vrot.slane %v573_v35, 1 }
  0x36   : > { %549 = vst [vmem:[#allocation2 + $0x18] sm:$0x1] %v548_v37  ;;  %v638_v42 = vsel %vm2851_vm8, 0, %v637_v38  ;;  %v2571_v43 = vld [vmem:[%s3154_s5 + $0x80] sm:$0xff]   ;;  %v2863_v45 = vld [vmem:[#allocation2 + $0x38] sm:$0xff]  ;;  %vm2867_vm9 = vmand %vm610_vm7, %vm611_vm4 }
  0x37   : > { %2235 = vmatpush3.bf16.msra.mxu0 %v2554_v16  ;;  %2391 = vmatpush3.bf16.msra.mxu1 %v2553_v15  ;;  %639 = vst [vmem:[#allocation2 + $0x28] sm:$0x80] %v638_v42  ;;  %v640_v46 = vld [vmem:[#allocation2 + $0x40] sm:$0x80]  ;;  %v580_v48 = vshll.u32 %v2863_v45, 16  ;;  %v575_v50 = vor.u32 %v573_v35, %v572_v39  ;;  %vm2876_vm10 = vmand %vm610_vm7, %vm670_vm6  ;;  %v577_v52 = vshrl.u32 %v2863_v45, 16  ;;  %v655_v55 = vor.u32 %v654_v44, %v570_v34 }
  0x38   : > { %2236 = vmatprep.subr.bf16.mxu0 %v2555_v17  ;;  %2392 = vmatprep.subr.bf16.mxu1 %v2556_v18  ;;  %v641_v49 = vsel %vm2851_vm8, 0, %v640_v46  ;;  %v2572_v54 = vld [vmem:[%s3154_s5] sm:$0xff]   ;;  %v2573_v56 = vld [vmem:[%s3154_s5 + $0x48] sm:$0xff]   ;;  %v550_v58 = vld [vmem:[#allocation2 + $0x30] sm:$0x1] }
  0x39   : > { %642 = vst [vmem:[#allocation2 + $0x40] sm:$0x80] %v641_v49  ;;  %v656_v53 = vrot.slane %v580_v48, 1  ;;  %v551_v61 = vsel %vm2838_vm3, 0, %v550_v58  ;;  %v2574_v63 = vld [vmem:[%s3154_s5 + $0x88] sm:$0xff]   ;;  %v579_v1 = vrot.slane %v577_v52, 7 }
  0x3a   : > { %v2575_v0 = vld [vmem:[%s3154_s5 + $0x8] sm:$0xff]   ;;  %552 = vst [vmem:[#allocation2 + $0x30] sm:$0x1] %v551_v61  ;;  %v2576_v3 = vld [vmem:[%s3154_s5 + $0x50] sm:$0xff]   ;;  %v2579_v11 = vld [vmem:[%s3154_s5 + $0x58] sm:$0xff]  }
  0x3b   : > { %2237 = vmatpush3.bf16.msra.mxu0 %v2557_v19  ;;  %2393 = vmatpush3.bf16.msra.mxu1 %v2556_v18  ;;  %v657_v60 = vor.u32 %v656_v53, %v577_v52  ;;  %v582_v6 = vor.u32 %v580_v48, %v579_v1  ;;  %v2577_v7 = vld [vmem:[%s3154_s5 + $0x90] sm:$0xff]   ;;  %v553_v9 = vld [vmem:[#allocation2 + $0x48] sm:$0x1]  ;;  %v2580_v18 = vld [vmem:[%s3154_s5 + $0x98] sm:$0xff]  }
  0x3c   : > { %2238 = vmatprep.subr.bf16.mxu0 %v2558_v20  ;;  %2394 = vmatprep.subr.bf16.mxu1 %v2559_v21  ;;  %v2920_v8 = vld [vmem:[#allocation2 + $0x50] sm:$0xff]  ;;  %v554_v12 = vsel %vm2838_vm3, 0, %v553_v9  ;;  %v2581_v19 = vld [vmem:[%s3154_s5 + $0x18] sm:$0xff]   ;;  %v2586_v38 = vld [vmem:[%s3154_s5 + $0xa8] sm:$0xff]  }
  0x3d   : > { %v616_v57 = vld [vmem:[#allocation2 + $0x18] sm:$0xff]  ;;  %v2578_v10 = vld [vmem:[%s3154_s5 + $0x10] sm:$0xff]   ;;  %v584_v13 = vshrl.u32 %v2920_v8, 16  ;;  %555 = vst [vmem:[#allocation2 + $0x48] sm:$0x1] %v554_v12  ;;  %v587_v15 = vshll.u32 %v2920_v8, 16 }
  0x3e   : > { %v2889_v59 = vsel %vm2867_vm9, %v575_v50, %v616_v57  ;;  %v675_v62 = vld [vmem:[#allocation2 + $0x28] sm:$0xff]  ;;  %v2588_v48 = vld [vmem:[%s3154_s5 + $0x70] sm:$0xff]   ;;  %v544_v53 = vld [vmem:[#allocation2] sm:$0x1] }
  0x3f   : > { %2239 = vmatpush3.bf16.msra.mxu0 %v2560_v22  ;;  %2395 = vmatpush3.bf16.msra.mxu1 %v2559_v21  ;;  %618 = vst [vmem:[#allocation2 + $0x18] sm:$0xff] %v2889_v59  ;;  %v2903_v2 = vsel %vm2876_vm10, %v655_v55, %v675_v62  ;;  %v586_v17 = vrot.slane %v584_v13, 7  ;;  %v2582_v21 = vld [vmem:[%s3154_s5 + $0x60] sm:$0xff]   ;;  %v658_v34 = vrot.slane %v587_v15, 1  ;;  %v2587_v39 = vld [vmem:[%s3154_s5 + $0x28] sm:$0xff]   ;;  %v2589_v49 = vld [vmem:[%s3154_s5 + $0xb0] sm:$0xff]  }
  0x40   : > { %2240 = vmatprep.subr.bf16.mxu0 %v2561_v23  ;;  %2396 = vmatprep.subr.bf16.mxu1 %v2562_v24  ;;  %677 = vst [vmem:[#allocation2 + $0x28] sm:$0xff] %v2903_v2  ;;  %v678_v4 = vld [vmem:[#allocation2 + $0x40] sm:$0xff]  ;;  %v2590_v50 = vld [vmem:[%s3154_s5 + $0x30] sm:$0xff]   ;;  %v691_v52 = vld [vmem:[#allocation2 + $0x8] sm:$0xff]  ;;  %v545_v61 = vsel %vm2838_vm3, 0, %v544_v53 }
  0x41   : > { %2402 = vmatprep.mubr.bf16.mxu1 %v2903_v2  ;;  %v2913_v5 = vsel %vm2876_vm10, %v657_v60, %v678_v4  ;;  %v619_v14 = vld [vmem:[#allocation2 + $0x30] sm:$0xff]  ;;  %v589_v20 = vor.u32 %v587_v15, %v586_v17  ;;  %v2583_v22 = vld [vmem:[%s3154_s5 + $0xa0] sm:$0xff]   ;;  %v659_v46 = vor.u32 %v658_v34, %v584_v13  ;;  %v566_v55 = vshll.u32 %v691_v52, 16  ;;  %v2591_v1 = vld [vmem:[%s3154_s5 + $0x78] sm:$0xff]   ;;  %546 = vst [vmem:[#allocation2] sm:$0x1] %v545_v61 }
  0x42   : > { %680 = vst [vmem:[#allocation2 + $0x40] sm:$0xff] %v2913_v5  ;;  %v2934_v16 = vsel %vm2867_vm9, %v582_v6, %v619_v14  ;;  %v2584_v23 = vld [vmem:[%s3154_s5 + $0x20] sm:$0xff]   ;;  %v2612_v33 = vld [vmem:[%s3154_s5 + $0x1f0] sm:$0xff]  }
  0x43   : > { %2241 = vmatpush3.bf16.msra.mxu0 %v2563_v25  ;;  %2397 = vmatpush3.bf16.msra.mxu1 %v2562_v24  ;;  %621 = vst [vmem:[#allocation2 + $0x30] sm:$0xff] %v2934_v16  ;;  %v2954_v24 = vld [vmem:[#allocation2 + $0x68] sm:$0xff]  ;;  %v556_v25 = vld [vmem:[#allocation2 + $0x60] sm:$0x1]  ;;  %v652_v4 = vrot.slane %v566_v55, 1  ;;  %v2613_v40 = vld [vmem:[%s3154_s5 + $0x230] sm:$0xff]  }
  0x44   : > { %2242 = vmatprep.subr.bf16.mxu0 %v2564_v26  ;;  %2398 = vmatprep.subr.bf16.mxu1 %v2565_v27  ;;  %v591_v26 = vshrl.u32 %v2954_v24, 16  ;;  %v2594_v13 = vld [vmem:[%s3154_s5 + $0x1c0] sm:$0xff]  }
  0x45   : > { %v2595_v14 = vld [vmem:[%s3154_s5 + $0x200] sm:$0xff]  }
  0x46   : > { %v593_v37 = vrot.slane %v591_v26, 7  ;;  %v2596_v15 = vld [vmem:[%s3154_s5 + $0x180] sm:$0xff]  }
  0x47   : > { %2243 = vmatpush3.bf16.msra.mxu0 %v2566_v28  ;;  %2399 = vmatpush3.bf16.msra.mxu1 %v2565_v27  ;;  %v594_v27 = vshll.u32 %v2954_v24, 16  ;;  %v643_v28 = vld [vmem:[#allocation2 + $0x58] sm:$0x80]  ;;  %v540_v34 = vld [vmem:[#allocation2 + $0x80] sm:$0xff] }
  0x48   : > { %2244 = vmatprep.subr.bf16.mxu0 %v2567_v29  ;;  %2400 = vmatprep.subr.bf16.mxu1 %v2568_v30  ;;  %v622_v29 = vld [vmem:[#allocation2 + $0x48] sm:$0xff]  ;;  %v644_v32 = vsel %vm2851_vm8, 0, %v643_v28  ;;  %v613_v17 = vld [vmem:[#allocation2] sm:$0xff]  ;;  %v2605_v28 = vld [vmem:[%s3154_s5 + $0x198] sm:$0xff]  }
  0x49   : > { %v2964_v35 = vsel %vm2867_vm9, %v589_v20, %v622_v29  ;;  %645 = vst [vmem:[#allocation2 + $0x58] sm:$0x80] %v644_v32  ;;  %v596_v44 = vor.u32 %v594_v27, %v593_v37  ;;  %v2606_v29 = vld [vmem:[%s3154_s5 + $0x1e0] sm:$0xff]   ;;  %v2609_v32 = vld [vmem:[%s3154_s5 + $0x1e8] sm:$0xff]   ;;  %v601_v37 = vshll.u32 %v540_v34, 16 }
  0x4a   : > { %624 = vst [vmem:[#allocation2 + $0x48] sm:$0xff] %v2964_v35 }
  0x4b   : > { %2245 = vmatpush3.bf16.msra.mxu0 %v2569_v36  ;;  %2401 = vmatpush3.bf16.msra.mxu1 %v2568_v30  ;;  %v557_v30 = vsel %vm2838_vm3, 0, %v556_v25  ;;  %v2585_v36 = vld [vmem:[%s3154_s5 + $0x68] sm:$0xff]   ;;  %v2600_v25 = vld [vmem:[%s3154_s5 + $0x1d0] sm:$0xff]  }
  0x4c   : > { %2282 = vmatprep.subr.bf16.mxu0 %v2570_v41  ;;  %2410 = vmatprep.subr.bf16.mxu1 %v2571_v43  ;;  %558 = vst [vmem:[#allocation2 + $0x60] sm:$0x1] %v557_v30  ;;  %v646_v41 = vld [vmem:[#allocation2 + $0x70] sm:$0x80]  ;;  %v2608_v30 = vld [vmem:[%s3154_s5 + $0x1a0] sm:$0xff]  }
  0x4d   : > { %v647_v42 = vsel %vm2851_vm8, 0, %v646_v41 }
  0x4e   : > { %988 = vmatmul.mubr.bf16.vlgmr.msra.gmra.mrb[0].mxu0 %v2889_v59  ;;  %2403 = vmatmul.mubr.bf16.vlgmr.msra.gmra.mrb[0].mxu1 %v2913_v5  ;;  %648 = vst [vmem:[#allocation2 + $0x70] sm:$0x80] %v647_v42  ;;  %v2610_v42 = vld [vmem:[%s3154_s5 + $0x228] sm:$0xff]  }
  0x4f   : > { %2283 = vmatpush3.bf16.msra.mxu0 %v2572_v54  ;;  %995 = vmatprep.mubr.bf16.mxu0 %v2863_v45  ;;  %v563_v54 = vshrl.u32 %v691_v52, 16 }
  0x50   : > { %2284 = vmatprep.subr.bf16.mxu0 %v2573_v56  ;;  %2411 = vmatpush3.bf16.msra.mxu1 %v2571_v43  ;;  %v660_v43 = vrot.slane %v594_v27, 1  ;;  %v634_v56 = vld [vmem:[#allocation2 + $0x10] sm:$0x80]  ;;  %v681_v58 = vld [vmem:[#allocation2 + $0x58] sm:$0xff] }
  0x51   : > { %2412 = vmatprep.subr.bf16.mxu1 %v2574_v63  ;;  %v635_v62 = vsel %vm2851_vm8, 0, %v634_v56  ;;  %v653_v12 = vor.u32 %v652_v4, %v563_v54  ;;  %v2602_v27 = vld [vmem:[%s3154_s5 + $0x190] sm:$0xff]   ;;  %v2617_v56 = vld [vmem:[%s3154_s5 + $0x1b8] sm:$0xff]  }
  0x52   : > { %v661_v60 = vor.u32 %v660_v43, %v591_v26  ;;  %636 = vst [vmem:[#allocation2 + $0x10] sm:$0x80] %v635_v62  ;;  %v2601_v26 = vld [vmem:[%s3154_s5 + $0x210] sm:$0xff]   ;;  %v2611_v43 = vld [vmem:[%s3154_s5 + $0x1a8] sm:$0xff]  }
  0x53   : > { %2285 = vmatpush3.bf16.msra.mxu0 %v2575_v0  ;;  %v625_v57 = vld [vmem:[#allocation2 + $0x60] sm:$0xff]  ;;  %v2999_v0 = vsel %vm2876_vm10, %v659_v46, %v681_v58 }
  0x54   : > { %2286 = vmatprep.subr.bf16.mxu0 %v2576_v3  ;;  %2413 = vmatpush3.bf16.msra.mxu1 %v2574_v63  ;;  %v2995_v63 = vsel %vm2867_vm9, %v596_v44, %v625_v57  ;;  %v565_v3 = vrot.slane %v563_v54, 7  ;;  %683 = vst [vmem:[#allocation2 + $0x58] sm:$0xff] %v2999_v0  ;;  %v662_v44 = vrot.slane %v601_v37, 1 }
  0x55   : > { %2414 = vmatprep.subr.bf16.mxu1 %v2577_v7  ;;  %627 = vst [vmem:[#allocation2 + $0x60] sm:$0xff] %v2995_v63  ;;  %2406 = vmatprep.mubr.bf16.mxu1 %v2999_v0  ;;  %v684_v6 = vld [vmem:[#allocation2 + $0x70] sm:$0xff] }
  0x56   : > { %996 = vmatmul.mubr.bf16.gmra.mrb[4].mxu0 %v2934_v16  ;;  %v3013_v9 = vsel %vm2876_vm10, %v661_v60, %v684_v6 }
  0x57   : > { %2287 = vmatpush3.bf16.msra.mxu0 %v2578_v10  ;;  %1003 = vmatprep.mubr.bf16.mxu0 %v2920_v8  ;;  %v2593_v10 = vld [vmem:[%s3154_s5 + $0x38] sm:$0xff]   ;;  %686 = vst [vmem:[#allocation2 + $0x70] sm:$0xff] %v3013_v9 }
  0x58   : > { %2288 = vmatprep.subr.bf16.mxu0 %v2579_v11  ;;  %2415 = vmatpush3.bf16.msra.mxu1 %v2577_v7  ;;  %v2592_v7 = vld [vmem:[%s3154_s5 + $0xb8] sm:$0xff]   ;;  %v568_v11 = vor.u32 %v566_v55, %v565_v3 }
  0x59   : > { %2416 = vmatprep.subr.bf16.mxu1 %v2580_v18  ;;  %2407 = vmatmul.mubr.bf16.gmra.mrb[4].mxu1 %v3013_v9  ;;  %v2616_v55 = vld [vmem:[%s3154_s5 + $0x238] sm:$0xff]  }
  0x5b   : > { %2289 = vmatpush3.bf16.msra.mxu0 %v2581_v19  ;;  %v614_v19 = vsel %vm2867_vm9, %v568_v11, %v613_v17 }
  0x5c   : > { %2290 = vmatprep.subr.bf16.mxu0 %v2582_v21  ;;  %2417 = vmatpush3.bf16.msra.mxu1 %v2580_v18  ;;  %v672_v18 = vld [vmem:[#allocation2 + $0x10] sm:$0xff]  ;;  %v2597_v21 = vld [vmem:[%s3154_s5 + $0x1c8] sm:$0xff]   ;;  %615 = vst [vmem:[#allocation2] sm:$0xff] %v614_v19 }
  0x5d   : > { %2418 = vmatprep.subr.bf16.mxu1 %v2583_v22  ;;  %v673_v20 = vsel %vm2876_vm10, %v653_v12, %v672_v18 }
  0x5e   : > { %1004 = vmatmul.mubr.bf16.gmra.mrb[8].mxu0 %v2964_v35  ;;  %674 = vst [vmem:[#allocation2 + $0x10] sm:$0xff] %v673_v20  ;;  %2426 = vmatprep.mubr.bf16.mxu1 %v673_v20 }
  0x5f   : > { %2291 = vmatpush3.bf16.msra.mxu0 %v2584_v23  ;;  %1011 = vmatprep.mubr.bf16.mxu0 %v2954_v24  ;;  %v2599_v23 = vld [vmem:[%s3154_s5 + $0x188] sm:$0xff]  }
  0x60   : > { %2292 = vmatprep.subr.bf16.mxu0 %v2585_v36  ;;  %2419 = vmatpush3.bf16.msra.mxu1 %v2583_v22  ;;  %v2598_v22 = vld [vmem:[%s3154_s5 + $0x208] sm:$0xff]   ;;  %v598_v36 = vshrl.u32 %v540_v34, 16 }
  0x61   : > { %2420 = vmatprep.subr.bf16.mxu1 %v2586_v38 }
  0x62   : > { %v600_v46 = vrot.slane %v598_v36, 7 }
  0x63   : > { %2293 = vmatpush3.bf16.msra.mxu0 %v2587_v39  ;;  %v559_v39 = vld [vmem:[#allocation2 + $0x78] sm:$0x1] }
  0x64   : > { %2294 = vmatprep.subr.bf16.mxu0 %v2588_v48  ;;  %2421 = vmatpush3.bf16.msra.mxu1 %v2586_v38  ;;  %v649_v38 = vld [vmem:[#allocation2 + $0x88] sm:$0x80]  ;;  %v560_v41 = vsel %vm2838_vm3, 0, %v559_v39  ;;  %v2614_v48 = vld [vmem:[%s3154_s5 + $0x1b0] sm:$0xff]  }
  0x65   : > { %2422 = vmatprep.subr.bf16.mxu1 %v2589_v49  ;;  %561 = vst [vmem:[#allocation2 + $0x78] sm:$0x1] %v560_v41 }
  0x66   : > { %1012 = vmatmul.mubr.bf16.gmra.mrb[12].mxu0 %v2995_v63 }
  0x67   : > { %2295 = vmatpush3.bf16.msra.mxu0 %v2590_v50  ;;  %1261 = vmatprep.mubr.bf16.mxu0 %v691_v52  ;;  %v603_v50 = vor.u32 %v601_v37, %v600_v46  ;;  %v2615_v52 = vld [vmem:[%s3154_s5 + $0x1f8] sm:$0xff]  }
  0x68   : > { %2296 = vmatprep.subr.bf16.mxu0 %v2591_v1  ;;  %2423 = vmatpush3.bf16.msra.mxu1 %v2589_v49  ;;  %v663_v49 = vor.u32 %v662_v44, %v598_v36 }
  0x69   : > { %2424 = vmatprep.subr.bf16.mxu1 %v2592_v7 }
  0x6b   : > { %2297 = vmatpush3.bf16.msra.mxu0 %v2593_v10 }
  0x6c   : > { %2334 = vmatprep.subr.bf16.mxu0 %v2594_v13  ;;  %2425 = vmatpush3.bf16.msra.mxu1 %v2592_v7  ;;  %v628_v54 = vld [vmem:[#allocation2 + $0x78] sm:$0xff] }
  0x6d   : > { %2434 = vmatprep.subr.bf16.mxu1 %v2595_v14  ;;  %v629_v58 = vsel %vm2867_vm9, %v603_v50, %v628_v54 }
  0x6e   : > { %1262 = vmatmul.mubr.bf16.vlgmr.msra.gmra.mrb[16].mxu0 %v614_v19  ;;  %630 = vst [vmem:[#allocation2 + $0x78] sm:$0xff] %v629_v58 }
  0x6f   : > { %2335 = vmatpush3.bf16.msra.mxu0 %v2596_v15  ;;  %1269 = vmatprep.mubr.bf16.mxu0 %v2836_v31  ;;  %v2603_v31 = vld [vmem:[%s3154_s5 + $0x1d8] sm:$0xff]  }
  0x70   : > { %2336 = vmatprep.subr.bf16.mxu0 %v2597_v21  ;;  %2427 = vmatmul.mubr.bf16.vlgmr.msra.gmra.mrb[0].mxu1 %v2903_v2  ;;  %v2604_v2 = vld [vmem:[%s3154_s5 + $0x218] sm:$0xff]  }
  0x71   : > { %2435 = vmatpush3.bf16.msra.mxu1 %v2595_v14  ;;  %2430 = vmatprep.mubr.bf16.mxu1 %v2913_v5 }
  0x72   : > { %2436 = vmatprep.subr.bf16.mxu1 %v2598_v22 }
  0x73   : > { %2337 = vmatpush3.bf16.msra.mxu0 %v2599_v23 }
  0x74   : > { %2338 = vmatprep.subr.bf16.mxu0 %v2600_v25 }
  0x75   : > { %2437 = vmatpush3.bf16.msra.mxu1 %v2598_v22 }
  0x76   : > { %1270 = vmatmul.mubr.bf16.gmra.mrb[20].mxu0 %v2889_v59  ;;  %2438 = vmatprep.subr.bf16.mxu1 %v2601_v26  ;;  %v2607_v59 = vld [vmem:[%s3154_s5 + $0x220] sm:$0xff]  }
  0x77   : > { %2339 = vmatpush3.bf16.msra.mxu0 %v2602_v27  ;;  %1277 = vmatprep.mubr.bf16.mxu0 %v2863_v45 }
  0x78   : > { %2340 = vmatprep.subr.bf16.mxu0 %v2603_v31  ;;  %2431 = vmatmul.mubr.bf16.gmra.mrb[4].mxu1 %v2999_v0 }
  0x79   : > { %2439 = vmatpush3.bf16.msra.mxu1 %v2601_v26  ;;  %2450 = vmatprep.mubr.bf16.mxu1 %v2913_v5  ;;  %v650_v5 = vsel %vm2851_vm8, 0, %v649_v38 }
  0x7a   : > { %2440 = vmatprep.subr.bf16.mxu1 %v2604_v2  ;;  %651 = vst [vmem:[#allocation2 + $0x88] sm:$0x80] %v650_v5 }
  0x7b   : > { %2341 = vmatpush3.bf16.msra.mxu0 %v2605_v28 }
  0x7c   : > { %2342 = vmatprep.subr.bf16.mxu0 %v2606_v29 }
  0x7d   : > { %2441 = vmatpush3.bf16.msra.mxu1 %v2604_v2 }
  0x7e   : > { %1278 = vmatmul.mubr.bf16.gmra.mrb[24].mxu0 %v2934_v16  ;;  %2442 = vmatprep.subr.bf16.mxu1 %v2607_v59 }
  0x7f   : > { %2343 = vmatpush3.bf16.msra.mxu0 %v2608_v30  ;;  %1285 = vmatprep.mubr.bf16.mxu0 %v2920_v8 }
  0x80   : > { %2344 = vmatprep.subr.bf16.mxu0 %v2609_v32 }
  0x81   : > { %2443 = vmatpush3.bf16.msra.mxu1 %v2607_v59  ;;  %v687_v53 = vld [vmem:[#allocation2 + $0x88] sm:$0xff] }
  0x82   : > { %2444 = vmatprep.subr.bf16.mxu1 %v2610_v42  ;;  %v688_v57 = vsel %vm2876_vm10, %v663_v49, %v687_v53 }
  0x83   : > { %2345 = vmatpush3.bf16.msra.mxu0 %v2611_v43  ;;  %689 = vst [vmem:[#allocation2 + $0x88] sm:$0xff] %v688_v57 }
  0x84   : > { %2346 = vmatprep.subr.bf16.mxu0 %v2612_v33 }
  0x85   : > { %2445 = vmatpush3.bf16.msra.mxu1 %v2610_v42 }
  0x86   : > { %1286 = vmatmul.mubr.bf16.gmra.mrb[28].mxu0 %v2964_v35  ;;  %2446 = vmatprep.subr.bf16.mxu1 %v2613_v40 }
  0x87   : > { %2347 = vmatpush3.bf16.msra.mxu0 %v2614_v48  ;;  %1597 = vmatprep.mubr.bf16.mxu0 %v2863_v45 }
  0x88   : > { %2348 = vmatprep.subr.bf16.mxu0 %v2615_v52 }
  0x89   : > { %2447 = vmatpush3.bf16.msra.mxu1 %v2613_v40 }
  0x8a   : > { %2448 = vmatprep.subr.bf16.mxu1 %v2616_v55 }
  0x8b   : > { %2349 = vmatpush3.bf16.msra.mxu0 %v2617_v56 }
  0x8d   : > { %2449 = vmatpush3.bf16.msra.mxu1 %v2616_v55 }
  0x8e   : > { %1598 = vmatmul.mubr.bf16.vlgmr.msra.gmra.mrb[32].mxu0 %v2934_v16 }
  0x8f   : > { %1605 = vmatprep.mubr.bf16.mxu0 %v2920_v8 }
  0x90   : > { %2451 = vmatmul.mubr.bf16.vlgmr.msra.gmra.mrb[0].mxu1 %v2999_v0 }
  0x91   : > { %2454 = vmatprep.mubr.bf16.mxu1 %v3013_v9 }
  0x96   : > { %1606 = vmatmul.mubr.bf16.gmra.mrb[36].mxu0 %v2964_v35 }
  0x97   : > { %1613 = vmatprep.mubr.bf16.mxu0 %v2954_v24 }
  0x98   : > { %2455 = vmatmul.mubr.bf16.gmra.mrb[4].mxu1 %v688_v57 }
  0x9e   : > { %1614 = vmatmul.mubr.bf16.gmra.mrb[40].mxu0 %v2995_v63 }
  0x9f   : > { %1621 = vmatprep.mubr.bf16.mxu0 %v540_v34 }
  0xa6   : > { %1622 = vmatmul.mubr.bf16.gmra.mrb[44].mxu0 %v629_v58 }
 0x121   : > { %v2246_v45 = vpop.f32.mrb[0].mxu0 }
 0x122   : > { %v2247_v47 = vpop.f32.mrb[1].mxu0 }
 0x123   : > { %v2248_v51 = vadd.f32 %v2247_v47, %v2246_v45  ;;  %v2249_v60 = vpop.f32.mrb[2].mxu0 }
 0x124   : > { %v2250_v16 = vpop.f32.mrb[3].mxu0 }
 0x125   : > { %v2251_v61 = vadd.f32 %v2250_v16, %v2249_v60 }
 0x129   : > { %v2252_v8 = vpop.f32.mrb[4].mxu0 }
 0x12a   : > { %v2253_v62 = vpop.f32.mrb[5].mxu0 }
 0x12b   : > { %v2254_v0 = vadd.f32 %v2253_v62, %v2252_v8  ;;  %v2255_v1 = vpop.f32.mrb[6].mxu0 }
 0x12c   : > { %v2256_v3 = vpop.f32.mrb[7].mxu0 }
 0x12d   : > { %v2257_v4 = vadd.f32 %v2256_v3, %v2255_v1 }
 0x131   : > { %v2258_v35 = vpop.f32.mrb[8].mxu0 }
 0x132   : > { %v2259_v6 = vpop.f32.mrb[9].mxu0 }
 0x133   : > { %v2260_v24 = vadd.f32 %v2259_v6, %v2258_v35  ;;  %v2261_v7 = vpop.f32.mrb[10].mxu0 }
 0x134   : > { %v2262_v9 = vpop.f32.mrb[11].mxu0 }
 0x135   : > { %v2263_v63 = vadd.f32 %v2262_v9, %v2261_v7 }
 0x139   : > { %v2264_v10 = vpop.f32.mrb[12].mxu0 }
 0x13a   : > { %v2265_v11 = vpop.f32.mrb[13].mxu0 }
 0x13b   : > { %v2266_v12 = vadd.f32 %v2265_v11, %v2264_v10  ;;  %v2267_v13 = vpop.f32.mrb[14].mxu0 }
 0x13c   : > { %v2268_v14 = vpop.f32.mrb[15].mxu0 }
 0x13d   : > { %v2269_v15 = vadd.f32 %v2268_v14, %v2267_v13 }
 0x141   : > { %v2298_v17 = vpop.f32.mrb[16].mxu0 }
 0x142   : > { %v2299_v18 = vpop.f32.mrb[17].mxu0 }
 0x143   : > { %v2300_v19 = vadd.f32 %v2299_v18, %v2298_v17  ;;  %v2301_v20 = vpop.f32.mrb[18].mxu0 }
 0x144   : > { %v2302_v21 = vpop.f32.mrb[19].mxu0 }
 0x145   : > { %v2461_v22 = vadd.f32 %v2300_v19, %v2248_v51  ;;  %v2303_v23 = vadd.f32 %v2302_v21, %v2301_v20 }
 0x147   : > { %v2467_v25 = vadd.f32 %v2303_v23, %v2251_v61 }
 0x149   : > { %v2304_v26 = vpop.f32.mrb[20].mxu0 }
 0x14a   : > { %v2305_v27 = vpop.f32.mrb[21].mxu0 }
 0x14b   : > { %v2306_v31 = vadd.f32 %v2305_v27, %v2304_v26  ;;  %v2307_v2 = vpop.f32.mrb[22].mxu0 }
 0x14c   : > { %v2308_v28 = vpop.f32.mrb[23].mxu0 }
 0x14d   : > { %v2458_v29 = vadd.f32 %v2306_v31, %v2254_v0  ;;  %v2309_v59 = vadd.f32 %v2308_v28, %v2307_v2 }
 0x14f   : > { %v2464_v30 = vadd.f32 %v2309_v59, %v2257_v4 }
 0x151   : > { %v2310_v32 = vpop.f32.mrb[24].mxu0 }
 0x152   : > { %v2311_v34 = vpop.f32.mrb[25].mxu0 }
 0x153   : > { %v2312_v36 = vadd.f32 %v2311_v34, %v2310_v32  ;;  %v2313_v37 = vpop.f32.mrb[26].mxu0 }
 0x154   : > { %v2314_v38 = vpop.f32.mrb[27].mxu0 }
 0x155   : > { %v2473_v39 = vadd.f32 %v2312_v36, %v2260_v24  ;;  %v2315_v5 = vadd.f32 %v2314_v38, %v2313_v37 }
 0x157   : > { %v2479_v41 = vadd.f32 %v2315_v5, %v2263_v63 }
 0x159   : > { %v2316_v42 = vpop.f32.mrb[28].mxu0 }
 0x15a   : > { %v2317_v43 = vpop.f32.mrb[29].mxu0 }
 0x15b   : > { %v2318_v44 = vadd.f32 %v2317_v43, %v2316_v42  ;;  %v2319_v46 = vpop.f32.mrb[30].mxu0 }
 0x15c   : > { %v2320_v33 = vpop.f32.mrb[31].mxu0 }
 0x15d   : > { %v3122_v40 = vadd.f32 %v2318_v44, %v2266_v12  ;;  %v2321_v48 = vadd.f32 %v2320_v33, %v2319_v46 }
 0x15f   : > { %v3124_v49 = vadd.f32 %v2321_v48, %v2269_v15 }
 0x161   : > { %v2350_v50 = vpop.f32.mrb[32].mxu0 }
 0x162   : > { %v2351_v52 = vpop.f32.mrb[33].mxu0 }
 0x163   : > { %v2352_v53 = vadd.f32 %v2351_v52, %v2350_v50  ;;  %v2353_v54 = vpop.f32.mrb[34].mxu0  ;;  %v2452_v55 = vpop.f32.mrb[0].mxu1 }
 0x164   : > { %v2354_v56 = vpop.f32.mrb[35].mxu0  ;;  %v1664_v57 = vpop.f32.mrb[1].mxu1 }
 0x165   : > { %v2462_v58 = vadd.f32 %v2461_v22, %v2352_v53  ;;  %v2355_v45 = vadd.f32 %v2354_v56, %v2353_v54  ;;  %v2453_v47 = vpop.f32.mrb[2].mxu1 }
 0x166   : > { %v1667_v60 = vpop.f32.mrb[3].mxu1 }
 0x167   : > { %v2463_v51 = vadd.f32 %v2462_v58, %v1664_v57  ;;  %v2468_v16 = vadd.f32 %v2467_v25, %v2355_v45 }
 0x169   : > { %v2469_v61 = vadd.f32 %v2468_v16, %v1667_v60  ;;  %v2356_v8 = vpop.f32.mrb[36].mxu0  ;;  %v1717_v62 = vmul.f32 %v2463_v51, %v2463_v51 }
 0x16a   : > { %v2357_v0 = vpop.f32.mrb[37].mxu0 }
 0x16b   : > { %v1703_v1 = vadd.f32 %v2469_v61, %v2463_v51  ;;  %v1718_v3 = vmul.f32 %v2469_v61, %v2469_v61  ;;  %v2210_v4 = vpack.c.bf16 %v2469_v61, %v2463_v51  ;;  %v2358_v35 = vadd.f32 %v2357_v0, %v2356_v8  ;;  %v2359_v6 = vpop.f32.mrb[38].mxu0  ;;  %v2456_v24 = vpop.f32.mrb[4].mxu1 }
 0x16c   : > { %v2360_v7 = vpop.f32.mrb[39].mxu0  ;;  %v1680_v10 = vpop.f32.mrb[5].mxu1 }
 0x16d   : > { %v1725_v9 = vadd.f32 %v1718_v3, %v1717_v62  ;;  %2211 = vst [vmem:[%s2748_s19] sm:$0xff] %v2210_v4   ;;  %v2459_v63 = vadd.f32 %v2458_v29, %v2358_v35  ;;  %v2361_v11 = vadd.f32 %v2360_v7, %v2359_v6  ;;  %v2457_v12 = vpop.f32.mrb[6].mxu1 }
 0x16e   : > { %v1683_v15 = vpop.f32.mrb[7].mxu1 }
 0x16f   : > { %v2460_v13 = vadd.f32 %v2459_v63, %v2452_v55  ;;  %v2465_v14 = vadd.f32 %v2464_v30, %v2361_v11 }
 0x171   : > { %v1704_v17 = vadd.f32 %v2460_v13, %v1703_v1  ;;  %v1719_v18 = vmul.f32 %v2460_v13, %v2460_v13  ;;  %v2466_v19 = vadd.f32 %v2465_v14, %v2453_v47  ;;  %v2362_v20 = vpop.f32.mrb[40].mxu0 }
 0x172   : > { %v2363_v21 = vpop.f32.mrb[41].mxu0 }
 0x173   : > { %v1726_v22 = vadd.f32 %v1725_v9, %v1719_v18  ;;  %v1705_v23 = vadd.f32 %v2466_v19, %v1704_v17  ;;  %v1720_v25 = vmul.f32 %v2466_v19, %v2466_v19  ;;  %v2215_v26 = vpack.c.bf16 %v2466_v19, %v2460_v13  ;;  %v2365_v27 = vpop.f32.mrb[42].mxu0 }
 0x174   : > { %v2364_v31 = vadd.f32 %v2363_v21, %v2362_v20  ;;  %v2366_v2 = vpop.f32.mrb[43].mxu0 }
 0x175   : > { %v1727_v28 = vadd.f32 %v1726_v22, %v1720_v25  ;;  %2227 = vst [vmem:[%s2748_s19 + $0x8] sm:$0xff] %v2215_v26   ;;  %v2367_v29 = vadd.f32 %v2366_v2, %v2365_v27 }
 0x176   : > { %v2474_v59 = vadd.f32 %v2473_v39, %v2364_v31 }
 0x177   : > { %v2480_v32 = vadd.f32 %v2479_v41, %v2367_v29 }
 0x178   : > { %v2475_v30 = vadd.f32 %v2474_v59, %v1680_v10 }
 0x179   : > { %v2481_v34 = vadd.f32 %v2480_v32, %v1683_v15  ;;  %v2368_v36 = vpop.f32.mrb[44].mxu0 }
 0x17a   : > { %v1706_v37 = vadd.f32 %v2475_v30, %v1705_v23  ;;  %v1721_v38 = vmul.f32 %v2475_v30, %v2475_v30  ;;  %v2369_v5 = vpop.f32.mrb[45].mxu0 }
 0x17b   : > { %v1722_v42 = vmul.f32 %v2481_v34, %v2481_v34  ;;  %v2220_v43 = vpack.c.bf16 %v2481_v34, %v2475_v30  ;;  %v2370_v44 = vadd.f32 %v2369_v5, %v2368_v36  ;;  %v2371_v46 = vpop.f32.mrb[46].mxu0 }
 0x17c   : > { %v1728_v33 = vadd.f32 %v1727_v28, %v1721_v38  ;;  %v1707_v48 = vadd.f32 %v2481_v34, %v1706_v37  ;;  %v2372_v50 = vpop.f32.mrb[47].mxu0 }
 0x17d   : > { %2228 = vst [vmem:[%s2748_s19 + $0x10] sm:$0xff] %v2220_v43   ;;  %v2471_v52 = vadd.f32 %v3122_v40, %v2370_v44  ;;  %v2373_v53 = vadd.f32 %v2372_v50, %v2371_v46 }
 0x17e   : > { %v1729_v39 = vadd.f32 %v1728_v33, %v1722_v42 }
 0x17f   : > { %v2472_v41 = vadd.f32 %v2471_v52, %v2456_v24  ;;  %v2477_v54 = vadd.f32 %v3124_v49, %v2373_v53 }
 0x181   : > { %v1708_v55 = vadd.f32 %v2472_v41, %v1707_v48  ;;  %v1723_v56 = vmul.f32 %v2472_v41, %v2472_v41  ;;  %v2478_v57 = vadd.f32 %v2477_v54, %v2457_v12 }
 0x183   : > { %v1730_v58 = vadd.f32 %v1729_v39, %v1723_v56  ;;  %v1709_v45 = vadd.f32 %v2478_v57, %v1708_v55  ;;  %v1724_v47 = vmul.f32 %v2478_v57, %v2478_v57  ;;  %v2225_v51 = vpack.c.bf16 %v2478_v57, %v2472_v41 }
 0x185   : > { %v1710_v60 = vrot.slane %v1709_v45, 4  ;;  %v1731_v16 = vadd.f32 %v1730_v58, %v1724_v47  ;;  %2229 = vst [vmem:[%s2748_s19 + $0x18] sm:$0xff] %v2225_v51  }
 0x187   : > { %v1711_v61 = vadd.f32 %v1710_v60, %v1709_v45  ;;  %v1732_v8 = vrot.slane %v1731_v16, 4 }
 0x189   : > { %v1712_v40 = vrot.slane %v1711_v61, 2  ;;  %v1733_v62 = vadd.f32 %v1732_v8, %v1731_v16 }
 0x18b   : > { %v1713_v0 = vadd.f32 %v1712_v40, %v1711_v61  ;;  %v1734_v1 = vrot.slane %v1733_v62, 2 }
 0x18d   : > { %v1714_v3 = vrot.slane %v1713_v0, 1  ;;  %v1735_v49 = vadd.f32 %v1734_v1, %v1733_v62 }
 0x18f   : > { %v1715_v4 = vadd.f32 %v1714_v3, %v1713_v0  ;;  %v1736_v35 = vrot.slane %v1735_v49, 1 }
 0x191   : > { %1716 = vst [vmem:[%s2756_s12] sm:$0x1] %v1715_v4  ;;  %v1737_v6 = vadd.f32 %v1736_v35, %v1735_v49 }
 0x193   : > { %1738 = vst [vmem:[%s2756_s12 + $0x1] sm:$0x1] %v1737_v6 }
 0x194 PF: > { %s18_s3 = sadd.s32 1, %s2656_s3   ;;  %s3165_s24 = smov %s2648_s26 }
 0x195   : > { %p15_p13 = scmp.ge.s32.totalorder %s18_s3, 10   ;;  %s3166_s25 = smov %s2652_s27 }
 0x196   : > { %s3167_s26 = smov %s3170_s4  ;;  %s3168_s27 = smov %s3174_s28 }
 0x197   :  { %17 = sbr.rel (!%p15_p13) target bundleno = 3 (0x3), region = 105 }

// kernel: up_forward.4
= control target key start
LH: loop header
LB: loop body
LE: loop exit
PB: predicated region body
PF: predicated region fallthrough
CT: control target
= control target key end

     0   :  { %s2749_s24 = smov 0   ;;  %s2751_s25 = smov 0   ;;  %s3234_s0 = inlined_call_operand.vmem [shape: bf16[2,16,16,128], index: 0, kind: input, shape index: {}, may-alias: {0,1,2}]   ;;  %s3235_s1 = inlined_call_operand.vmem [shape: bf16[2,16,16,128], index: 1, kind: input, shape index: {}, may-alias: {0,1,2}]   ;;  %s3236_s2 = inlined_call_operand.vmem [shape: bf16[2,16,16,128], index: 2, kind: input, shape index: {}, may-alias: {0,1,2}]   ;;  %s3237_s3 = inlined_call_operand.vmem [shape: f32[1,128], index: 3, kind: input, shape index: {}]   ;;  %s3238_s4 = inlined_call_operand.vmem [shape: f32[1,128], index: 4, kind: input, shape index: {}]   ;;  %s3239_s5 = inlined_call_operand.vmem [shape: bf16[3,384,128], index: 5, kind: input, shape index: {}]   ;;  %s3240_s6 = inlined_call_operand.vmem [shape: bf16[2,16,16,128], index: 6, kind: output, shape index: {0}]   ;;  %s3241_s7 = inlined_call_operand.vmem [shape: f32[2,4,2,128], index: 7, kind: output, shape index: {1}]  }
   0x1   :  { %s2753_s26 = smov 0   ;;  %s2755_s27 = smov 0  }
   0x2   :  { %s2757_s28 = smov 0  }
   0x3 LB: > { %s27_s29 = sadd.s32 1, %s2697_s26  ;;  %s30_s30 = sadd.s32 1, %s2701_s27  ;;  %s2705_s28 = sphi %s2757_s28, %s18_s28   ;;  %s2701_s27 = sphi %s2755_s27, %s3256_s27   ;;  %s2697_s26 = sphi %s2753_s26, %s3255_s26   ;;  %s2693_s25 = sphi %s2751_s25, %s3254_s25   ;;  %s2689_s24 = sphi %s2749_s24, %s3253_s24  }
   0x4   : > { %p28_p0 = scmp.ge.s32.totalorder %s27_s29, 4  ;;  %p2009_p1 = scmp.ge.s32.totalorder %s2705_s28, 1 }
   0x5   : > { %p328_p2 = scmp.lt.s32.totalorder %s2705_s28, 9 }
   0x6   : > { %s3258_s29 = smov (%p28_p0, %s27_s29), 0  ;;  %s3260_s30 = smov (!%p28_p0, %s30_s30), %s2701_s27 }
   0x7   : > { %p329_p3 = pnand %p2009_p1, %p328_p2  ;;  %p32_p4 = scmp.ge.s32.totalorder %s3260_s30, 2 }
   0x8   : > { %s2010_s8 = sshll.u32 (!%p329_p3), %s2689_s24, 2  ;;  %p405_p5 = scmp.lt.s32.totalorder (!%p329_p3), %s2693_s25, 1  ;;  %v2802_v0 = vld [vmem:[%s3237_s3] ss:$0 sm:$0xff] (!%p329_p3) }
   0x9   : > { %s3262_s30 = smov (%p32_p4, %s3260_s30), 0  ;;  %332 = sbr.rel (%p329_p3) target bundleno = 418 (0x1a2), region = 44 }
   0xa   : > { %3242 = sst [smem:[#allocation3_spill]] %s3262_s30  ;;  %s2015_s9 = sadd.s32 (!%p329_p3), 4294967295, %s2010_s8  ;;  %v2809_v4 = vld [vmem:[%s3238_s4] ss:$0 sm:$0xff] (!%p329_p3) }
   0xb   : > { %p462_p6 = scmp.lt.s32.totalorder (!%p329_p3), %s2689_s24, 3  ;;  %p417_p7 = scmp.gt.s32.totalorder (!%p329_p3), %s2015_s9, 0 }
   0xc   : > { %p2016_p8 = scmp.lt.s32.totalorder (!%p329_p3), %s2015_s9, 15  ;;  %p407_p9 = scmp.lt.s32.totalorder (!%p329_p3), %s2010_s8, 15 }
   0xd   : > { %s2226_s21 = sadd.s32 (!%p329_p3), 4, %s2010_s8  ;;  %p2039_p11 = scmp.ne.s32.totalorder (!%p329_p3), %s2689_s24, 0 }
   0xe   : > { %p2795_p10 = scmp.lt.s32.totalorder (!%p329_p3), %s2226_s21, 15 }
  0x10   : > { %s3264_s25 = smov (!%p405_p5, %s2693_s25), 1  ;;  %s3266_s9 = smov (!%p417_p7, %s2015_s9), 0 }
  0x11   : > { %s2783_s10 = sshll.u32 %s3264_s25, 5  ;;  %s2035_s11 = sshll.u32 %s3264_s25, 2  ;;  %v2707_v62 = vmov (!%p2039_p11), 0  }
  0x12   : > { %s463_s12 = scalar_select %p462_p6, %s2689_s24, 3 }
  0x13   : > { %s3268_s9 = smov (!%p2016_p8, %s3266_s9), 15  ;;  %s3270_s8 = smov (!%p407_p9, %s2010_s8), 15 }
  0x14   : > { %s465_s13 = sadd.s32 %s2035_s11, %s463_s12  ;;  %s2021_s14 = sshll.u32 %s3268_s9, 1 }
  0x15   : > { %s2036_s15 = sshll.u32 %s465_s13, 1  ;;  %s425_s16 = sadd.s32 %s2021_s14, %s2783_s10 }
  0x16   : > { %s2790_s19 = scalar_lea.vmem %s3241_s7, %s2036_s15  ;;  %s2023_s20 = sshll.u32 %s425_s16, 2 }
  0x17   : > { %s427_s25 = scalar_lea.vmem %s3235_s1, %s2023_s20  ;;  %s3272_s21 = smov (!%p2795_p10, %s2226_s21), 15 }
  0x18   : > { %v2236_v1 = vld [vmem:[%s427_s25] sm:$0xff]   ;;  %s2011_s14 = sshll.u32 %s3270_s8, 1  ;;  %s3274_s21 = smov (!%p2795_p10, %s3272_s21), 15 }
  0x19   : > { %v2237_v2 = vunpack.c.l.bf16 %v2236_v1  ;;  %v2238_v3 = vunpack.c.h.bf16 %v2236_v1  ;;  %s411_s15 = sadd.s32 %s2783_s10, %s2011_s14  ;;  %s2028_s8 = sshll.u32 %s3274_s21, 1 }
  0x1a   : > { %s2013_s16 = sshll.u32 %s411_s15, 2  ;;  %s442_s11 = sadd.s32 %s2028_s8, %s2783_s10 }
  0x1b   : > { %v481_v5 = vmul.f32 %v2237_v2, %v2802_v0  ;;  %v482_v6 = vmul.f32 %v2238_v3, %v2802_v0  ;;  %s413_s20 = scalar_lea.vmem %s3234_s0, %s2013_s16  ;;  %s2822_s25 = scalar_lea.vmem %s3240_s6, %s2013_s16 }
  0x1c   : > { %v2240_v9 = vld [vmem:[%s413_s20] sm:$0xff]   ;;  %v2279_v10 = vld [vmem:[%s413_s20 + $0x8] sm:$0xff]   ;;  %v2280_v11 = vld [vmem:[%s413_s20 + $0x10] sm:$0xff]   ;;  %s2030_s30 = sshll.u32 %s442_s11, 2 }
  0x1d   : > { %v489_v7 = vadd.f32 %v2809_v4, %v481_v5  ;;  %v490_v8 = vadd.f32 %v2809_v4, %v482_v6  ;;  %v2241_v14 = vunpack.c.l.bf16 %v2240_v9  ;;  %v2242_v15 = vunpack.c.h.bf16 %v2240_v9  ;;  %v2281_v16 = vld [vmem:[%s413_s20 + $0x18] sm:$0xff]   ;;  %s444_s10 = scalar_lea.vmem %s3236_s2, %s2030_s30 }
  0x1e   : > { %v2245_v17 = vunpack.c.l.bf16 %v2279_v10  ;;  %v2246_v18 = vunpack.c.h.bf16 %v2279_v10  ;;  %v2249_v19 = vunpack.c.l.bf16 %v2280_v11  ;;  %v2250_v20 = vunpack.c.h.bf16 %v2280_v11  ;;  %v2256_v37 = vld [vmem:[%s444_s10] sm:$0xff]  }
  0x1f   : > { %v491_v12 = vmax.f32 %v489_v7, 0.0  ;;  %v492_v13 = vmax.f32 %v490_v8, 0.0  ;;  %v511_v22 = vmul.f32 %v2241_v14, %v2802_v0  ;;  %v512_v23 = vmul.f32 %v2242_v15, %v2802_v0 }
  0x20   : > { %v2253_v24 = vunpack.c.l.bf16 %v2281_v16  ;;  %v513_v25 = vmul.f32 %v2245_v17, %v2802_v0  ;;  %v514_v26 = vmul.f32 %v2246_v18, %v2802_v0  ;;  %v515_v27 = vmul.f32 %v2249_v19, %v2802_v0 }
  0x21   : > { %v493_v21 = vpack.c.bf16 %v492_v13, %v491_v12  ;;  %v516_v28 = vmul.f32 %v2250_v20, %v2802_v0  ;;  %v519_v29 = vadd.f32 %v2809_v4, %v511_v22  ;;  %v520_v30 = vadd.f32 %v2809_v4, %v512_v23 }
  0x22   : > { %v2254_v31 = vunpack.c.h.bf16 %v2281_v16  ;;  %v517_v32 = vmul.f32 %v2253_v24, %v2802_v0  ;;  %v521_v33 = vadd.f32 %v2809_v4, %v513_v25  ;;  %v522_v34 = vadd.f32 %v2809_v4, %v514_v26 }
  0x23   : > { %494 = vst [vmem:[#allocation2 + $0x8] sm:$0xff] %v493_v21  ;;  %v523_v35 = vadd.f32 %v2809_v4, %v515_v27  ;;  %v524_v36 = vadd.f32 %v2809_v4, %v516_v28  ;;  %v527_v38 = vmax.f32 %v519_v29, 0.0  ;;  %v528_v39 = vmax.f32 %v520_v30, 0.0 }
  0x24   : > { %v518_v40 = vmul.f32 %v2254_v31, %v2802_v0  ;;  %v525_v41 = vadd.f32 %v2809_v4, %v517_v32  ;;  %v529_v42 = vmax.f32 %v521_v33, 0.0  ;;  %v530_v43 = vmax.f32 %v522_v34, 0.0  ;;  %561 = vst [vmem:[#allocation2 + $0x8] sm:$0xff] (!%p2039_p11), %v2707_v62 }
  0x25   : > { %v531_v44 = vmax.f32 %v523_v35, 0.0  ;;  %v532_v45 = vmax.f32 %v524_v36, 0.0  ;;  %v535_v46 = vpack.c.bf16 %v528_v39, %v527_v38  ;;  %v2257_v49 = vunpack.c.l.bf16 %v2256_v37 }
  0x26   : > { %v526_v47 = vadd.f32 %v2809_v4, %v518_v40  ;;  %v533_v48 = vmax.f32 %v525_v41, 0.0  ;;  %v536_v50 = vpack.c.bf16 %v530_v43, %v529_v42  ;;  %v2258_v52 = vunpack.c.h.bf16 %v2256_v37 }
  0x27   : > { %v537_v51 = vpack.c.bf16 %v532_v45, %v531_v44  ;;  %540 = vst [vmem:[#allocation2 + $0x20] sm:$0xff] %v535_v46  ;;  %v548_v54 = vmul.f32 %v2257_v49, %v2802_v0 }
  0x28   : > { %v534_v53 = vmax.f32 %v526_v47, 0.0  ;;  %541 = vst [vmem:[#allocation2 + $0x38] sm:$0xff] %v536_v50  ;;  %v549_v55 = vmul.f32 %v2258_v52, %v2802_v0 }
  0x29   : > { %542 = vst [vmem:[#allocation2 + $0x50] sm:$0xff] %v537_v51  ;;  %v550_v57 = vadd.f32 %v2809_v4, %v548_v54 }
  0x2a   : > { %v538_v56 = vpack.c.bf16 %v534_v53, %v533_v48  ;;  %v551_v58 = vadd.f32 %v2809_v4, %v549_v55  ;;  %560 = sbr.rel (%p2039_p11) target bundleno = 49 (0x31), region = 48 }
  0x2b   : > { %v552_v59 = vmax.f32 %v550_v57, 0.0 }
  0x2c   : > { %543 = vst [vmem:[#allocation2 + $0x68] sm:$0xff] %v538_v56  ;;  %v553_v60 = vmax.f32 %v551_v58, 0.0 }
  0x2e   : > { %v554_v61 = vpack.c.bf16 %v553_v60, %v552_v59 }
  0x30   : > { %556 = vst [vmem:[#allocation2 + $0x80] sm:$0xff] %v554_v61 }
  0x31 PF: > { %p2040_p12 = scmp.ne.s32.totalorder %s2689_s24, 3 }
  0x32   : > { %v2708_v63 = vmov (!%p2040_p12), 0  }
  0x33   : > { %565 = sbr.rel (%p2040_p12) target bundleno = 58 (0x3a), region = 52  ;;  %566 = vst [vmem:[#allocation2 + $0x80] sm:$0xff] (!%p2040_p12), %v2708_v63 }
  0x3a PF: > { %v2595_v0 = vld [vmem:[%s3239_s5 + $0x100] sm:$0xff]   ;;  %v2598_v3 = vld [vmem:[%s3239_s5 + $0x108] sm:$0xff]   ;;  %v2601_v6 = vld [vmem:[%s3239_s5 + $0x110] sm:$0xff]   ;;  %vm573_vm0 = vcmask 1040384   ;;  %vm663_vm1 = vcmask 1047559   ;;  %vm642_vm7 = vcmask 1047552  }
  0x3b   : > { %v2596_v1 = vld [vmem:[%s3239_s5 + $0x140] sm:$0xff]   ;;  %2285 = vmatprep.subr.bf16.mxu0 %v2595_v0  ;;  %v2599_v4 = vld [vmem:[%s3239_s5 + $0x148] sm:$0xff]   ;;  %v2602_v7 = vld [vmem:[%s3239_s5 + $0x150] sm:$0xff]   ;;  %vm574_vm2 = vsmask.f32 256 }
  0x3c   : > { %v2597_v2 = vld [vmem:[%s3239_s5 + $0xc0] sm:$0xff]   ;;  %2441 = vmatprep.subr.bf16.mxu1 %v2596_v1  ;;  %v2600_v5 = vld [vmem:[%s3239_s5 + $0xc8] sm:$0xff]   ;;  %v2603_v8 = vld [vmem:[%s3239_s5 + $0xd0] sm:$0xff]   ;;  %vm643_vm4 = vsmask.f32 7938 }
  0x3d   : > { %2286 = vmatpush3.bf16.msra.mxu0 %v2597_v2  ;;  %2442 = vmatpush3.bf16.msra.mxu1 %v2596_v1  ;;  %v2604_v9 = vld [vmem:[%s3239_s5 + $0x118] sm:$0xff]   ;;  %v2607_v12 = vld [vmem:[%s3239_s5 + $0x120] sm:$0xff]   ;;  %v2610_v15 = vld [vmem:[%s3239_s5 + $0x128] sm:$0xff]   ;;  %vm664_vm5 = vsmask.f32 7966 }
  0x3e   : > { %2287 = vmatprep.subr.bf16.mxu0 %v2598_v3  ;;  %2443 = vmatprep.subr.bf16.mxu1 %v2599_v4  ;;  %v2605_v10 = vld [vmem:[%s3239_s5 + $0x158] sm:$0xff]   ;;  %v2608_v13 = vld [vmem:[%s3239_s5 + $0x160] sm:$0xff]   ;;  %v2611_v16 = vld [vmem:[%s3239_s5 + $0x168] sm:$0xff]   ;;  %vm702_vm6 = vsmask.f32 7424 }
  0x3f   : > { %v2606_v11 = vld [vmem:[%s3239_s5 + $0xd8] sm:$0xff]   ;;  %v2609_v14 = vld [vmem:[%s3239_s5 + $0xe0] sm:$0xff]   ;;  %v2612_v17 = vld [vmem:[%s3239_s5 + $0xe8] sm:$0xff]  }
  0x40   : > { %v2613_v18 = vld [vmem:[%s3239_s5 + $0x130] sm:$0xff]   ;;  %v2616_v21 = vld [vmem:[%s3239_s5 + $0x138] sm:$0xff]   ;;  %v2921_v23 = vld [vmem:[#allocation2 + $0x20] sm:$0xff] }
  0x41   : > { %2288 = vmatpush3.bf16.msra.mxu0 %v2600_v5  ;;  %2444 = vmatpush3.bf16.msra.mxu1 %v2599_v4  ;;  %v2614_v19 = vld [vmem:[%s3239_s5 + $0x170] sm:$0xff]   ;;  %v2617_v22 = vld [vmem:[%s3239_s5 + $0x178] sm:$0xff]   ;;  %vm2923_vm3 = vmand %vm573_vm0, %vm574_vm2  ;;  %v602_v26 = vshrl.u32 %v2921_v23, 16  ;;  %v605_v27 = vshll.u32 %v2921_v23, 16 }
  0x42   : > { %2289 = vmatprep.subr.bf16.mxu0 %v2601_v6  ;;  %2445 = vmatprep.subr.bf16.mxu1 %v2602_v7  ;;  %v2615_v20 = vld [vmem:[%s3239_s5 + $0xf0] sm:$0xff]   ;;  %v579_v24 = vld [vmem:[#allocation2 + $0x18] sm:$0x1]  ;;  %v669_v30 = vld [vmem:[#allocation2 + $0x28] sm:$0x80] }
  0x43   : > { %v2618_v28 = vld [vmem:[%s3239_s5 + $0xf8] sm:$0xff]   ;;  %1019 = vmatprep.mubr.bf16.mxu0 %v2921_v23  ;;  %v580_v29 = vsel %vm2923_vm3, 0, %v579_v24  ;;  %v604_v31 = vrot.slane %v602_v26, 7  ;;  %vm2936_vm8 = vmand %vm663_vm1, %vm664_vm5  ;;  %v2619_v33 = vld [vmem:[%s3239_s5 + $0x40] sm:$0xff]   ;;  %v686_v36 = vrot.slane %v605_v27, 1 }
  0x44   : > { %581 = vst [vmem:[#allocation2 + $0x18] sm:$0x1] %v580_v29  ;;  %v670_v34 = vsel %vm2936_vm8, 0, %v669_v30  ;;  %v2620_v35 = vld [vmem:[%s3239_s5 + $0x80] sm:$0xff]   ;;  %v2948_v37 = vld [vmem:[#allocation2 + $0x38] sm:$0xff]  ;;  %vm2952_vm9 = vmand %vm642_vm7, %vm643_vm4 }
  0x45   : > { %2290 = vmatpush3.bf16.msra.mxu0 %v2603_v8  ;;  %2446 = vmatpush3.bf16.msra.mxu1 %v2602_v7  ;;  %671 = vst [vmem:[#allocation2 + $0x28] sm:$0x80] %v670_v34  ;;  %v672_v38 = vld [vmem:[#allocation2 + $0x40] sm:$0x80]  ;;  %v612_v40 = vshll.u32 %v2948_v37, 16  ;;  %v607_v42 = vor.u32 %v605_v27, %v604_v31  ;;  %vm2961_vm10 = vmand %vm642_vm7, %vm702_vm6  ;;  %v609_v44 = vshrl.u32 %v2948_v37, 16  ;;  %v687_v47 = vor.u32 %v686_v36, %v602_v26 }
  0x46   : > { %2291 = vmatprep.subr.bf16.mxu0 %v2604_v9  ;;  %2447 = vmatprep.subr.bf16.mxu1 %v2605_v10  ;;  %v673_v41 = vsel %vm2936_vm8, 0, %v672_v38  ;;  %v2621_v46 = vld [vmem:[%s3239_s5] sm:$0xff]   ;;  %v2622_v48 = vld [vmem:[%s3239_s5 + $0x48] sm:$0xff]   ;;  %v582_v50 = vld [vmem:[#allocation2 + $0x30] sm:$0x1] }
  0x47   : > { %674 = vst [vmem:[#allocation2 + $0x40] sm:$0x80] %v673_v41  ;;  %v688_v45 = vrot.slane %v612_v40, 1  ;;  %v583_v53 = vsel %vm2923_vm3, 0, %v582_v50  ;;  %v2623_v55 = vld [vmem:[%s3239_s5 + $0x88] sm:$0xff]   ;;  %v611_v57 = vrot.slane %v609_v44, 7 }
  0x48   : > { %v2624_v56 = vld [vmem:[%s3239_s5 + $0x8] sm:$0xff]   ;;  %584 = vst [vmem:[#allocation2 + $0x30] sm:$0x1] %v583_v53  ;;  %v2625_v59 = vld [vmem:[%s3239_s5 + $0x50] sm:$0xff]   ;;  %v2628_v3 = vld [vmem:[%s3239_s5 + $0x58] sm:$0xff]  }
  0x49   : > { %2292 = vmatpush3.bf16.msra.mxu0 %v2606_v11  ;;  %2448 = vmatpush3.bf16.msra.mxu1 %v2605_v10  ;;  %v689_v52 = vor.u32 %v688_v45, %v609_v44  ;;  %v614_v62 = vor.u32 %v612_v40, %v611_v57  ;;  %v2626_v63 = vld [vmem:[%s3239_s5 + $0x90] sm:$0xff]   ;;  %v585_v1 = vld [vmem:[#allocation2 + $0x48] sm:$0x1]  ;;  %v2629_v10 = vld [vmem:[%s3239_s5 + $0x98] sm:$0xff]  }
  0x4a   : > { %2293 = vmatprep.subr.bf16.mxu0 %v2607_v12  ;;  %2449 = vmatprep.subr.bf16.mxu1 %v2608_v13  ;;  %v3005_v0 = vld [vmem:[#allocation2 + $0x50] sm:$0xff]  ;;  %v586_v4 = vsel %vm2923_vm3, 0, %v585_v1  ;;  %v2630_v11 = vld [vmem:[%s3239_s5 + $0x18] sm:$0xff]   ;;  %v2635_v30 = vld [vmem:[%s3239_s5 + $0xa8] sm:$0xff]  }
  0x4b   : > { %v648_v49 = vld [vmem:[#allocation2 + $0x18] sm:$0xff]  ;;  %v2627_v2 = vld [vmem:[%s3239_s5 + $0x10] sm:$0xff]   ;;  %v616_v5 = vshrl.u32 %v3005_v0, 16  ;;  %587 = vst [vmem:[#allocation2 + $0x48] sm:$0x1] %v586_v4  ;;  %v619_v7 = vshll.u32 %v3005_v0, 16 }
  0x4c   : > { %v2974_v51 = vsel %vm2952_vm9, %v607_v42, %v648_v49  ;;  %v707_v54 = vld [vmem:[#allocation2 + $0x28] sm:$0xff]  ;;  %v2637_v40 = vld [vmem:[%s3239_s5 + $0x70] sm:$0xff]   ;;  %v576_v45 = vld [vmem:[#allocation2] sm:$0x1] }
  0x4d   : > { %2294 = vmatpush3.bf16.msra.mxu0 %v2609_v14  ;;  %2450 = vmatpush3.bf16.msra.mxu1 %v2608_v13  ;;  %650 = vst [vmem:[#allocation2 + $0x18] sm:$0xff] %v2974_v51  ;;  %v2988_v58 = vsel %vm2961_vm10, %v687_v47, %v707_v54  ;;  %v618_v9 = vrot.slane %v616_v5, 7  ;;  %v2631_v13 = vld [vmem:[%s3239_s5 + $0x60] sm:$0xff]   ;;  %v690_v26 = vrot.slane %v619_v7, 1  ;;  %v2636_v31 = vld [vmem:[%s3239_s5 + $0x28] sm:$0xff]   ;;  %v2638_v41 = vld [vmem:[%s3239_s5 + $0xb0] sm:$0xff]  }
  0x4e   : > { %2295 = vmatprep.subr.bf16.mxu0 %v2610_v15  ;;  %2451 = vmatprep.subr.bf16.mxu1 %v2611_v16  ;;  %709 = vst [vmem:[#allocation2 + $0x28] sm:$0xff] %v2988_v58  ;;  %v710_v60 = vld [vmem:[#allocation2 + $0x40] sm:$0xff]  ;;  %v2639_v42 = vld [vmem:[%s3239_s5 + $0x30] sm:$0xff]   ;;  %v723_v44 = vld [vmem:[#allocation2 + $0x8] sm:$0xff]  ;;  %v577_v53 = vsel %vm2923_vm3, 0, %v576_v45 }
  0x4f   : > { %2457 = vmatprep.mubr.bf16.mxu1 %v2988_v58  ;;  %v2998_v61 = vsel %vm2961_vm10, %v689_v52, %v710_v60  ;;  %v651_v6 = vld [vmem:[#allocation2 + $0x30] sm:$0xff]  ;;  %v621_v12 = vor.u32 %v619_v7, %v618_v9  ;;  %v2632_v14 = vld [vmem:[%s3239_s5 + $0xa0] sm:$0xff]   ;;  %v691_v38 = vor.u32 %v690_v26, %v616_v5  ;;  %v598_v47 = vshll.u32 %v723_v44, 16  ;;  %v2640_v57 = vld [vmem:[%s3239_s5 + $0x78] sm:$0xff]   ;;  %578 = vst [vmem:[#allocation2] sm:$0x1] %v577_v53 }
  0x50   : > { %712 = vst [vmem:[#allocation2 + $0x40] sm:$0xff] %v2998_v61  ;;  %v3019_v8 = vsel %vm2952_vm9, %v614_v62, %v651_v6  ;;  %v2633_v15 = vld [vmem:[%s3239_s5 + $0x20] sm:$0xff]   ;;  %v2661_v25 = vld [vmem:[%s3239_s5 + $0x1f0] sm:$0xff]  }
  0x51   : > { %2296 = vmatpush3.bf16.msra.mxu0 %v2612_v17  ;;  %2452 = vmatpush3.bf16.msra.mxu1 %v2611_v16  ;;  %653 = vst [vmem:[#allocation2 + $0x30] sm:$0xff] %v3019_v8  ;;  %v3039_v16 = vld [vmem:[#allocation2 + $0x68] sm:$0xff]  ;;  %v588_v17 = vld [vmem:[#allocation2 + $0x60] sm:$0x1]  ;;  %v684_v60 = vrot.slane %v598_v47, 1  ;;  %v2662_v32 = vld [vmem:[%s3239_s5 + $0x230] sm:$0xff]  }
  0x52   : > { %2297 = vmatprep.subr.bf16.mxu0 %v2613_v18  ;;  %2453 = vmatprep.subr.bf16.mxu1 %v2614_v19  ;;  %v623_v18 = vshrl.u32 %v3039_v16, 16  ;;  %v2643_v5 = vld [vmem:[%s3239_s5 + $0x1c0] sm:$0xff]  }
  0x53   : > { %v2644_v6 = vld [vmem:[%s3239_s5 + $0x200] sm:$0xff]  }
  0x54   : > { %v625_v29 = vrot.slane %v623_v18, 7  ;;  %v2645_v7 = vld [vmem:[%s3239_s5 + $0x180] sm:$0xff]  }
  0x55   : > { %2298 = vmatpush3.bf16.msra.mxu0 %v2615_v20  ;;  %2454 = vmatpush3.bf16.msra.mxu1 %v2614_v19  ;;  %v626_v19 = vshll.u32 %v3039_v16, 16  ;;  %v675_v20 = vld [vmem:[#allocation2 + $0x58] sm:$0x80]  ;;  %v572_v26 = vld [vmem:[#allocation2 + $0x80] sm:$0xff] }
  0x56   : > { %2299 = vmatprep.subr.bf16.mxu0 %v2616_v21  ;;  %2455 = vmatprep.subr.bf16.mxu1 %v2617_v22  ;;  %v654_v21 = vld [vmem:[#allocation2 + $0x48] sm:$0xff]  ;;  %v676_v24 = vsel %vm2936_vm8, 0, %v675_v20  ;;  %v645_v9 = vld [vmem:[#allocation2] sm:$0xff]  ;;  %v2654_v20 = vld [vmem:[%s3239_s5 + $0x198] sm:$0xff]  }
  0x57   : > { %v3049_v27 = vsel %vm2952_vm9, %v621_v12, %v654_v21  ;;  %677 = vst [vmem:[#allocation2 + $0x58] sm:$0x80] %v676_v24  ;;  %v628_v36 = vor.u32 %v626_v19, %v625_v29  ;;  %v2655_v21 = vld [vmem:[%s3239_s5 + $0x1e0] sm:$0xff]   ;;  %v2658_v24 = vld [vmem:[%s3239_s5 + $0x1e8] sm:$0xff]   ;;  %v633_v29 = vshll.u32 %v572_v26, 16 }
  0x58   : > { %656 = vst [vmem:[#allocation2 + $0x48] sm:$0xff] %v3049_v27 }
  0x59   : > { %2300 = vmatpush3.bf16.msra.mxu0 %v2618_v28  ;;  %2456 = vmatpush3.bf16.msra.mxu1 %v2617_v22  ;;  %v589_v22 = vsel %vm2923_vm3, 0, %v588_v17  ;;  %v2634_v28 = vld [vmem:[%s3239_s5 + $0x68] sm:$0xff]   ;;  %v2649_v17 = vld [vmem:[%s3239_s5 + $0x1d0] sm:$0xff]  }
  0x5a   : > { %2337 = vmatprep.subr.bf16.mxu0 %v2619_v33  ;;  %2465 = vmatprep.subr.bf16.mxu1 %v2620_v35  ;;  %590 = vst [vmem:[#allocation2 + $0x60] sm:$0x1] %v589_v22  ;;  %v678_v33 = vld [vmem:[#allocation2 + $0x70] sm:$0x80]  ;;  %v2657_v22 = vld [vmem:[%s3239_s5 + $0x1a0] sm:$0xff]  }
  0x5b   : > { %v679_v34 = vsel %vm2936_vm8, 0, %v678_v33 }
  0x5c   : > { %1020 = vmatmul.mubr.bf16.vlgmr.msra.gmra.mrb[0].mxu0 %v2974_v51  ;;  %2458 = vmatmul.mubr.bf16.vlgmr.msra.gmra.mrb[0].mxu1 %v2998_v61  ;;  %680 = vst [vmem:[#allocation2 + $0x70] sm:$0x80] %v679_v34  ;;  %v2659_v34 = vld [vmem:[%s3239_s5 + $0x228] sm:$0xff]  }
  0x5d   : > { %2338 = vmatpush3.bf16.msra.mxu0 %v2621_v46  ;;  %1027 = vmatprep.mubr.bf16.mxu0 %v2948_v37  ;;  %v595_v46 = vshrl.u32 %v723_v44, 16 }
  0x5e   : > { %2339 = vmatprep.subr.bf16.mxu0 %v2622_v48  ;;  %2466 = vmatpush3.bf16.msra.mxu1 %v2620_v35  ;;  %v692_v35 = vrot.slane %v626_v19, 1  ;;  %v666_v48 = vld [vmem:[#allocation2 + $0x10] sm:$0x80]  ;;  %v713_v50 = vld [vmem:[#allocation2 + $0x58] sm:$0xff] }
  0x5f   : > { %2467 = vmatprep.subr.bf16.mxu1 %v2623_v55  ;;  %v667_v54 = vsel %vm2936_vm8, 0, %v666_v48  ;;  %v685_v4 = vor.u32 %v684_v60, %v595_v46  ;;  %v2651_v19 = vld [vmem:[%s3239_s5 + $0x190] sm:$0xff]   ;;  %v2666_v48 = vld [vmem:[%s3239_s5 + $0x1b8] sm:$0xff]  }
  0x60   : > { %v693_v52 = vor.u32 %v692_v35, %v623_v18  ;;  %668 = vst [vmem:[#allocation2 + $0x10] sm:$0x80] %v667_v54  ;;  %v2650_v18 = vld [vmem:[%s3239_s5 + $0x210] sm:$0xff]   ;;  %v2660_v35 = vld [vmem:[%s3239_s5 + $0x1a8] sm:$0xff]  }
  0x61   : > { %2340 = vmatpush3.bf16.msra.mxu0 %v2624_v56  ;;  %v657_v49 = vld [vmem:[#allocation2 + $0x60] sm:$0xff]  ;;  %v3084_v56 = vsel %vm2961_vm10, %v691_v38, %v713_v50 }
  0x62   : > { %2341 = vmatprep.subr.bf16.mxu0 %v2625_v59  ;;  %2468 = vmatpush3.bf16.msra.mxu1 %v2623_v55  ;;  %v3080_v55 = vsel %vm2952_vm9, %v628_v36, %v657_v49  ;;  %v597_v59 = vrot.slane %v595_v46, 7  ;;  %715 = vst [vmem:[#allocation2 + $0x58] sm:$0xff] %v3084_v56  ;;  %v694_v36 = vrot.slane %v633_v29, 1 }
  0x63   : > { %2469 = vmatprep.subr.bf16.mxu1 %v2626_v63  ;;  %659 = vst [vmem:[#allocation2 + $0x60] sm:$0xff] %v3080_v55  ;;  %2461 = vmatprep.mubr.bf16.mxu1 %v3084_v56  ;;  %v716_v62 = vld [vmem:[#allocation2 + $0x70] sm:$0xff] }
  0x64   : > { %1028 = vmatmul.mubr.bf16.gmra.mrb[4].mxu0 %v3019_v8  ;;  %v3098_v1 = vsel %vm2961_vm10, %v693_v52, %v716_v62 }
  0x65   : > { %2342 = vmatpush3.bf16.msra.mxu0 %v2627_v2  ;;  %1035 = vmatprep.mubr.bf16.mxu0 %v3005_v0  ;;  %v2642_v2 = vld [vmem:[%s3239_s5 + $0x38] sm:$0xff]   ;;  %718 = vst [vmem:[#allocation2 + $0x70] sm:$0xff] %v3098_v1 }
  0x66   : > { %2343 = vmatprep.subr.bf16.mxu0 %v2628_v3  ;;  %2470 = vmatpush3.bf16.msra.mxu1 %v2626_v63  ;;  %v2641_v63 = vld [vmem:[%s3239_s5 + $0xb8] sm:$0xff]   ;;  %v600_v3 = vor.u32 %v598_v47, %v597_v59 }
  0x67   : > { %2471 = vmatprep.subr.bf16.mxu1 %v2629_v10  ;;  %2462 = vmatmul.mubr.bf16.gmra.mrb[4].mxu1 %v3098_v1  ;;  %v2665_v47 = vld [vmem:[%s3239_s5 + $0x238] sm:$0xff]  }
  0x69   : > { %2344 = vmatpush3.bf16.msra.mxu0 %v2630_v11  ;;  %v646_v11 = vsel %vm2952_vm9, %v600_v3, %v645_v9 }
  0x6a   : > { %2345 = vmatprep.subr.bf16.mxu0 %v2631_v13  ;;  %2472 = vmatpush3.bf16.msra.mxu1 %v2629_v10  ;;  %v704_v10 = vld [vmem:[#allocation2 + $0x10] sm:$0xff]  ;;  %v2646_v13 = vld [vmem:[%s3239_s5 + $0x1c8] sm:$0xff]   ;;  %647 = vst [vmem:[#allocation2] sm:$0xff] %v646_v11 }
  0x6b   : > { %2473 = vmatprep.subr.bf16.mxu1 %v2632_v14  ;;  %v705_v12 = vsel %vm2961_vm10, %v685_v4, %v704_v10 }
  0x6c   : > { %1036 = vmatmul.mubr.bf16.gmra.mrb[8].mxu0 %v3049_v27  ;;  %706 = vst [vmem:[#allocation2 + $0x10] sm:$0xff] %v705_v12  ;;  %2481 = vmatprep.mubr.bf16.mxu1 %v705_v12 }
  0x6d   : > { %2346 = vmatpush3.bf16.msra.mxu0 %v2633_v15  ;;  %1043 = vmatprep.mubr.bf16.mxu0 %v3039_v16  ;;  %v2648_v15 = vld [vmem:[%s3239_s5 + $0x188] sm:$0xff]  }
  0x6e   : > { %2347 = vmatprep.subr.bf16.mxu0 %v2634_v28  ;;  %2474 = vmatpush3.bf16.msra.mxu1 %v2632_v14  ;;  %v2647_v14 = vld [vmem:[%s3239_s5 + $0x208] sm:$0xff]   ;;  %v630_v28 = vshrl.u32 %v572_v26, 16 }
  0x6f   : > { %2475 = vmatprep.subr.bf16.mxu1 %v2635_v30 }
  0x70   : > { %v632_v38 = vrot.slane %v630_v28, 7 }
  0x71   : > { %2348 = vmatpush3.bf16.msra.mxu0 %v2636_v31  ;;  %v591_v31 = vld [vmem:[#allocation2 + $0x78] sm:$0x1] }
  0x72   : > { %2349 = vmatprep.subr.bf16.mxu0 %v2637_v40  ;;  %2476 = vmatpush3.bf16.msra.mxu1 %v2635_v30  ;;  %v681_v30 = vld [vmem:[#allocation2 + $0x88] sm:$0x80]  ;;  %v592_v33 = vsel %vm2923_vm3, 0, %v591_v31  ;;  %v2663_v40 = vld [vmem:[%s3239_s5 + $0x1b0] sm:$0xff]  }
  0x73   : > { %2477 = vmatprep.subr.bf16.mxu1 %v2638_v41  ;;  %593 = vst [vmem:[#allocation2 + $0x78] sm:$0x1] %v592_v33 }
  0x74   : > { %1044 = vmatmul.mubr.bf16.gmra.mrb[12].mxu0 %v3080_v55 }
  0x75   : > { %2350 = vmatpush3.bf16.msra.mxu0 %v2639_v42  ;;  %1293 = vmatprep.mubr.bf16.mxu0 %v723_v44  ;;  %v635_v42 = vor.u32 %v633_v29, %v632_v38  ;;  %v2664_v44 = vld [vmem:[%s3239_s5 + $0x1f8] sm:$0xff]  }
  0x76   : > { %2351 = vmatprep.subr.bf16.mxu0 %v2640_v57  ;;  %2478 = vmatpush3.bf16.msra.mxu1 %v2638_v41  ;;  %v695_v41 = vor.u32 %v694_v36, %v630_v28 }
  0x77   : > { %2479 = vmatprep.subr.bf16.mxu1 %v2641_v63 }
  0x79   : > { %2352 = vmatpush3.bf16.msra.mxu0 %v2642_v2 }
  0x7a   : > { %2389 = vmatprep.subr.bf16.mxu0 %v2643_v5  ;;  %2480 = vmatpush3.bf16.msra.mxu1 %v2641_v63  ;;  %v660_v46 = vld [vmem:[#allocation2 + $0x78] sm:$0xff] }
  0x7b   : > { %2489 = vmatprep.subr.bf16.mxu1 %v2644_v6  ;;  %v661_v50 = vsel %vm2952_vm9, %v635_v42, %v660_v46 }
  0x7c   : > { %1294 = vmatmul.mubr.bf16.vlgmr.msra.gmra.mrb[16].mxu0 %v646_v11  ;;  %662 = vst [vmem:[#allocation2 + $0x78] sm:$0xff] %v661_v50 }
  0x7d   : > { %2390 = vmatpush3.bf16.msra.mxu0 %v2645_v7  ;;  %1301 = vmatprep.mubr.bf16.mxu0 %v2921_v23  ;;  %v2652_v23 = vld [vmem:[%s3239_s5 + $0x1d8] sm:$0xff]  }
  0x7e   : > { %2391 = vmatprep.subr.bf16.mxu0 %v2646_v13  ;;  %2482 = vmatmul.mubr.bf16.vlgmr.msra.gmra.mrb[0].mxu1 %v2988_v58  ;;  %v2653_v58 = vld [vmem:[%s3239_s5 + $0x218] sm:$0xff]  }
  0x7f   : > { %2490 = vmatpush3.bf16.msra.mxu1 %v2644_v6  ;;  %2485 = vmatprep.mubr.bf16.mxu1 %v2998_v61 }
  0x80   : > { %2491 = vmatprep.subr.bf16.mxu1 %v2647_v14 }
  0x81   : > { %2392 = vmatpush3.bf16.msra.mxu0 %v2648_v15 }
  0x82   : > { %2393 = vmatprep.subr.bf16.mxu0 %v2649_v17 }
  0x83   : > { %2492 = vmatpush3.bf16.msra.mxu1 %v2647_v14 }
  0x84   : > { %1302 = vmatmul.mubr.bf16.gmra.mrb[20].mxu0 %v2974_v51  ;;  %2493 = vmatprep.subr.bf16.mxu1 %v2650_v18  ;;  %v2656_v51 = vld [vmem:[%s3239_s5 + $0x220] sm:$0xff]  }
  0x85   : > { %2394 = vmatpush3.bf16.msra.mxu0 %v2651_v19  ;;  %1309 = vmatprep.mubr.bf16.mxu0 %v2948_v37 }
  0x86   : > { %2395 = vmatprep.subr.bf16.mxu0 %v2652_v23  ;;  %2486 = vmatmul.mubr.bf16.gmra.mrb[4].mxu1 %v3084_v56 }
  0x87   : > { %2494 = vmatpush3.bf16.msra.mxu1 %v2650_v18  ;;  %2505 = vmatprep.mubr.bf16.mxu1 %v2998_v61  ;;  %v682_v61 = vsel %vm2936_vm8, 0, %v681_v30 }
  0x88   : > { %2495 = vmatprep.subr.bf16.mxu1 %v2653_v58  ;;  %683 = vst [vmem:[#allocation2 + $0x88] sm:$0x80] %v682_v61 }
  0x89   : > { %2396 = vmatpush3.bf16.msra.mxu0 %v2654_v20 }
  0x8a   : > { %2397 = vmatprep.subr.bf16.mxu0 %v2655_v21 }
  0x8b   : > { %2496 = vmatpush3.bf16.msra.mxu1 %v2653_v58 }
  0x8c   : > { %1310 = vmatmul.mubr.bf16.gmra.mrb[24].mxu0 %v3019_v8  ;;  %2497 = vmatprep.subr.bf16.mxu1 %v2656_v51 }
  0x8d   : > { %2398 = vmatpush3.bf16.msra.mxu0 %v2657_v22  ;;  %1317 = vmatprep.mubr.bf16.mxu0 %v3005_v0 }
  0x8e   : > { %2399 = vmatprep.subr.bf16.mxu0 %v2658_v24 }
  0x8f   : > { %2498 = vmatpush3.bf16.msra.mxu1 %v2656_v51  ;;  %v719_v45 = vld [vmem:[#allocation2 + $0x88] sm:$0xff] }
  0x90   : > { %2499 = vmatprep.subr.bf16.mxu1 %v2659_v34  ;;  %v720_v49 = vsel %vm2961_vm10, %v695_v41, %v719_v45 }
  0x91   : > { %2400 = vmatpush3.bf16.msra.mxu0 %v2660_v35  ;;  %721 = vst [vmem:[#allocation2 + $0x88] sm:$0xff] %v720_v49 }
  0x92   : > { %2401 = vmatprep.subr.bf16.mxu0 %v2661_v25 }
  0x93   : > { %2500 = vmatpush3.bf16.msra.mxu1 %v2659_v34 }
  0x94   : > { %1318 = vmatmul.mubr.bf16.gmra.mrb[28].mxu0 %v3049_v27  ;;  %2501 = vmatprep.subr.bf16.mxu1 %v2662_v32 }
  0x95   : > { %2402 = vmatpush3.bf16.msra.mxu0 %v2663_v40  ;;  %1629 = vmatprep.mubr.bf16.mxu0 %v2948_v37 }
  0x96   : > { %2403 = vmatprep.subr.bf16.mxu0 %v2664_v44 }
  0x97   : > { %2502 = vmatpush3.bf16.msra.mxu1 %v2662_v32 }
  0x98   : > { %2503 = vmatprep.subr.bf16.mxu1 %v2665_v47 }
  0x99   : > { %2404 = vmatpush3.bf16.msra.mxu0 %v2666_v48 }
  0x9b   : > { %2504 = vmatpush3.bf16.msra.mxu1 %v2665_v47 }
  0x9c   : > { %1630 = vmatmul.mubr.bf16.vlgmr.msra.gmra.mrb[32].mxu0 %v3019_v8 }
  0x9d   : > { %1637 = vmatprep.mubr.bf16.mxu0 %v3005_v0 }
  0x9e   : > { %2506 = vmatmul.mubr.bf16.vlgmr.msra.gmra.mrb[0].mxu1 %v3084_v56 }
  0x9f   : > { %2509 = vmatprep.mubr.bf16.mxu1 %v3098_v1 }
  0xa4   : > { %1638 = vmatmul.mubr.bf16.gmra.mrb[36].mxu0 %v3049_v27 }
  0xa5   : > { %1645 = vmatprep.mubr.bf16.mxu0 %v3039_v16 }
  0xa6   : > { %2510 = vmatmul.mubr.bf16.gmra.mrb[4].mxu1 %v720_v49 }
  0xac   : > { %1646 = vmatmul.mubr.bf16.gmra.mrb[40].mxu0 %v3080_v55 }
  0xad   : > { %1653 = vmatprep.mubr.bf16.mxu0 %v572_v26 }
  0xb4   : > { %1654 = vmatmul.mubr.bf16.gmra.mrb[44].mxu0 %v661_v50 }
 0x12f   : > { %v2301_v37 = vpop.f32.mrb[0].mxu0 }
 0x130   : > { %v2302_v39 = vpop.f32.mrb[1].mxu0 }
 0x131   : > { %v2303_v43 = vadd.f32 %v2302_v39, %v2301_v37  ;;  %v2304_v52 = vpop.f32.mrb[2].mxu0 }
 0x132   : > { %v2305_v8 = vpop.f32.mrb[3].mxu0 }
 0x133   : > { %v2306_v53 = vadd.f32 %v2305_v8, %v2304_v52 }
 0x137   : > { %v2307_v0 = vpop.f32.mrb[4].mxu0 }
 0x138   : > { %v2308_v54 = vpop.f32.mrb[5].mxu0 }
 0x139   : > { %v2309_v56 = vadd.f32 %v2308_v54, %v2307_v0  ;;  %v2310_v57 = vpop.f32.mrb[6].mxu0 }
 0x13a   : > { %v2311_v59 = vpop.f32.mrb[7].mxu0 }
 0x13b   : > { %v2312_v60 = vadd.f32 %v2311_v59, %v2310_v57 }
 0x13f   : > { %v2313_v27 = vpop.f32.mrb[8].mxu0 }
 0x140   : > { %v2314_v62 = vpop.f32.mrb[9].mxu0 }
 0x141   : > { %v2315_v16 = vadd.f32 %v2314_v62, %v2313_v27  ;;  %v2316_v63 = vpop.f32.mrb[10].mxu0 }
 0x142   : > { %v2317_v1 = vpop.f32.mrb[11].mxu0 }
 0x143   : > { %v2318_v55 = vadd.f32 %v2317_v1, %v2316_v63 }
 0x147   : > { %v2319_v2 = vpop.f32.mrb[12].mxu0 }
 0x148   : > { %v2320_v3 = vpop.f32.mrb[13].mxu0 }
 0x149   : > { %v2321_v4 = vadd.f32 %v2320_v3, %v2319_v2  ;;  %v2322_v5 = vpop.f32.mrb[14].mxu0 }
 0x14a   : > { %v2323_v6 = vpop.f32.mrb[15].mxu0 }
 0x14b   : > { %v2324_v7 = vadd.f32 %v2323_v6, %v2322_v5 }
 0x14f   : > { %v2353_v9 = vpop.f32.mrb[16].mxu0 }
 0x150   : > { %v2354_v10 = vpop.f32.mrb[17].mxu0 }
 0x151   : > { %v2355_v11 = vadd.f32 %v2354_v10, %v2353_v9  ;;  %v2356_v12 = vpop.f32.mrb[18].mxu0 }
 0x152   : > { %v2357_v13 = vpop.f32.mrb[19].mxu0 }
 0x153   : > { %v2516_v14 = vadd.f32 %v2355_v11, %v2303_v43  ;;  %v2358_v15 = vadd.f32 %v2357_v13, %v2356_v12 }
 0x155   : > { %v2522_v17 = vadd.f32 %v2358_v15, %v2306_v53 }
 0x157   : > { %v2359_v18 = vpop.f32.mrb[20].mxu0 }
 0x158   : > { %v2360_v19 = vpop.f32.mrb[21].mxu0 }
 0x159   : > { %v2361_v23 = vadd.f32 %v2360_v19, %v2359_v18  ;;  %v2362_v58 = vpop.f32.mrb[22].mxu0 }
 0x15a   : > { %v2363_v20 = vpop.f32.mrb[23].mxu0 }
 0x15b   : > { %v2513_v21 = vadd.f32 %v2361_v23, %v2309_v56  ;;  %v2364_v51 = vadd.f32 %v2363_v20, %v2362_v58 }
 0x15d   : > { %v2519_v22 = vadd.f32 %v2364_v51, %v2312_v60 }
 0x15f   : > { %v2365_v24 = vpop.f32.mrb[24].mxu0 }
 0x160   : > { %v2366_v26 = vpop.f32.mrb[25].mxu0 }
 0x161   : > { %v2367_v28 = vadd.f32 %v2366_v26, %v2365_v24  ;;  %v2368_v29 = vpop.f32.mrb[26].mxu0 }
 0x162   : > { %v2369_v30 = vpop.f32.mrb[27].mxu0 }
 0x163   : > { %v2528_v31 = vadd.f32 %v2367_v28, %v2315_v16  ;;  %v2370_v61 = vadd.f32 %v2369_v30, %v2368_v29 }
 0x165   : > { %v2534_v33 = vadd.f32 %v2370_v61, %v2318_v55 }
 0x167   : > { %v2371_v34 = vpop.f32.mrb[28].mxu0 }
 0x168   : > { %v2372_v35 = vpop.f32.mrb[29].mxu0 }
 0x169   : > { %v2373_v36 = vadd.f32 %v2372_v35, %v2371_v34  ;;  %v2374_v38 = vpop.f32.mrb[30].mxu0 }
 0x16a   : > { %v2375_v25 = vpop.f32.mrb[31].mxu0 }
 0x16b   : > { %v3207_v32 = vadd.f32 %v2373_v36, %v2321_v4  ;;  %v2376_v40 = vadd.f32 %v2375_v25, %v2374_v38 }
 0x16d   : > { %v3209_v41 = vadd.f32 %v2376_v40, %v2324_v7 }
 0x16f   : > { %v2405_v42 = vpop.f32.mrb[32].mxu0 }
 0x170   : > { %v2406_v44 = vpop.f32.mrb[33].mxu0 }
 0x171   : > { %v2407_v45 = vadd.f32 %v2406_v44, %v2405_v42  ;;  %v2408_v46 = vpop.f32.mrb[34].mxu0  ;;  %v2507_v47 = vpop.f32.mrb[0].mxu1 }
 0x172   : > { %v2409_v48 = vpop.f32.mrb[35].mxu0  ;;  %v1696_v49 = vpop.f32.mrb[1].mxu1 }
 0x173   : > { %v2517_v50 = vadd.f32 %v2516_v14, %v2407_v45  ;;  %v2410_v37 = vadd.f32 %v2409_v48, %v2408_v46  ;;  %v2508_v39 = vpop.f32.mrb[2].mxu1 }
 0x174   : > { %v1699_v52 = vpop.f32.mrb[3].mxu1 }
 0x175   : > { %v2518_v43 = vadd.f32 %v2517_v50, %v1696_v49  ;;  %v2523_v8 = vadd.f32 %v2522_v17, %v2410_v37 }
 0x177   : > { %v2524_v53 = vadd.f32 %v2523_v8, %v1699_v52  ;;  %v2411_v0 = vpop.f32.mrb[36].mxu0  ;;  %v1749_v54 = vmul.f32 %v2518_v43, %v2518_v43 }
 0x178   : > { %v2412_v56 = vpop.f32.mrb[37].mxu0 }
 0x179   : > { %v1735_v57 = vadd.f32 %v2524_v53, %v2518_v43  ;;  %v1750_v59 = vmul.f32 %v2524_v53, %v2524_v53  ;;  %v2262_v60 = vpack.c.bf16 %v2524_v53, %v2518_v43  ;;  %v2413_v27 = vadd.f32 %v2412_v56, %v2411_v0  ;;  %v2414_v62 = vpop.f32.mrb[38].mxu0  ;;  %v2511_v16 = vpop.f32.mrb[4].mxu1 }
 0x17a   : > { %v2415_v63 = vpop.f32.mrb[39].mxu0  ;;  %v1712_v2 = vpop.f32.mrb[5].mxu1 }
 0x17b   : > { %v1757_v1 = vadd.f32 %v1750_v59, %v1749_v54  ;;  %2263 = vst [vmem:[%s2822_s25] sm:$0xff] %v2262_v60   ;;  %v2514_v55 = vadd.f32 %v2513_v21, %v2413_v27  ;;  %v2416_v3 = vadd.f32 %v2415_v63, %v2414_v62  ;;  %v2512_v4 = vpop.f32.mrb[6].mxu1 }
 0x17c   : > { %v1715_v7 = vpop.f32.mrb[7].mxu1 }
 0x17d   : > { %v2515_v5 = vadd.f32 %v2514_v55, %v2507_v47  ;;  %v2520_v6 = vadd.f32 %v2519_v22, %v2416_v3 }
 0x17f   : > { %v1736_v9 = vadd.f32 %v2515_v5, %v1735_v57  ;;  %v1751_v10 = vmul.f32 %v2515_v5, %v2515_v5  ;;  %v2521_v11 = vadd.f32 %v2520_v6, %v2508_v39  ;;  %v2417_v12 = vpop.f32.mrb[40].mxu0 }
 0x180   : > { %v2418_v13 = vpop.f32.mrb[41].mxu0 }
 0x181   : > { %v1758_v14 = vadd.f32 %v1757_v1, %v1751_v10  ;;  %v1737_v15 = vadd.f32 %v2521_v11, %v1736_v9  ;;  %v1752_v17 = vmul.f32 %v2521_v11, %v2521_v11  ;;  %v2267_v18 = vpack.c.bf16 %v2521_v11, %v2515_v5  ;;  %v2420_v19 = vpop.f32.mrb[42].mxu0 }
 0x182   : > { %v2419_v23 = vadd.f32 %v2418_v13, %v2417_v12  ;;  %v2421_v58 = vpop.f32.mrb[43].mxu0 }
 0x183   : > { %v1759_v20 = vadd.f32 %v1758_v14, %v1752_v17  ;;  %2282 = vst [vmem:[%s2822_s25 + $0x8] sm:$0xff] %v2267_v18   ;;  %v2422_v21 = vadd.f32 %v2421_v58, %v2420_v19 }
 0x184   : > { %v2529_v51 = vadd.f32 %v2528_v31, %v2419_v23 }
 0x185   : > { %v2535_v24 = vadd.f32 %v2534_v33, %v2422_v21 }
 0x186   : > { %v2530_v22 = vadd.f32 %v2529_v51, %v1712_v2 }
 0x187   : > { %v2536_v26 = vadd.f32 %v2535_v24, %v1715_v7  ;;  %v2423_v28 = vpop.f32.mrb[44].mxu0 }
 0x188   : > { %v1738_v29 = vadd.f32 %v2530_v22, %v1737_v15  ;;  %v1753_v30 = vmul.f32 %v2530_v22, %v2530_v22  ;;  %v2424_v61 = vpop.f32.mrb[45].mxu0 }
 0x189   : > { %v1754_v34 = vmul.f32 %v2536_v26, %v2536_v26  ;;  %v2272_v35 = vpack.c.bf16 %v2536_v26, %v2530_v22  ;;  %v2425_v36 = vadd.f32 %v2424_v61, %v2423_v28  ;;  %v2426_v38 = vpop.f32.mrb[46].mxu0 }
 0x18a   : > { %v1760_v25 = vadd.f32 %v1759_v20, %v1753_v30  ;;  %v1739_v40 = vadd.f32 %v2536_v26, %v1738_v29  ;;  %v2427_v42 = vpop.f32.mrb[47].mxu0 }
 0x18b   : > { %2283 = vst [vmem:[%s2822_s25 + $0x10] sm:$0xff] %v2272_v35   ;;  %v2526_v44 = vadd.f32 %v3207_v32, %v2425_v36  ;;  %v2428_v45 = vadd.f32 %v2427_v42, %v2426_v38 }
 0x18c   : > { %v1761_v31 = vadd.f32 %v1760_v25, %v1754_v34 }
 0x18d   : > { %v2527_v33 = vadd.f32 %v2526_v44, %v2511_v16  ;;  %v2532_v46 = vadd.f32 %v3209_v41, %v2428_v45 }
 0x18f   : > { %v1740_v47 = vadd.f32 %v2527_v33, %v1739_v40  ;;  %v1755_v48 = vmul.f32 %v2527_v33, %v2527_v33  ;;  %v2533_v49 = vadd.f32 %v2532_v46, %v2512_v4 }
 0x191   : > { %v1762_v50 = vadd.f32 %v1761_v31, %v1755_v48  ;;  %v1741_v37 = vadd.f32 %v2533_v49, %v1740_v47  ;;  %v1756_v39 = vmul.f32 %v2533_v49, %v2533_v49  ;;  %v2277_v43 = vpack.c.bf16 %v2533_v49, %v2527_v33 }
 0x193   : > { %v1742_v52 = vrot.slane %v1741_v37, 4  ;;  %v1763_v8 = vadd.f32 %v1762_v50, %v1756_v39  ;;  %2284 = vst [vmem:[%s2822_s25 + $0x18] sm:$0xff] %v2277_v43  }
 0x195   : > { %v1743_v53 = vadd.f32 %v1742_v52, %v1741_v37  ;;  %v1764_v0 = vrot.slane %v1763_v8, 4 }
 0x197   : > { %v1744_v32 = vrot.slane %v1743_v53, 2  ;;  %v1765_v54 = vadd.f32 %v1764_v0, %v1763_v8 }
 0x199   : > { %v1745_v56 = vadd.f32 %v1744_v32, %v1743_v53  ;;  %v1766_v57 = vrot.slane %v1765_v54, 2 }
 0x19b   : > { %v1746_v59 = vrot.slane %v1745_v56, 1  ;;  %v1767_v41 = vadd.f32 %v1766_v57, %v1765_v54 }
 0x19d   : > { %v1747_v60 = vadd.f32 %v1746_v59, %v1745_v56  ;;  %v1768_v27 = vrot.slane %v1767_v41, 1 }
 0x19f   : > { %1748 = vst [vmem:[%s2790_s19] sm:$0x1] %v1747_v60  ;;  %v1769_v62 = vadd.f32 %v1768_v27, %v1767_v41 }
 0x1a1   : > { %1770 = vst [vmem:[%s2790_s19 + $0x1] sm:$0x1] %v1769_v62 }
 0x1a2 PF: > { %s18_s28 = sadd.s32 1, %s2705_s28   ;;  %s3252_s20 = sld [smem:[#allocation3_spill]] }
 0x1a3   : > { %p15_p13 = scmp.ge.s32.totalorder %s18_s28, 10   ;;  %s3253_s24 = smov %s2697_s26 }
 0x1a4   : > { %s3254_s25 = smov %s2701_s27  ;;  %s3255_s26 = smov %s3258_s29 }
 0x1a5   :  { %17 = sbr.rel (!%p15_p13) target bundleno = 3 (0x3), region = 105 }
 0x1a8   : > { %s3256_s27 = smov %s3252_s20 }

</bundles_post_ra>
